<compile_context>
chip_gen: v7x
topology: tpu7x:2x2x1
jax: 0.10.0
libtpu: 0.0.40
codegen_flags: <defaults>
</compile_context>

<pallas_src>
import functools

import jax
import jax.numpy as jnp
from jax import lax
from jax.experimental import pallas as pl
from jax.experimental.pallas import tpu as pltpu

LANE = 128
_LRN_SIZE = 5
_LRN_ALPHA = 1e-4
_LRN_K = 1.0                 # beta = 0.75 is hard-coded via the rsqrt composition below
_TILE_ROWS = 256             # target flat rows per in-kernel accumulator tile (~128 KiB f32)


def _round_up(x, m):
    return (x + m - 1) // m * m


# ----------------------------------------------------------------------------
# Kernel
# ----------------------------------------------------------------------------

def _lrn_0p75(y, *, alpha_over_n, k):
    """PyTorch LocalResponseNorm(5) with beta=0.75 on a (M, 128) lane-padded f32 tile.

    Padded channels are exactly zero (zero weight columns + zero bias + ReLU), so the
    circular lane rolls only ever bring zeros into real channels (real C <= 126).
    """
    c = y.shape[1]
    y2 = y * y
    s = y2
    for sh in (1, 2, c - 1, c - 2):          # symmetric +/-1, +/-2 window
        s = s + pltpu.roll(y2, shift=sh, axis=1)
    base = k + alpha_over_n * s
    # base ** (-0.75) == rsqrt(base) * rsqrt(sqrt(base))  (EUP ops, no exp/log)
    return y * (lax.rsqrt(base) * lax.rsqrt(jnp.sqrt(base)))


def _fused_block_kernel(x_ref, w_ref, b_ref, o_ref, *scratch, tiles, taps_off,
                        wgrid, wo, c_real, apply_lrn, pool, hpo, wpo):
    """One image: conv (tap-accumulated MXU matmuls) + bias + ReLU (+ LRN) (+ 3x3/s2 pool).

    x_ref : (R, Cin) bf16       row-flattened (padded) activation, or im2col patches.
    w_ref : (T, Cin, 128) bf16  per-tap weight matrices (Cout zero-padded to 128 lanes).
    b_ref : (1, 128) f32        bias (padding lanes zero).
    o_ref : pool -> (hpo, wpo, c_real) bf16 ; else -> (ho, wo, c_real) bf16
    scratch[0] (pool only): (>= ho*wgrid, 128) f32 VMEM holding the post-LRN conv output.
    """
    bias = b_ref[...]
    y_scr = scratch[0] if pool else None

    for r0, nrows in tiles:                       # static tiling over spatial rows
        tm = nrows * wgrid
        base = r0 * wgrid
        # Tap-innermost accumulation; bias folded into the accumulator init so no
        # separate bias pass over the tile is needed.
        acc = jnp.dot(x_ref[pl.ds(base + taps_off[0], tm), :], w_ref[0],
                      preferred_element_type=jnp.float32) + bias
        for t in range(1, len(taps_off)):
            acc = acc + jnp.dot(x_ref[pl.ds(base + taps_off[t], tm), :], w_ref[t],
                                preferred_element_type=jnp.float32)
        y = jnp.maximum(acc, 0.0)
        if apply_lrn:
            y = _lrn_0p75(y, alpha_over_n=_LRN_ALPHA / _LRN_SIZE, k=_LRN_K)
        if pool:
            y_scr[pl.ds(base, tm), :] = y         # stays in VMEM, never hits HBM
        else:
            for rr in range(nrows):               # emit only valid columns, real channels
                o_ref[r0 + rr] = y[rr * wgrid:rr * wgrid + wo, :c_real].astype(o_ref.dtype)

    if pool:
        # Fused 3x3 / stride-2 max-pool straight out of the VMEM scratch; only the
        # pooled rows (real channel count, bf16) are written to HBM.
        for pi in range(hpo):
            m = None
            for dy in range(3):
                for dx in range(3):
                    start = (2 * pi + dy) * wgrid + dx
                    v = y_scr[pl.ds(start, wpo, stride=2), :]
                    m = v if m is None else jnp.maximum(m, v)
            o_ref[pi] = m[:, :c_real].astype(o_ref.dtype)


# ----------------------------------------------------------------------------
# pallas_call wrapper
# ----------------------------------------------------------------------------

def _fused_block(x_flat, wmat, brow, *, wgrid, wo, ho, c_real, taps_off,
                 apply_lrn, pool, hpo=0, wpo=0):
    n, r, cin = x_flat.shape
    kk = wmat.shape[0]
    if apply_lrn:
        assert c_real <= 126, "lane-roll LRN requires real channels <= 126"

    rows_per_tile = max(1, _TILE_ROWS // wgrid)
    tiles, r0 = [], 0
    while r0 < ho:
        nr = min(rows_per_tile, ho - r0)
        tiles.append((r0, nr))
        r0 += nr

    kern = functools.partial(
        _fused_block_kernel, tiles=tuple(tiles), taps_off=tuple(taps_off),
        wgrid=wgrid, wo=wo, c_real=c_real, apply_lrn=apply_lrn, pool=pool,
        hpo=hpo, wpo=wpo)

    if pool:
        out_shape = jax.ShapeDtypeStruct((n, hpo, wpo, c_real), jnp.bfloat16)
        out_spec = pl.BlockSpec((None, hpo, wpo, c_real), lambda i: (i, 0, 0, 0))
        scratch = [pltpu.VMEM((_round_up(ho * wgrid, 8), LANE), jnp.float32)]
    else:
        out_shape = jax.ShapeDtypeStruct((n, ho, wo, c_real), jnp.bfloat16)
        out_spec = pl.BlockSpec((None, ho, wo, c_real), lambda i: (i, 0, 0, 0))
        scratch = []

    return pl.pallas_call(
        kern,
        grid=(n,),
        in_specs=[pl.BlockSpec((None, r, cin), lambda i: (i, 0, 0)),
                  pl.BlockSpec((kk, cin, LANE), lambda i: (0, 0, 0)),
                  pl.BlockSpec((1, LANE), lambda i: (0, 0))],
        out_specs=out_spec,
        out_shape=out_shape,
        scratch_shapes=scratch,
        compiler_params=pltpu.CompilerParams(
            dimension_semantics=("parallel",),          # images shard across TCs
            vmem_limit_bytes=32 * 1024 * 1024),
    )(x_flat, wmat, brow)


# ----------------------------------------------------------------------------
# XLA-side glue (im2col for conv1, spatial padding + flatten for s1 convs)
# ----------------------------------------------------------------------------

def _im2col_s2(x, k, stride, ho, wo):
    """(N,H,W,C) f32 -> (N, ho*wo, k*k*C) bf16 patches for a valid stride-`stride` conv."""
    cols = []
    for ky in range(k):
        for kx in range(k):
            cols.append(x[:, ky:ky + stride * ho:stride, kx:kx + stride * wo:stride, :])
    patches = jnp.concatenate(cols, axis=-1)
    return patches.reshape(x.shape[0], ho * wo, patches.shape[-1]).astype(jnp.bfloat16)


def _pad_flatten(x, pad, k):
    """Spatially pad and row-flatten an NHWC bf16 activation for the shifted-view conv."""
    n, h, w, c = x.shape
    xp = jnp.pad(x, ((0, 0), (pad, pad), (pad, pad), (0, 0)))
    hp, wp = h + 2 * pad, w + 2 * pad
    ho, wo = hp - k + 1, wp - k + 1
    flat = xp.reshape(n, hp * wp, c)
    max_off = (k - 1) * wp + (k - 1)
    r_needed = _round_up(ho * wp + max_off, 8)
    if r_needed > hp * wp:
        flat = jnp.pad(flat, ((0, 0), (0, r_needed - hp * wp), (0, 0)))
    return flat, wp, ho, wo


def _taps(k, wgrid):
    return tuple(ky * wgrid + kx for ky in range(k) for kx in range(k))


# ----------------------------------------------------------------------------
# Parameter preparation (once, outside the hot path)
# ----------------------------------------------------------------------------

def prepare_params(raw):
    """OIHW f32 weights -> bf16 matmul operands with Cout zero-padded to 128 lanes."""
    def tap_mat(w):                       # (Cout,Cin,K,K) -> (K*K, Cin, 128) bf16
        cout, cin, k, _ = w.shape
        m = jnp.transpose(w, (2, 3, 1, 0)).reshape(k * k, cin, cout)
        return jnp.pad(m, ((0, 0), (0, 0), (0, LANE - cout))).astype(jnp.bfloat16)

    def im2col_mat(w):                    # (Cout,Cin,K,K) -> (1, K*K*Cin, 128) bf16
        cout, cin, k, _ = w.shape
        m = jnp.transpose(w, (2, 3, 1, 0)).reshape(k * k * cin, cout)
        m = jnp.pad(m, ((0, 0), (0, LANE - cout)))
        return m.reshape(1, k * k * cin, LANE).astype(jnp.bfloat16)

    def bias_row(b):
        return jnp.pad(b, (0, LANE - b.shape[0])).reshape(1, LANE).astype(jnp.float32)

    prep = {
        "mean": raw["mean"].astype(jnp.float32),
        "w1": im2col_mat(raw["w1"]), "b1": bias_row(raw["b1"]),
        "w2": tap_mat(raw["w2"]),    "b2": bias_row(raw["b2"]),
        "w3": tap_mat(raw["w3"]),    "b3": bias_row(raw["b3"]),
        "w4": tap_mat(raw["w4"]),    "b4": bias_row(raw["b4"]),
    }
    meta = {"c1": raw["w1"].shape[0], "c2": raw["w2"].shape[0],
            "c3": raw["w3"].shape[0], "c4": raw["w4"].shape[0]}
    return prep, meta


# ----------------------------------------------------------------------------
# EIG_classifier_early_layers.forward (segment=False)
# ----------------------------------------------------------------------------

def build_forward(meta):
    c1, c2, c3, c4 = meta["c1"], meta["c2"], meta["c3"], meta["c4"]

    def flatten_chw(x_hwc):
        # PyTorch `x[0].numpy().flatten()` flattens in CHW order.
        return jnp.transpose(x_hwc, (2, 0, 1)).reshape(-1).astype(jnp.float32)

    @jax.jit
    def forward(prep, x_nchw):
        x = jnp.transpose(x_nchw.astype(jnp.float32), (0, 2, 3, 1))   # NCHW -> NHWC
        x = x - prep["mean"].reshape(1, 1, 1, -1)                      # exact mean subtract
        n, h, w, _ = x.shape
        outs = []

        # block 1: conv(5x5, s2, valid) + ReLU + LRN + maxpool(3,2), fully fused
        ho1, wo1 = (h - 5) // 2 + 1, (w - 5) // 2 + 1
        hpo1, wpo1 = (ho1 - 3) // 2 + 1, (wo1 - 3) // 2 + 1
        patches = _im2col_s2(x, 5, 2, ho1, wo1)                        # (N, ho1*wo1, 75) bf16
        x = _fused_block(patches, prep["w1"], prep["b1"], wgrid=wo1, wo=wo1, ho=ho1,
                         c_real=c1, taps_off=(0,), apply_lrn=True, pool=True,
                         hpo=hpo1, wpo=wpo1)
        outs.append(flatten_chw(x[0]))

        # block 2: conv(5x5, s1, p2) + ReLU + LRN + maxpool(3,2), fully fused
        flat, wp2, ho2, wo2 = _pad_flatten(x, 2, 5)
        hpo2, wpo2 = (ho2 - 3) // 2 + 1, (wo2 - 3) // 2 + 1
        x = _fused_block(flat, prep["w2"], prep["b2"], wgrid=wp2, wo=wo2, ho=ho2,
                         c_real=c2, taps_off=_taps(5, wp2), apply_lrn=True, pool=True,
                         hpo=hpo2, wpo=wpo2)
        outs.append(flatten_chw(x[0]))

        # block 3: conv(3x3, s1, p1) + ReLU
        flat, wp3, ho3, wo3 = _pad_flatten(x, 1, 3)
        x = _fused_block(flat, prep["w3"], prep["b3"], wgrid=wp3, wo=wo3, ho=ho3,
                         c_real=c3, taps_off=_taps(3, wp3), apply_lrn=False, pool=False)
        outs.append(flatten_chw(x[0]))

        # block 4: conv(3x3, s1, p1) + ReLU
        flat, wp4, ho4, wo4 = _pad_flatten(x, 1, 3)
        x = _fused_block(flat, prep["w4"], prep["b4"], wgrid=wp4, wo=wo4, ho=ho4,
                         c_real=c4, taps_off=_taps(3, wp4), apply_lrn=False, pool=False)
        outs.append(flatten_chw(x[0]))
        return tuple(outs)

    return forward


# ----------------------------------------------------------------------------
# Pure-JAX f32 reference (for in-script correctness check)
# ----------------------------------------------------------------------------

def _ref_conv_relu(x, w, b, stride, pad):
    y = lax.conv_general_dilated(x, w, (stride, stride), [(pad, pad), (pad, pad)],
                                 dimension_numbers=("NCHW", "OIHW", "NCHW"))
    return jnp.maximum(y + b.reshape(1, -1, 1, 1), 0.0)


def _ref_lrn(x, size=5, alpha=1e-4, beta=0.75, k=1.0):
    c = x.shape[1]
    half = size // 2
    x2 = jnp.pad(x * x, ((0, 0), (half, half), (0, 0), (0, 0)))
    s = sum(x2[:, i:i + c] for i in range(size))
    return x / jnp.power(k + (alpha / size) * s, beta)


def _ref_pool(x, k=3, s=2):
    return lax.reduce_window(x, -jnp.inf, lax.max, (1, 1, k, k), (1, 1, s, s), "VALID")


def eig_early_layers_reference(params, x_nchw):
    x = x_nchw.astype(jnp.float32) - params["mean"].reshape(1, -1, 1, 1)
    outs = []
    x = _ref_pool(_ref_lrn(_ref_conv_relu(x, params["w1"], params["b1"], 2, 0)))
    outs.append(x[0].reshape(-1))
    x = _ref_pool(_ref_lrn(_ref_conv_relu(x, params["w2"], params["b2"], 1, 2)))
    outs.append(x[0].reshape(-1))
    x = _ref_conv_relu(x, params["w3"], params["b3"], 1, 1)
    outs.append(x[0].reshape(-1))
    x = _ref_conv_relu(x, params["w4"], params["b4"], 1, 1)
    outs.append(x[0].reshape(-1))
    return tuple(outs)


# ----------------------------------------------------------------------------
# Main
# ----------------------------------------------------------------------------

if __name__ == "__main__":
    key = jax.random.PRNGKey(0)
    k_x, k1, k2, k3, k4, kb1, kb2, kb3, kb4 = jax.random.split(key, 9)

    # Small scaled-down shapes consistent with the forward pass (3 input channels
    # because the module subtracts a 3-channel BGR mean).
    N, CIN, H, W = 2, 3, 32, 32
    C1, C2, C3, C4 = 16, 32, 48, 48

    raw_params = {
        # exact mean constants from the PyTorch module
        "mean": jnp.array([104.0510072177276, 112.51448910834733, 116.67603893449996],
                          dtype=jnp.float32),
        # conv weights in PyTorch OIHW layout, deterministic synthetic init
        "w1": jax.random.normal(k1, (C1, CIN, 5, 5), jnp.float32) * 0.05,
        "b1": jax.random.normal(kb1, (C1,), jnp.float32) * 0.1,
        "w2": jax.random.normal(k2, (C2, C1, 5, 5), jnp.float32) * 0.05,
        "b2": jax.random.normal(kb2, (C2,), jnp.float32) * 0.1,
        "w3": jax.random.normal(k3, (C3, C2, 3, 3), jnp.float32) * 0.05,
        "b3": jax.random.normal(kb3, (C3,), jnp.float32) * 0.1,
        "w4": jax.random.normal(k4, (C4, C3, 3, 3), jnp.float32) * 0.05,
        "b4": jax.random.normal(kb4, (C4,), jnp.float32) * 0.1,
    }
    x = jax.random.uniform(k_x, (N, CIN, H, W), jnp.float32, 0.0, 255.0)

    prep, meta = prepare_params(raw_params)
    forward = build_forward(meta)

    outs = jax.block_until_ready(forward(prep, x))
    refs = jax.block_until_ready(eig_early_layers_reference(raw_params, x))

    # bf16 MXU operands + bf16 inter-block carry with f32 accumulation vs an f32
    # reference: max-normalized error is expected ~1e-3; gate at 2e-2.
    for o_pal, o_ref in zip(outs, refs):
        assert o_pal.shape == o_ref.shape, (o_pal.shape, o_ref.shape)
        denom = jnp.maximum(jnp.max(jnp.abs(o_ref)), 1e-6)
        rel_err = float(jnp.max(jnp.abs(o_pal - o_ref)) / denom)
        assert rel_err < 2e-2, f"mismatch: rel_err={rel_err}"

    print("KERNEL_OK")
</pallas_src>

<mosaic_0001>
module attributes {stable_mosaic.version = 11 : i64} {
  func.func @_fused_block_kernel(%arg0: i32, %arg1: memref<1x196x75xbf16, #tpu.memory_space<vmem>>, %arg2: memref<1x75x128xbf16, #tpu.memory_space<vmem>>, %arg3: memref<1x128xf32, #tpu.memory_space<vmem>>, %arg4: memref<1x6x6x16xbf16, #tpu.memory_space<vmem>>, %arg5: memref<200x128xf32, #tpu.memory_space<vmem>>) attributes {dimension_semantics = [#tpu.dimension_semantics<parallel>], iteration_bounds = array<i64: 2>, scalar_prefetch = 0 : i64, scratch_operands = 1 : i64, tpu.core_type = #tpu.core_type<tc>, window_params = [{transform_indices = @transform_0, window_bounds = array<i64: 1, 196, 75>}, {pipeline_mode = #tpu.pipeline_mode<synchronous>, transform_indices = @transform_1, window_bounds = array<i64: 1, 75, 128>}, {pipeline_mode = #tpu.pipeline_mode<synchronous>, transform_indices = @transform_2, window_bounds = array<i64: 1, 128>}, {transform_indices = @transform_3, window_bounds = array<i64: 1, 6, 6, 16>}]} {
    %c0 = arith.constant 0 : index
    %c0_0 = arith.constant 0 : index
    %0 = vector.load %arg3[%c0, %c0_0] : memref<1x128xf32, #tpu.memory_space<vmem>>, vector<1x128xf32>
    %c0_1 = arith.constant 0 : index
    %c0_2 = arith.constant 0 : index
    %c0_3 = arith.constant 0 : index
    %1 = vector.load %arg1[%c0_1, %c0_2, %c0_3] : memref<1x196x75xbf16, #tpu.memory_space<vmem>>, vector<1x196x75xbf16>
    %2 = vector.shape_cast %1 : vector<1x196x75xbf16> to vector<196x75xbf16>
    %c0_4 = arith.constant 0 : index
    %c0_5 = arith.constant 0 : index
    %c0_6 = arith.constant 0 : index
    %3 = vector.load %arg2[%c0_4, %c0_5, %c0_6] : memref<1x75x128xbf16, #tpu.memory_space<vmem>>, vector<1x75x128xbf16>
    %4 = vector.shape_cast %3 : vector<1x75x128xbf16> to vector<75x128xbf16>
    %cst = arith.constant dense<0.000000e+00> : vector<196x128xf32>
    %5 = tpu.matmul %2, %4, %cst {dimension_numbers = #tpu.dot_dimension_numbers<[1], [0], [0], [1], [0, 0, 1, 1], [], []>} : vector<196x75xbf16>, vector<75x128xbf16>, vector<196x128xf32> -> vector<196x128xf32>
    %6 = vector.broadcast %0 : vector<1x128xf32> to vector<196x128xf32>
    %7 = arith.addf %5, %6 : vector<196x128xf32>
    %cst_7 = arith.constant 0.000000e+00 : f32
    %8 = vector.broadcast %cst_7 : f32 to vector<196x128xf32>
    %9 = arith.maximumf %7, %8 : vector<196x128xf32>
    %10 = arith.mulf %9, %9 : vector<196x128xf32>
    %c1_i32 = arith.constant 1 : i32
    %11 = tpu.dynamic_rotate %10 by %c1_i32 dim 1 : vector<196x128xf32>, i32 -> vector<196x128xf32>
    %12 = arith.addf %10, %11 : vector<196x128xf32>
    %c2_i32 = arith.constant 2 : i32
    %13 = tpu.dynamic_rotate %10 by %c2_i32 dim 1 : vector<196x128xf32>, i32 -> vector<196x128xf32>
    %14 = arith.addf %12, %13 : vector<196x128xf32>
    %c127_i32 = arith.constant 127 : i32
    %15 = tpu.dynamic_rotate %10 by %c127_i32 dim 1 : vector<196x128xf32>, i32 -> vector<196x128xf32>
    %16 = arith.addf %14, %15 : vector<196x128xf32>
    %c126_i32 = arith.constant 126 : i32
    %17 = tpu.dynamic_rotate %10 by %c126_i32 dim 1 : vector<196x128xf32>, i32 -> vector<196x128xf32>
    %18 = arith.addf %16, %17 : vector<196x128xf32>
    %cst_8 = arith.constant 2.000000e-05 : f32
    %19 = vector.broadcast %cst_8 : f32 to vector<196x128xf32>
    %20 = arith.mulf %19, %18 : vector<196x128xf32>
    %cst_9 = arith.constant 1.000000e+00 : f32
    %21 = vector.broadcast %cst_9 : f32 to vector<196x128xf32>
    %22 = arith.addf %21, %20 : vector<196x128xf32>
    %23 = math.rsqrt %22 : vector<196x128xf32>
    %24 = math.sqrt %22 : vector<196x128xf32>
    %25 = math.rsqrt %24 : vector<196x128xf32>
    %26 = arith.mulf %23, %25 : vector<196x128xf32>
    %27 = arith.mulf %9, %26 : vector<196x128xf32>
    %c0_10 = arith.constant 0 : index
    %c0_11 = arith.constant 0 : index
    %28 = vector.load %arg5[%c0_10, %c0_11] : memref<200x128xf32, #tpu.memory_space<vmem>>, vector<196x128xf32>
    tpu.vector_store %arg5[%c0_10, %c0_11], %27 {strides = array<i32>} : memref<200x128xf32, #tpu.memory_space<vmem>>, vector<196x128xf32>,
    %c0_12 = arith.constant 0 : index
    %c0_13 = arith.constant 0 : index
    %29 = tpu.strided_load %arg5[%c0_12, %c0_13] {strides = array<i32: 2, 1>} : memref<200x128xf32, #tpu.memory_space<vmem>>, vector<6x128xf32>
    %c1 = arith.constant 1 : index
    %c0_14 = arith.constant 0 : index
    %30 = tpu.strided_load %arg5[%c1, %c0_14] {strides = array<i32: 2, 1>} : memref<200x128xf32, #tpu.memory_space<vmem>>, vector<6x128xf32>
    %31 = arith.maximumf %29, %30 : vector<6x128xf32>
    %c2 = arith.constant 2 : index
    %c0_15 = arith.constant 0 : index
    %32 = tpu.strided_load %arg5[%c2, %c0_15] {strides = array<i32: 2, 1>} : memref<200x128xf32, #tpu.memory_space<vmem>>, vector<6x128xf32>
    %33 = arith.maximumf %31, %32 : vector<6x128xf32>
    %c14 = arith.constant 14 : index
    %c0_16 = arith.constant 0 : index
    %34 = tpu.strided_load %arg5[%c14, %c0_16] {strides = array<i32: 2, 1>} : memref<200x128xf32, #tpu.memory_space<vmem>>, vector<6x128xf32>
    %35 = arith.maximumf %33, %34 : vector<6x128xf32>
    %c15 = arith.constant 15 : index
    %c0_17 = arith.constant 0 : index
    %36 = tpu.strided_load %arg5[%c15, %c0_17] {strides = array<i32: 2, 1>} : memref<200x128xf32, #tpu.memory_space<vmem>>, vector<6x128xf32>
    %37 = arith.maximumf %35, %36 : vector<6x128xf32>
    %c16 = arith.constant 16 : index
    %c0_18 = arith.constant 0 : index
    %38 = tpu.strided_load %arg5[%c16, %c0_18] {strides = array<i32: 2, 1>} : memref<200x128xf32, #tpu.memory_space<vmem>>, vector<6x128xf32>
    %39 = arith.maximumf %37, %38 : vector<6x128xf32>
    %c28 = arith.constant 28 : index
    %c0_19 = arith.constant 0 : index
    %40 = tpu.strided_load %arg5[%c28, %c0_19] {strides = array<i32: 2, 1>} : memref<200x128xf32, #tpu.memory_space<vmem>>, vector<6x128xf32>
    %41 = arith.maximumf %39, %40 : vector<6x128xf32>
    %c29 = arith.constant 29 : index
    %c0_20 = arith.constant 0 : index
    %42 = tpu.strided_load %arg5[%c29, %c0_20] {strides = array<i32: 2, 1>} : memref<200x128xf32, #tpu.memory_space<vmem>>, vector<6x128xf32>
    %43 = arith.maximumf %41, %42 : vector<6x128xf32>
    %c30 = arith.constant 30 : index
    %c0_21 = arith.constant 0 : index
    %44 = tpu.strided_load %arg5[%c30, %c0_21] {strides = array<i32: 2, 1>} : memref<200x128xf32, #tpu.memory_space<vmem>>, vector<6x128xf32>
    %45 = arith.maximumf %43, %44 : vector<6x128xf32>
    %46 = vector.extract_strided_slice %45 {offsets = [0, 0], sizes = [6, 16], strides = [1, 1]} : vector<6x128xf32> to vector<6x16xf32>
    %47 = arith.truncf %46 : vector<6x16xf32> to vector<6x16xbf16>
    %c0_22 = arith.constant 0 : index
    %c0_23 = arith.constant 0 : index
    %c0_24 = arith.constant 0 : index
    %c0_25 = arith.constant 0 : index
    %48 = vector.load %arg4[%c0_22, %c0_23, %c0_24, %c0_25] : memref<1x6x6x16xbf16, #tpu.memory_space<vmem>>, vector<1x1x6x16xbf16>
    %49 = vector.shape_cast %48 : vector<1x1x6x16xbf16> to vector<6x16xbf16>
    %50 = vector.shape_cast %47 : vector<6x16xbf16> to vector<1x1x6x16xbf16>
    tpu.vector_store %arg4[%c0_22, %c0_23, %c0_24, %c0_25], %50 {strides = array<i32>} : memref<1x6x6x16xbf16, #tpu.memory_space<vmem>>, vector<1x1x6x16xbf16>,
    %c28_26 = arith.constant 28 : index
    %c0_27 = arith.constant 0 : index
    %51 = tpu.strided_load %arg5[%c28_26, %c0_27] {strides = array<i32: 2, 1>} : memref<200x128xf32, #tpu.memory_space<vmem>>, vector<6x128xf32>
    %c29_28 = arith.constant 29 : index
    %c0_29 = arith.constant 0 : index
    %52 = tpu.strided_load %arg5[%c29_28, %c0_29] {strides = array<i32: 2, 1>} : memref<200x128xf32, #tpu.memory_space<vmem>>, vector<6x128xf32>
    %53 = arith.maximumf %51, %52 : vector<6x128xf32>
    %c30_30 = arith.constant 30 : index
    %c0_31 = arith.constant 0 : index
    %54 = tpu.strided_load %arg5[%c30_30, %c0_31] {strides = array<i32: 2, 1>} : memref<200x128xf32, #tpu.memory_space<vmem>>, vector<6x128xf32>
    %55 = arith.maximumf %53, %54 : vector<6x128xf32>
    %c42 = arith.constant 42 : index
    %c0_32 = arith.constant 0 : index
    %56 = tpu.strided_load %arg5[%c42, %c0_32] {strides = array<i32: 2, 1>} : memref<200x128xf32, #tpu.memory_space<vmem>>, vector<6x128xf32>
    %57 = arith.maximumf %55, %56 : vector<6x128xf32>
    %c43 = arith.constant 43 : index
    %c0_33 = arith.constant 0 : index
    %58 = tpu.strided_load %arg5[%c43, %c0_33] {strides = array<i32: 2, 1>} : memref<200x128xf32, #tpu.memory_space<vmem>>, vector<6x128xf32>
    %59 = arith.maximumf %57, %58 : vector<6x128xf32>
    %c44 = arith.constant 44 : index
    %c0_34 = arith.constant 0 : index
    %60 = tpu.strided_load %arg5[%c44, %c0_34] {strides = array<i32: 2, 1>} : memref<200x128xf32, #tpu.memory_space<vmem>>, vector<6x128xf32>
    %61 = arith.maximumf %59, %60 : vector<6x128xf32>
    %c56 = arith.constant 56 : index
    %c0_35 = arith.constant 0 : index
    %62 = tpu.strided_load %arg5[%c56, %c0_35] {strides = array<i32: 2, 1>} : memref<200x128xf32, #tpu.memory_space<vmem>>, vector<6x128xf32>
    %63 = arith.maximumf %61, %62 : vector<6x128xf32>
    %c57 = arith.constant 57 : index
    %c0_36 = arith.constant 0 : index
    %64 = tpu.strided_load %arg5[%c57, %c0_36] {strides = array<i32: 2, 1>} : memref<200x128xf32, #tpu.memory_space<vmem>>, vector<6x128xf32>
    %65 = arith.maximumf %63, %64 : vector<6x128xf32>
    %c58 = arith.constant 58 : index
    %c0_37 = arith.constant 0 : index
    %66 = tpu.strided_load %arg5[%c58, %c0_37] {strides = array<i32: 2, 1>} : memref<200x128xf32, #tpu.memory_space<vmem>>, vector<6x128xf32>
    %67 = arith.maximumf %65, %66 : vector<6x128xf32>
    %68 = vector.extract_strided_slice %67 {offsets = [0, 0], sizes = [6, 16], strides = [1, 1]} : vector<6x128xf32> to vector<6x16xf32>
    %69 = arith.truncf %68 : vector<6x16xf32> to vector<6x16xbf16>
    %c0_38 = arith.constant 0 : index
    %c1_39 = arith.constant 1 : index
    %c0_40 = arith.constant 0 : index
    %c0_41 = arith.constant 0 : index
    %70 = vector.load %arg4[%c0_38, %c1_39, %c0_40, %c0_41] : memref<1x6x6x16xbf16, #tpu.memory_space<vmem>>, vector<1x1x6x16xbf16>
    %71 = vector.shape_cast %70 : vector<1x1x6x16xbf16> to vector<6x16xbf16>
    %72 = vector.shape_cast %69 : vector<6x16xbf16> to vector<1x1x6x16xbf16>
    tpu.vector_store %arg4[%c0_38, %c1_39, %c0_40, %c0_41], %72 {strides = array<i32>} : memref<1x6x6x16xbf16, #tpu.memory_space<vmem>>, vector<1x1x6x16xbf16>,
    %c56_42 = arith.constant 56 : index
    %c0_43 = arith.constant 0 : index
    %73 = tpu.strided_load %arg5[%c56_42, %c0_43] {strides = array<i32: 2, 1>} : memref<200x128xf32, #tpu.memory_space<vmem>>, vector<6x128xf32>
    %c57_44 = arith.constant 57 : index
    %c0_45 = arith.constant 0 : index
    %74 = tpu.strided_load %arg5[%c57_44, %c0_45] {strides = array<i32: 2, 1>} : memref<200x128xf32, #tpu.memory_space<vmem>>, vector<6x128xf32>
    %75 = arith.maximumf %73, %74 : vector<6x128xf32>
    %c58_46 = arith.constant 58 : index
    %c0_47 = arith.constant 0 : index
    %76 = tpu.strided_load %arg5[%c58_46, %c0_47] {strides = array<i32: 2, 1>} : memref<200x128xf32, #tpu.memory_space<vmem>>, vector<6x128xf32>
    %77 = arith.maximumf %75, %76 : vector<6x128xf32>
    %c70 = arith.constant 70 : index
    %c0_48 = arith.constant 0 : index
    %78 = tpu.strided_load %arg5[%c70, %c0_48] {strides = array<i32: 2, 1>} : memref<200x128xf32, #tpu.memory_space<vmem>>, vector<6x128xf32>
    %79 = arith.maximumf %77, %78 : vector<6x128xf32>
    %c71 = arith.constant 71 : index
    %c0_49 = arith.constant 0 : index
    %80 = tpu.strided_load %arg5[%c71, %c0_49] {strides = array<i32: 2, 1>} : memref<200x128xf32, #tpu.memory_space<vmem>>, vector<6x128xf32>
    %81 = arith.maximumf %79, %80 : vector<6x128xf32>
    %c72 = arith.constant 72 : index
    %c0_50 = arith.constant 0 : index
    %82 = tpu.strided_load %arg5[%c72, %c0_50] {strides = array<i32: 2, 1>} : memref<200x128xf32, #tpu.memory_space<vmem>>, vector<6x128xf32>
    %83 = arith.maximumf %81, %82 : vector<6x128xf32>
    %c84 = arith.constant 84 : index
    %c0_51 = arith.constant 0 : index
    %84 = tpu.strided_load %arg5[%c84, %c0_51] {strides = array<i32: 2, 1>} : memref<200x128xf32, #tpu.memory_space<vmem>>, vector<6x128xf32>
    %85 = arith.maximumf %83, %84 : vector<6x128xf32>
    %c85 = arith.constant 85 : index
    %c0_52 = arith.constant 0 : index
    %86 = tpu.strided_load %arg5[%c85, %c0_52] {strides = array<i32: 2, 1>} : memref<200x128xf32, #tpu.memory_space<vmem>>, vector<6x128xf32>
    %87 = arith.maximumf %85, %86 : vector<6x128xf32>
    %c86 = arith.constant 86 : index
    %c0_53 = arith.constant 0 : index
    %88 = tpu.strided_load %arg5[%c86, %c0_53] {strides = array<i32: 2, 1>} : memref<200x128xf32, #tpu.memory_space<vmem>>, vector<6x128xf32>
    %89 = arith.maximumf %87, %88 : vector<6x128xf32>
    %90 = vector.extract_strided_slice %89 {offsets = [0, 0], sizes = [6, 16], strides = [1, 1]} : vector<6x128xf32> to vector<6x16xf32>
    %91 = arith.truncf %90 : vector<6x16xf32> to vector<6x16xbf16>
    %c0_54 = arith.constant 0 : index
    %c2_55 = arith.constant 2 : index
    %c0_56 = arith.constant 0 : index
    %c0_57 = arith.constant 0 : index
    %92 = vector.load %arg4[%c0_54, %c2_55, %c0_56, %c0_57] : memref<1x6x6x16xbf16, #tpu.memory_space<vmem>>, vector<1x1x6x16xbf16>
    %93 = vector.shape_cast %92 : vector<1x1x6x16xbf16> to vector<6x16xbf16>
    %94 = vector.shape_cast %91 : vector<6x16xbf16> to vector<1x1x6x16xbf16>
    tpu.vector_store %arg4[%c0_54, %c2_55, %c0_56, %c0_57], %94 {strides = array<i32>} : memref<1x6x6x16xbf16, #tpu.memory_space<vmem>>, vector<1x1x6x16xbf16>,
    %c84_58 = arith.constant 84 : index
    %c0_59 = arith.constant 0 : index
    %95 = tpu.strided_load %arg5[%c84_58, %c0_59] {strides = array<i32: 2, 1>} : memref<200x128xf32, #tpu.memory_space<vmem>>, vector<6x128xf32>
    %c85_60 = arith.constant 85 : index
    %c0_61 = arith.constant 0 : index
    %96 = tpu.strided_load %arg5[%c85_60, %c0_61] {strides = array<i32: 2, 1>} : memref<200x128xf32, #tpu.memory_space<vmem>>, vector<6x128xf32>
    %97 = arith.maximumf %95, %96 : vector<6x128xf32>
    %c86_62 = arith.constant 86 : index
    %c0_63 = arith.constant 0 : index
    %98 = tpu.strided_load %arg5[%c86_62, %c0_63] {strides = array<i32: 2, 1>} : memref<200x128xf32, #tpu.memory_space<vmem>>, vector<6x128xf32>
    %99 = arith.maximumf %97, %98 : vector<6x128xf32>
    %c98 = arith.constant 98 : index
    %c0_64 = arith.constant 0 : index
    %100 = tpu.strided_load %arg5[%c98, %c0_64] {strides = array<i32: 2, 1>} : memref<200x128xf32, #tpu.memory_space<vmem>>, vector<6x128xf32>
    %101 = arith.maximumf %99, %100 : vector<6x128xf32>
    %c99 = arith.constant 99 : index
    %c0_65 = arith.constant 0 : index
    %102 = tpu.strided_load %arg5[%c99, %c0_65] {strides = array<i32: 2, 1>} : memref<200x128xf32, #tpu.memory_space<vmem>>, vector<6x128xf32>
    %103 = arith.maximumf %101, %102 : vector<6x128xf32>
    %c100 = arith.constant 100 : index
    %c0_66 = arith.constant 0 : index
    %104 = tpu.strided_load %arg5[%c100, %c0_66] {strides = array<i32: 2, 1>} : memref<200x128xf32, #tpu.memory_space<vmem>>, vector<6x128xf32>
    %105 = arith.maximumf %103, %104 : vector<6x128xf32>
    %c112 = arith.constant 112 : index
    %c0_67 = arith.constant 0 : index
    %106 = tpu.strided_load %arg5[%c112, %c0_67] {strides = array<i32: 2, 1>} : memref<200x128xf32, #tpu.memory_space<vmem>>, vector<6x128xf32>
    %107 = arith.maximumf %105, %106 : vector<6x128xf32>
    %c113 = arith.constant 113 : index
    %c0_68 = arith.constant 0 : index
    %108 = tpu.strided_load %arg5[%c113, %c0_68] {strides = array<i32: 2, 1>} : memref<200x128xf32, #tpu.memory_space<vmem>>, vector<6x128xf32>
    %109 = arith.maximumf %107, %108 : vector<6x128xf32>
    %c114 = arith.constant 114 : index
    %c0_69 = arith.constant 0 : index
    %110 = tpu.strided_load %arg5[%c114, %c0_69] {strides = array<i32: 2, 1>} : memref<200x128xf32, #tpu.memory_space<vmem>>, vector<6x128xf32>
    %111 = arith.maximumf %109, %110 : vector<6x128xf32>
    %112 = vector.extract_strided_slice %111 {offsets = [0, 0], sizes = [6, 16], strides = [1, 1]} : vector<6x128xf32> to vector<6x16xf32>
    %113 = arith.truncf %112 : vector<6x16xf32> to vector<6x16xbf16>
    %c0_70 = arith.constant 0 : index
    %c3 = arith.constant 3 : index
    %c0_71 = arith.constant 0 : index
    %c0_72 = arith.constant 0 : index
    %114 = vector.load %arg4[%c0_70, %c3, %c0_71, %c0_72] : memref<1x6x6x16xbf16, #tpu.memory_space<vmem>>, vector<1x1x6x16xbf16>
    %115 = vector.shape_cast %114 : vector<1x1x6x16xbf16> to vector<6x16xbf16>
    %116 = vector.shape_cast %113 : vector<6x16xbf16> to vector<1x1x6x16xbf16>
    tpu.vector_store %arg4[%c0_70, %c3, %c0_71, %c0_72], %116 {strides = array<i32>} : memref<1x6x6x16xbf16, #tpu.memory_space<vmem>>, vector<1x1x6x16xbf16>,
    %c112_73 = arith.constant 112 : index
    %c0_74 = arith.constant 0 : index
    %117 = tpu.strided_load %arg5[%c112_73, %c0_74] {strides = array<i32: 2, 1>} : memref<200x128xf32, #tpu.memory_space<vmem>>, vector<6x128xf32>
    %c113_75 = arith.constant 113 : index
    %c0_76 = arith.constant 0 : index
    %118 = tpu.strided_load %arg5[%c113_75, %c0_76] {strides = array<i32: 2, 1>} : memref<200x128xf32, #tpu.memory_space<vmem>>, vector<6x128xf32>
    %119 = arith.maximumf %117, %118 : vector<6x128xf32>
    %c114_77 = arith.constant 114 : index
    %c0_78 = arith.constant 0 : index
    %120 = tpu.strided_load %arg5[%c114_77, %c0_78] {strides = array<i32: 2, 1>} : memref<200x128xf32, #tpu.memory_space<vmem>>, vector<6x128xf32>
    %121 = arith.maximumf %119, %120 : vector<6x128xf32>
    %c126 = arith.constant 126 : index
    %c0_79 = arith.constant 0 : index
    %122 = tpu.strided_load %arg5[%c126, %c0_79] {strides = array<i32: 2, 1>} : memref<200x128xf32, #tpu.memory_space<vmem>>, vector<6x128xf32>
    %123 = arith.maximumf %121, %122 : vector<6x128xf32>
    %c127 = arith.constant 127 : index
    %c0_80 = arith.constant 0 : index
    %124 = tpu.strided_load %arg5[%c127, %c0_80] {strides = array<i32: 2, 1>} : memref<200x128xf32, #tpu.memory_space<vmem>>, vector<6x128xf32>
    %125 = arith.maximumf %123, %124 : vector<6x128xf32>
    %c128 = arith.constant 128 : index
    %c0_81 = arith.constant 0 : index
    %126 = tpu.strided_load %arg5[%c128, %c0_81] {strides = array<i32: 2, 1>} : memref<200x128xf32, #tpu.memory_space<vmem>>, vector<6x128xf32>
    %127 = arith.maximumf %125, %126 : vector<6x128xf32>
    %c140 = arith.constant 140 : index
    %c0_82 = arith.constant 0 : index
    %128 = tpu.strided_load %arg5[%c140, %c0_82] {strides = array<i32: 2, 1>} : memref<200x128xf32, #tpu.memory_space<vmem>>, vector<6x128xf32>
    %129 = arith.maximumf %127, %128 : vector<6x128xf32>
    %c141 = arith.constant 141 : index
    %c0_83 = arith.constant 0 : index
    %130 = tpu.strided_load %arg5[%c141, %c0_83] {strides = array<i32: 2, 1>} : memref<200x128xf32, #tpu.memory_space<vmem>>, vector<6x128xf32>
    %131 = arith.maximumf %129, %130 : vector<6x128xf32>
    %c142 = arith.constant 142 : index
    %c0_84 = arith.constant 0 : index
    %132 = tpu.strided_load %arg5[%c142, %c0_84] {strides = array<i32: 2, 1>} : memref<200x128xf32, #tpu.memory_space<vmem>>, vector<6x128xf32>
    %133 = arith.maximumf %131, %132 : vector<6x128xf32>
    %134 = vector.extract_strided_slice %133 {offsets = [0, 0], sizes = [6, 16], strides = [1, 1]} : vector<6x128xf32> to vector<6x16xf32>
    %135 = arith.truncf %134 : vector<6x16xf32> to vector<6x16xbf16>
    %c0_85 = arith.constant 0 : index
    %c4 = arith.constant 4 : index
    %c0_86 = arith.constant 0 : index
    %c0_87 = arith.constant 0 : index
    %136 = vector.load %arg4[%c0_85, %c4, %c0_86, %c0_87] : memref<1x6x6x16xbf16, #tpu.memory_space<vmem>>, vector<1x1x6x16xbf16>
    %137 = vector.shape_cast %136 : vector<1x1x6x16xbf16> to vector<6x16xbf16>
    %138 = vector.shape_cast %135 : vector<6x16xbf16> to vector<1x1x6x16xbf16>
    tpu.vector_store %arg4[%c0_85, %c4, %c0_86, %c0_87], %138 {strides = array<i32>} : memref<1x6x6x16xbf16, #tpu.memory_space<vmem>>, vector<1x1x6x16xbf16>,
    %c140_88 = arith.constant 140 : index
    %c0_89 = arith.constant 0 : index
    %139 = tpu.strided_load %arg5[%c140_88, %c0_89] {strides = array<i32: 2, 1>} : memref<200x128xf32, #tpu.memory_space<vmem>>, vector<6x128xf32>
    %c141_90 = arith.constant 141 : index
    %c0_91 = arith.constant 0 : index
    %140 = tpu.strided_load %arg5[%c141_90, %c0_91] {strides = array<i32: 2, 1>} : memref<200x128xf32, #tpu.memory_space<vmem>>, vector<6x128xf32>
    %141 = arith.maximumf %139, %140 : vector<6x128xf32>
    %c142_92 = arith.constant 142 : index
    %c0_93 = arith.constant 0 : index
    %142 = tpu.strided_load %arg5[%c142_92, %c0_93] {strides = array<i32: 2, 1>} : memref<200x128xf32, #tpu.memory_space<vmem>>, vector<6x128xf32>
    %143 = arith.maximumf %141, %142 : vector<6x128xf32>
    %c154 = arith.constant 154 : index
    %c0_94 = arith.constant 0 : index
    %144 = tpu.strided_load %arg5[%c154, %c0_94] {strides = array<i32: 2, 1>} : memref<200x128xf32, #tpu.memory_space<vmem>>, vector<6x128xf32>
    %145 = arith.maximumf %143, %144 : vector<6x128xf32>
    %c155 = arith.constant 155 : index
    %c0_95 = arith.constant 0 : index
    %146 = tpu.strided_load %arg5[%c155, %c0_95] {strides = array<i32: 2, 1>} : memref<200x128xf32, #tpu.memory_space<vmem>>, vector<6x128xf32>
    %147 = arith.maximumf %145, %146 : vector<6x128xf32>
    %c156 = arith.constant 156 : index
    %c0_96 = arith.constant 0 : index
    %148 = tpu.strided_load %arg5[%c156, %c0_96] {strides = array<i32: 2, 1>} : memref<200x128xf32, #tpu.memory_space<vmem>>, vector<6x128xf32>
    %149 = arith.maximumf %147, %148 : vector<6x128xf32>
    %c168 = arith.constant 168 : index
    %c0_97 = arith.constant 0 : index
    %150 = tpu.strided_load %arg5[%c168, %c0_97] {strides = array<i32: 2, 1>} : memref<200x128xf32, #tpu.memory_space<vmem>>, vector<6x128xf32>
    %151 = arith.maximumf %149, %150 : vector<6x128xf32>
    %c169 = arith.constant 169 : index
    %c0_98 = arith.constant 0 : index
    %152 = tpu.strided_load %arg5[%c169, %c0_98] {strides = array<i32: 2, 1>} : memref<200x128xf32, #tpu.memory_space<vmem>>, vector<6x128xf32>
    %153 = arith.maximumf %151, %152 : vector<6x128xf32>
    %c170 = arith.constant 170 : index
    %c0_99 = arith.constant 0 : index
    %154 = tpu.strided_load %arg5[%c170, %c0_99] {strides = array<i32: 2, 1>} : memref<200x128xf32, #tpu.memory_space<vmem>>, vector<6x128xf32>
    %155 = arith.maximumf %153, %154 : vector<6x128xf32>
    %156 = vector.extract_strided_slice %155 {offsets = [0, 0], sizes = [6, 16], strides = [1, 1]} : vector<6x128xf32> to vector<6x16xf32>
    %157 = arith.truncf %156 : vector<6x16xf32> to vector<6x16xbf16>
    %c0_100 = arith.constant 0 : index
    %c5 = arith.constant 5 : index
    %c0_101 = arith.constant 0 : index
    %c0_102 = arith.constant 0 : index
    %158 = vector.load %arg4[%c0_100, %c5, %c0_101, %c0_102] : memref<1x6x6x16xbf16, #tpu.memory_space<vmem>>, vector<1x1x6x16xbf16>
    %159 = vector.shape_cast %158 : vector<1x1x6x16xbf16> to vector<6x16xbf16>
    %160 = vector.shape_cast %157 : vector<6x16xbf16> to vector<1x1x6x16xbf16>
    tpu.vector_store %arg4[%c0_100, %c5, %c0_101, %c0_102], %160 {strides = array<i32>} : memref<1x6x6x16xbf16, #tpu.memory_space<vmem>>, vector<1x1x6x16xbf16>,
    return
  }
  func.func @transform_0(%arg0: i32) -> (i32, i32, i32) {
    %c0_i32 = arith.constant 0 : i32
    %c0_i32_0 = arith.constant 0 : i32
    %c0_i32_1 = arith.constant 0 : i32
    return %arg0, %c0_i32, %c0_i32_0 : i32, i32, i32
  }
  func.func @transform_1(%arg0: i32) -> (i32, i32, i32) {
    %c0_i32 = arith.constant 0 : i32
    %c0_i32_0 = arith.constant 0 : i32
    %c0_i32_1 = arith.constant 0 : i32
    %c0_i32_2 = arith.constant 0 : i32
    return %c0_i32, %c0_i32_0, %c0_i32_1 : i32, i32, i32
  }
  func.func @transform_2(%arg0: i32) -> (i32, i32) {
    %c0_i32 = arith.constant 0 : i32
    %c0_i32_0 = arith.constant 0 : i32
    %c0_i32_1 = arith.constant 0 : i32
    return %c0_i32, %c0_i32_0 : i32, i32
  }
  func.func @transform_3(%arg0: i32) -> (i32, i32, i32, i32) {
    %c0_i32 = arith.constant 0 : i32
    %c0_i32_0 = arith.constant 0 : i32
    %c0_i32_1 = arith.constant 0 : i32
    %c0_i32_2 = arith.constant 0 : i32
    return %arg0, %c0_i32, %c0_i32_0, %c0_i32_1 : i32, i32, i32, i32
  }
}

module attributes {stable_mosaic.version = 11 : i64} {
  func.func @_fused_block_kernel(%arg0: i32, %arg1: memref<1x104x16xbf16, #tpu.memory_space<vmem>>, %arg2: memref<25x16x128xbf16, #tpu.memory_space<vmem>>, %arg3: memref<1x128xf32, #tpu.memory_space<vmem>>, %arg4: memref<1x2x2x32xbf16, #tpu.memory_space<vmem>>, %arg5: memref<64x128xf32, #tpu.memory_space<vmem>>) attributes {dimension_semantics = [#tpu.dimension_semantics<parallel>], iteration_bounds = array<i64: 2>, scalar_prefetch = 0 : i64, scratch_operands = 1 : i64, tpu.core_type = #tpu.core_type<tc>, window_params = [{transform_indices = @transform_0, window_bounds = array<i64: 1, 104, 16>}, {pipeline_mode = #tpu.pipeline_mode<synchronous>, transform_indices = @transform_1, window_bounds = array<i64: 25, 16, 128>}, {pipeline_mode = #tpu.pipeline_mode<synchronous>, transform_indices = @transform_2, window_bounds = array<i64: 1, 128>}, {transform_indices = @transform_3, window_bounds = array<i64: 1, 2, 2, 32>}]} {
    %c0 = arith.constant 0 : index
    %c0_0 = arith.constant 0 : index
    %0 = vector.load %arg3[%c0, %c0_0] : memref<1x128xf32, #tpu.memory_space<vmem>>, vector<1x128xf32>
    %c0_1 = arith.constant 0 : index
    %c0_2 = arith.constant 0 : index
    %c0_3 = arith.constant 0 : index
    %1 = vector.load %arg1[%c0_1, %c0_2, %c0_3] : memref<1x104x16xbf16, #tpu.memory_space<vmem>>, vector<1x60x16xbf16>
    %2 = vector.shape_cast %1 : vector<1x60x16xbf16> to vector<60x16xbf16>
    %c0_4 = arith.constant 0 : index
    %c0_5 = arith.constant 0 : index
    %c0_6 = arith.constant 0 : index
    %3 = vector.load %arg2[%c0_4, %c0_5, %c0_6] : memref<25x16x128xbf16, #tpu.memory_space<vmem>>, vector<1x16x128xbf16>
    %4 = vector.shape_cast %3 : vector<1x16x128xbf16> to vector<16x128xbf16>
    %cst = arith.constant dense<0.000000e+00> : vector<60x128xf32>
    %5 = tpu.matmul %2, %4, %cst {dimension_numbers = #tpu.dot_dimension_numbers<[1], [0], [0], [1], [0, 0, 1, 1], [], []>} : vector<60x16xbf16>, vector<16x128xbf16>, vector<60x128xf32> -> vector<60x128xf32>
    %6 = vector.broadcast %0 : vector<1x128xf32> to vector<60x128xf32>
    %7 = arith.addf %5, %6 : vector<60x128xf32>
    %c0_7 = arith.constant 0 : index
    %c1 = arith.constant 1 : index
    %c0_8 = arith.constant 0 : index
    %8 = vector.load %arg1[%c0_7, %c1, %c0_8] : memref<1x104x16xbf16, #tpu.memory_space<vmem>>, vector<1x60x16xbf16>
    %9 = vector.shape_cast %8 : vector<1x60x16xbf16> to vector<60x16xbf16>
    %c1_9 = arith.constant 1 : index
    %c0_10 = arith.constant 0 : index
    %c0_11 = arith.constant 0 : index
    %10 = vector.load %arg2[%c1_9, %c0_10, %c0_11] : memref<25x16x128xbf16, #tpu.memory_space<vmem>>, vector<1x16x128xbf16>
    %11 = vector.shape_cast %10 : vector<1x16x128xbf16> to vector<16x128xbf16>
    %cst_12 = arith.constant dense<0.000000e+00> : vector<60x128xf32>
    %12 = tpu.matmul %9, %11, %cst_12 {dimension_numbers = #tpu.dot_dimension_numbers<[1], [0], [0], [1], [0, 0, 1, 1], [], []>} : vector<60x16xbf16>, vector<16x128xbf16>, vector<60x128xf32> -> vector<60x128xf32>
    %13 = arith.addf %7, %12 : vector<60x128xf32>
    %c0_13 = arith.constant 0 : index
    %c2 = arith.constant 2 : index
    %c0_14 = arith.constant 0 : index
    %14 = vector.load %arg1[%c0_13, %c2, %c0_14] : memref<1x104x16xbf16, #tpu.memory_space<vmem>>, vector<1x60x16xbf16>
    %15 = vector.shape_cast %14 : vector<1x60x16xbf16> to vector<60x16xbf16>
    %c2_15 = arith.constant 2 : index
    %c0_16 = arith.constant 0 : index
    %c0_17 = arith.constant 0 : index
    %16 = vector.load %arg2[%c2_15, %c0_16, %c0_17] : memref<25x16x128xbf16, #tpu.memory_space<vmem>>, vector<1x16x128xbf16>
    %17 = vector.shape_cast %16 : vector<1x16x128xbf16> to vector<16x128xbf16>
    %cst_18 = arith.constant dense<0.000000e+00> : vector<60x128xf32>
    %18 = tpu.matmul %15, %17, %cst_18 {dimension_numbers = #tpu.dot_dimension_numbers<[1], [0], [0], [1], [0, 0, 1, 1], [], []>} : vector<60x16xbf16>, vector<16x128xbf16>, vector<60x128xf32> -> vector<60x128xf32>
    %19 = arith.addf %13, %18 : vector<60x128xf32>
    %c0_19 = arith.constant 0 : index
    %c3 = arith.constant 3 : index
    %c0_20 = arith.constant 0 : index
    %20 = vector.load %arg1[%c0_19, %c3, %c0_20] : memref<1x104x16xbf16, #tpu.memory_space<vmem>>, vector<1x60x16xbf16>
    %21 = vector.shape_cast %20 : vector<1x60x16xbf16> to vector<60x16xbf16>
    %c3_21 = arith.constant 3 : index
    %c0_22 = arith.constant 0 : index
    %c0_23 = arith.constant 0 : index
    %22 = vector.load %arg2[%c3_21, %c0_22, %c0_23] : memref<25x16x128xbf16, #tpu.memory_space<vmem>>, vector<1x16x128xbf16>
    %23 = vector.shape_cast %22 : vector<1x16x128xbf16> to vector<16x128xbf16>
    %cst_24 = arith.constant dense<0.000000e+00> : vector<60x128xf32>
    %24 = tpu.matmul %21, %23, %cst_24 {dimension_numbers = #tpu.dot_dimension_numbers<[1], [0], [0], [1], [0, 0, 1, 1], [], []>} : vector<60x16xbf16>, vector<16x128xbf16>, vector<60x128xf32> -> vector<60x128xf32>
    %25 = arith.addf %19, %24 : vector<60x128xf32>
    %c0_25 = arith.constant 0 : index
    %c4 = arith.constant 4 : index
    %c0_26 = arith.constant 0 : index
    %26 = vector.load %arg1[%c0_25, %c4, %c0_26] : memref<1x104x16xbf16, #tpu.memory_space<vmem>>, vector<1x60x16xbf16>
    %27 = vector.shape_cast %26 : vector<1x60x16xbf16> to vector<60x16xbf16>
    %c4_27 = arith.constant 4 : index
    %c0_28 = arith.constant 0 : index
    %c0_29 = arith.constant 0 : index
    %28 = vector.load %arg2[%c4_27, %c0_28, %c0_29] : memref<25x16x128xbf16, #tpu.memory_space<vmem>>, vector<1x16x128xbf16>
    %29 = vector.shape_cast %28 : vector<1x16x128xbf16> to vector<16x128xbf16>
    %cst_30 = arith.constant dense<0.000000e+00> : vector<60x128xf32>
    %30 = tpu.matmul %27, %29, %cst_30 {dimension_numbers = #tpu.dot_dimension_numbers<[1], [0], [0], [1], [0, 0, 1, 1], [], []>} : vector<60x16xbf16>, vector<16x128xbf16>, vector<60x128xf32> -> vector<60x128xf32>
    %31 = arith.addf %25, %30 : vector<60x128xf32>
    %c0_31 = arith.constant 0 : index
    %c10 = arith.constant 10 : index
    %c0_32 = arith.constant 0 : index
    %32 = vector.load %arg1[%c0_31, %c10, %c0_32] : memref<1x104x16xbf16, #tpu.memory_space<vmem>>, vector<1x60x16xbf16>
    %33 = vector.shape_cast %32 : vector<1x60x16xbf16> to vector<60x16xbf16>
    %c5 = arith.constant 5 : index
    %c0_33 = arith.constant 0 : index
    %c0_34 = arith.constant 0 : index
    %34 = vector.load %arg2[%c5, %c0_33, %c0_34] : memref<25x16x128xbf16, #tpu.memory_space<vmem>>, vector<1x16x128xbf16>
    %35 = vector.shape_cast %34 : vector<1x16x128xbf16> to vector<16x128xbf16>
    %cst_35 = arith.constant dense<0.000000e+00> : vector<60x128xf32>
    %36 = tpu.matmul %33, %35, %cst_35 {dimension_numbers = #tpu.dot_dimension_numbers<[1], [0], [0], [1], [0, 0, 1, 1], [], []>} : vector<60x16xbf16>, vector<16x128xbf16>, vector<60x128xf32> -> vector<60x128xf32>
    %37 = arith.addf %31, %36 : vector<60x128xf32>
    %c0_36 = arith.constant 0 : index
    %c11 = arith.constant 11 : index
    %c0_37 = arith.constant 0 : index
    %38 = vector.load %arg1[%c0_36, %c11, %c0_37] : memref<1x104x16xbf16, #tpu.memory_space<vmem>>, vector<1x60x16xbf16>
    %39 = vector.shape_cast %38 : vector<1x60x16xbf16> to vector<60x16xbf16>
    %c6 = arith.constant 6 : index
    %c0_38 = arith.constant 0 : index
    %c0_39 = arith.constant 0 : index
    %40 = vector.load %arg2[%c6, %c0_38, %c0_39] : memref<25x16x128xbf16, #tpu.memory_space<vmem>>, vector<1x16x128xbf16>
    %41 = vector.shape_cast %40 : vector<1x16x128xbf16> to vector<16x128xbf16>
    %cst_40 = arith.constant dense<0.000000e+00> : vector<60x128xf32>
    %42 = tpu.matmul %39, %41, %cst_40 {dimension_numbers = #tpu.dot_dimension_numbers<[1], [0], [0], [1], [0, 0, 1, 1], [], []>} : vector<60x16xbf16>, vector<16x128xbf16>, vector<60x128xf32> -> vector<60x128xf32>
    %43 = arith.addf %37, %42 : vector<60x128xf32>
    %c0_41 = arith.constant 0 : index
    %c12 = arith.constant 12 : index
    %c0_42 = arith.constant 0 : index
    %44 = vector.load %arg1[%c0_41, %c12, %c0_42] : memref<1x104x16xbf16, #tpu.memory_space<vmem>>, vector<1x60x16xbf16>
    %45 = vector.shape_cast %44 : vector<1x60x16xbf16> to vector<60x16xbf16>
    %c7 = arith.constant 7 : index
    %c0_43 = arith.constant 0 : index
    %c0_44 = arith.constant 0 : index
    %46 = vector.load %arg2[%c7, %c0_43, %c0_44] : memref<25x16x128xbf16, #tpu.memory_space<vmem>>, vector<1x16x128xbf16>
    %47 = vector.shape_cast %46 : vector<1x16x128xbf16> to vector<16x128xbf16>
    %cst_45 = arith.constant dense<0.000000e+00> : vector<60x128xf32>
    %48 = tpu.matmul %45, %47, %cst_45 {dimension_numbers = #tpu.dot_dimension_numbers<[1], [0], [0], [1], [0, 0, 1, 1], [], []>} : vector<60x16xbf16>, vector<16x128xbf16>, vector<60x128xf32> -> vector<60x128xf32>
    %49 = arith.addf %43, %48 : vector<60x128xf32>
    %c0_46 = arith.constant 0 : index
    %c13 = arith.constant 13 : index
    %c0_47 = arith.constant 0 : index
    %50 = vector.load %arg1[%c0_46, %c13, %c0_47] : memref<1x104x16xbf16, #tpu.memory_space<vmem>>, vector<1x60x16xbf16>
    %51 = vector.shape_cast %50 : vector<1x60x16xbf16> to vector<60x16xbf16>
    %c8 = arith.constant 8 : index
    %c0_48 = arith.constant 0 : index
    %c0_49 = arith.constant 0 : index
    %52 = vector.load %arg2[%c8, %c0_48, %c0_49] : memref<25x16x128xbf16, #tpu.memory_space<vmem>>, vector<1x16x128xbf16>
    %53 = vector.shape_cast %52 : vector<1x16x128xbf16> to vector<16x128xbf16>
    %cst_50 = arith.constant dense<0.000000e+00> : vector<60x128xf32>
    %54 = tpu.matmul %51, %53, %cst_50 {dimension_numbers = #tpu.dot_dimension_numbers<[1], [0], [0], [1], [0, 0, 1, 1], [], []>} : vector<60x16xbf16>, vector<16x128xbf16>, vector<60x128xf32> -> vector<60x128xf32>
    %55 = arith.addf %49, %54 : vector<60x128xf32>
    %c0_51 = arith.constant 0 : index
    %c14 = arith.constant 14 : index
    %c0_52 = arith.constant 0 : index
    %56 = vector.load %arg1[%c0_51, %c14, %c0_52] : memref<1x104x16xbf16, #tpu.memory_space<vmem>>, vector<1x60x16xbf16>
    %57 = vector.shape_cast %56 : vector<1x60x16xbf16> to vector<60x16xbf16>
    %c9 = arith.constant 9 : index
    %c0_53 = arith.constant 0 : index
    %c0_54 = arith.constant 0 : index
    %58 = vector.load %arg2[%c9, %c0_53, %c0_54] : memref<25x16x128xbf16, #tpu.memory_space<vmem>>, vector<1x16x128xbf16>
    %59 = vector.shape_cast %58 : vector<1x16x128xbf16> to vector<16x128xbf16>
    %cst_55 = arith.constant dense<0.000000e+00> : vector<60x128xf32>
    %60 = tpu.matmul %57, %59, %cst_55 {dimension_numbers = #tpu.dot_dimension_numbers<[1], [0], [0], [1], [0, 0, 1, 1], [], []>} : vector<60x16xbf16>, vector<16x128xbf16>, vector<60x128xf32> -> vector<60x128xf32>
    %61 = arith.addf %55, %60 : vector<60x128xf32>
    %c0_56 = arith.constant 0 : index
    %c20 = arith.constant 20 : index
    %c0_57 = arith.constant 0 : index
    %62 = vector.load %arg1[%c0_56, %c20, %c0_57] : memref<1x104x16xbf16, #tpu.memory_space<vmem>>, vector<1x60x16xbf16>
    %63 = vector.shape_cast %62 : vector<1x60x16xbf16> to vector<60x16xbf16>
    %c10_58 = arith.constant 10 : index
    %c0_59 = arith.constant 0 : index
    %c0_60 = arith.constant 0 : index
    %64 = vector.load %arg2[%c10_58, %c0_59, %c0_60] : memref<25x16x128xbf16, #tpu.memory_space<vmem>>, vector<1x16x128xbf16>
    %65 = vector.shape_cast %64 : vector<1x16x128xbf16> to vector<16x128xbf16>
    %cst_61 = arith.constant dense<0.000000e+00> : vector<60x128xf32>
    %66 = tpu.matmul %63, %65, %cst_61 {dimension_numbers = #tpu.dot_dimension_numbers<[1], [0], [0], [1], [0, 0, 1, 1], [], []>} : vector<60x16xbf16>, vector<16x128xbf16>, vector<60x128xf32> -> vector<60x128xf32>
    %67 = arith.addf %61, %66 : vector<60x128xf32>
    %c0_62 = arith.constant 0 : index
    %c21 = arith.constant 21 : index
    %c0_63 = arith.constant 0 : index
    %68 = vector.load %arg1[%c0_62, %c21, %c0_63] : memref<1x104x16xbf16, #tpu.memory_space<vmem>>, vector<1x60x16xbf16>
    %69 = vector.shape_cast %68 : vector<1x60x16xbf16> to vector<60x16xbf16>
    %c11_64 = arith.constant 11 : index
    %c0_65 = arith.constant 0 : index
    %c0_66 = arith.constant 0 : index
    %70 = vector.load %arg2[%c11_64, %c0_65, %c0_66] : memref<25x16x128xbf16, #tpu.memory_space<vmem>>, vector<1x16x128xbf16>
    %71 = vector.shape_cast %70 : vector<1x16x128xbf16> to vector<16x128xbf16>
    %cst_67 = arith.constant dense<0.000000e+00> : vector<60x128xf32>
    %72 = tpu.matmul %69, %71, %cst_67 {dimension_numbers = #tpu.dot_dimension_numbers<[1], [0], [0], [1], [0, 0, 1, 1], [], []>} : vector<60x16xbf16>, vector<16x128xbf16>, vector<60x128xf32> -> vector<60x128xf32>
    %73 = arith.addf %67, %72 : vector<60x128xf32>
    %c0_68 = arith.constant 0 : index
    %c22 = arith.constant 22 : index
    %c0_69 = arith.constant 0 : index
    %74 = vector.load %arg1[%c0_68, %c22, %c0_69] : memref<1x104x16xbf16, #tpu.memory_space<vmem>>, vector<1x60x16xbf16>
    %75 = vector.shape_cast %74 : vector<1x60x16xbf16> to vector<60x16xbf16>
    %c12_70 = arith.constant 12 : index
    %c0_71 = arith.constant 0 : index
    %c0_72 = arith.constant 0 : index
    %76 = vector.load %arg2[%c12_70, %c0_71, %c0_72] : memref<25x16x128xbf16, #tpu.memory_space<vmem>>, vector<1x16x128xbf16>
    %77 = vector.shape_cast %76 : vector<1x16x128xbf16> to vector<16x128xbf16>
    %cst_73 = arith.constant dense<0.000000e+00> : vector<60x128xf32>
    %78 = tpu.matmul %75, %77, %cst_73 {dimension_numbers = #tpu.dot_dimension_numbers<[1], [0], [0], [1], [0, 0, 1, 1], [], []>} : vector<60x16xbf16>, vector<16x128xbf16>, vector<60x128xf32> -> vector<60x128xf32>
    %79 = arith.addf %73, %78 : vector<60x128xf32>
    %c0_74 = arith.constant 0 : index
    %c23 = arith.constant 23 : index
    %c0_75 = arith.constant 0 : index
    %80 = vector.load %arg1[%c0_74, %c23, %c0_75] : memref<1x104x16xbf16, #tpu.memory_space<vmem>>, vector<1x60x16xbf16>
    %81 = vector.shape_cast %80 : vector<1x60x16xbf16> to vector<60x16xbf16>
    %c13_76 = arith.constant 13 : index
    %c0_77 = arith.constant 0 : index
    %c0_78 = arith.constant 0 : index
    %82 = vector.load %arg2[%c13_76, %c0_77, %c0_78] : memref<25x16x128xbf16, #tpu.memory_space<vmem>>, vector<1x16x128xbf16>
    %83 = vector.shape_cast %82 : vector<1x16x128xbf16> to vector<16x128xbf16>
    %cst_79 = arith.constant dense<0.000000e+00> : vector<60x128xf32>
    %84 = tpu.matmul %81, %83, %cst_79 {dimension_numbers = #tpu.dot_dimension_numbers<[1], [0], [0], [1], [0, 0, 1, 1], [], []>} : vector<60x16xbf16>, vector<16x128xbf16>, vector<60x128xf32> -> vector<60x128xf32>
    %85 = arith.addf %79, %84 : vector<60x128xf32>
    %c0_80 = arith.constant 0 : index
    %c24 = arith.constant 24 : index
    %c0_81 = arith.constant 0 : index
    %86 = vector.load %arg1[%c0_80, %c24, %c0_81] : memref<1x104x16xbf16, #tpu.memory_space<vmem>>, vector<1x60x16xbf16>
    %87 = vector.shape_cast %86 : vector<1x60x16xbf16> to vector<60x16xbf16>
    %c14_82 = arith.constant 14 : index
    %c0_83 = arith.constant 0 : index
    %c0_84 = arith.constant 0 : index
    %88 = vector.load %arg2[%c14_82, %c0_83, %c0_84] : memref<25x16x128xbf16, #tpu.memory_space<vmem>>, vector<1x16x128xbf16>
    %89 = vector.shape_cast %88 : vector<1x16x128xbf16> to vector<16x128xbf16>
    %cst_85 = arith.constant dense<0.000000e+00> : vector<60x128xf32>
    %90 = tpu.matmul %87, %89, %cst_85 {dimension_numbers = #tpu.dot_dimension_numbers<[1], [0], [0], [1], [0, 0, 1, 1], [], []>} : vector<60x16xbf16>, vector<16x128xbf16>, vector<60x128xf32> -> vector<60x128xf32>
    %91 = arith.addf %85, %90 : vector<60x128xf32>
    %c0_86 = arith.constant 0 : index
    %c30 = arith.constant 30 : index
    %c0_87 = arith.constant 0 : index
    %92 = vector.load %arg1[%c0_86, %c30, %c0_87] : memref<1x104x16xbf16, #tpu.memory_space<vmem>>, vector<1x60x16xbf16>
    %93 = vector.shape_cast %92 : vector<1x60x16xbf16> to vector<60x16xbf16>
    %c15 = arith.constant 15 : index
    %c0_88 = arith.constant 0 : index
    %c0_89 = arith.constant 0 : index
    %94 = vector.load %arg2[%c15, %c0_88, %c0_89] : memref<25x16x128xbf16, #tpu.memory_space<vmem>>, vector<1x16x128xbf16>
    %95 = vector.shape_cast %94 : vector<1x16x128xbf16> to vector<16x128xbf16>
    %cst_90 = arith.constant dense<0.000000e+00> : vector<60x128xf32>
    %96 = tpu.matmul %93, %95, %cst_90 {dimension_numbers = #tpu.dot_dimension_numbers<[1], [0], [0], [1], [0, 0, 1, 1], [], []>} : vector<60x16xbf16>, vector<16x128xbf16>, vector<60x128xf32> -> vector<60x128xf32>
    %97 = arith.addf %91, %96 : vector<60x128xf32>
    %c0_91 = arith.constant 0 : index
    %c31 = arith.constant 31 : index
    %c0_92 = arith.constant 0 : index
    %98 = vector.load %arg1[%c0_91, %c31, %c0_92] : memref<1x104x16xbf16, #tpu.memory_space<vmem>>, vector<1x60x16xbf16>
    %99 = vector.shape_cast %98 : vector<1x60x16xbf16> to vector<60x16xbf16>
    %c16 = arith.constant 16 : index
    %c0_93 = arith.constant 0 : index
    %c0_94 = arith.constant 0 : index
    %100 = vector.load %arg2[%c16, %c0_93, %c0_94] : memref<25x16x128xbf16, #tpu.memory_space<vmem>>, vector<1x16x128xbf16>
    %101 = vector.shape_cast %100 : vector<1x16x128xbf16> to vector<16x128xbf16>
    %cst_95 = arith.constant dense<0.000000e+00> : vector<60x128xf32>
    %102 = tpu.matmul %99, %101, %cst_95 {dimension_numbers = #tpu.dot_dimension_numbers<[1], [0], [0], [1], [0, 0, 1, 1], [], []>} : vector<60x16xbf16>, vector<16x128xbf16>, vector<60x128xf32> -> vector<60x128xf32>
    %103 = arith.addf %97, %102 : vector<60x128xf32>
    %c0_96 = arith.constant 0 : index
    %c32 = arith.constant 32 : index
    %c0_97 = arith.constant 0 : index
    %104 = vector.load %arg1[%c0_96, %c32, %c0_97] : memref<1x104x16xbf16, #tpu.memory_space<vmem>>, vector<1x60x16xbf16>
    %105 = vector.shape_cast %104 : vector<1x60x16xbf16> to vector<60x16xbf16>
    %c17 = arith.constant 17 : index
    %c0_98 = arith.constant 0 : index
    %c0_99 = arith.constant 0 : index
    %106 = vector.load %arg2[%c17, %c0_98, %c0_99] : memref<25x16x128xbf16, #tpu.memory_space<vmem>>, vector<1x16x128xbf16>
    %107 = vector.shape_cast %106 : vector<1x16x128xbf16> to vector<16x128xbf16>
    %cst_100 = arith.constant dense<0.000000e+00> : vector<60x128xf32>
    %108 = tpu.matmul %105, %107, %cst_100 {dimension_numbers = #tpu.dot_dimension_numbers<[1], [0], [0], [1], [0, 0, 1, 1], [], []>} : vector<60x16xbf16>, vector<16x128xbf16>, vector<60x128xf32> -> vector<60x128xf32>
    %109 = arith.addf %103, %108 : vector<60x128xf32>
    %c0_101 = arith.constant 0 : index
    %c33 = arith.constant 33 : index
    %c0_102 = arith.constant 0 : index
    %110 = vector.load %arg1[%c0_101, %c33, %c0_102] : memref<1x104x16xbf16, #tpu.memory_space<vmem>>, vector<1x60x16xbf16>
    %111 = vector.shape_cast %110 : vector<1x60x16xbf16> to vector<60x16xbf16>
    %c18 = arith.constant 18 : index
    %c0_103 = arith.constant 0 : index
    %c0_104 = arith.constant 0 : index
    %112 = vector.load %arg2[%c18, %c0_103, %c0_104] : memref<25x16x128xbf16, #tpu.memory_space<vmem>>, vector<1x16x128xbf16>
    %113 = vector.shape_cast %112 : vector<1x16x128xbf16> to vector<16x128xbf16>
    %cst_105 = arith.constant dense<0.000000e+00> : vector<60x128xf32>
    %114 = tpu.matmul %111, %113, %cst_105 {dimension_numbers = #tpu.dot_dimension_numbers<[1], [0], [0], [1], [0, 0, 1, 1], [], []>} : vector<60x16xbf16>, vector<16x128xbf16>, vector<60x128xf32> -> vector<60x128xf32>
    %115 = arith.addf %109, %114 : vector<60x128xf32>
    %c0_106 = arith.constant 0 : index
    %c34 = arith.constant 34 : index
    %c0_107 = arith.constant 0 : index
    %116 = vector.load %arg1[%c0_106, %c34, %c0_107] : memref<1x104x16xbf16, #tpu.memory_space<vmem>>, vector<1x60x16xbf16>
    %117 = vector.shape_cast %116 : vector<1x60x16xbf16> to vector<60x16xbf16>
    %c19 = arith.constant 19 : index
    %c0_108 = arith.constant 0 : index
    %c0_109 = arith.constant 0 : index
    %118 = vector.load %arg2[%c19, %c0_108, %c0_109] : memref<25x16x128xbf16, #tpu.memory_space<vmem>>, vector<1x16x128xbf16>
    %119 = vector.shape_cast %118 : vector<1x16x128xbf16> to vector<16x128xbf16>
    %cst_110 = arith.constant dense<0.000000e+00> : vector<60x128xf32>
    %120 = tpu.matmul %117, %119, %cst_110 {dimension_numbers = #tpu.dot_dimension_numbers<[1], [0], [0], [1], [0, 0, 1, 1], [], []>} : vector<60x16xbf16>, vector<16x128xbf16>, vector<60x128xf32> -> vector<60x128xf32>
    %121 = arith.addf %115, %120 : vector<60x128xf32>
    %c0_111 = arith.constant 0 : index
    %c40 = arith.constant 40 : index
    %c0_112 = arith.constant 0 : index
    %122 = vector.load %arg1[%c0_111, %c40, %c0_112] : memref<1x104x16xbf16, #tpu.memory_space<vmem>>, vector<1x60x16xbf16>
    %123 = vector.shape_cast %122 : vector<1x60x16xbf16> to vector<60x16xbf16>
    %c20_113 = arith.constant 20 : index
    %c0_114 = arith.constant 0 : index
    %c0_115 = arith.constant 0 : index
    %124 = vector.load %arg2[%c20_113, %c0_114, %c0_115] : memref<25x16x128xbf16, #tpu.memory_space<vmem>>, vector<1x16x128xbf16>
    %125 = vector.shape_cast %124 : vector<1x16x128xbf16> to vector<16x128xbf16>
    %cst_116 = arith.constant dense<0.000000e+00> : vector<60x128xf32>
    %126 = tpu.matmul %123, %125, %cst_116 {dimension_numbers = #tpu.dot_dimension_numbers<[1], [0], [0], [1], [0, 0, 1, 1], [], []>} : vector<60x16xbf16>, vector<16x128xbf16>, vector<60x128xf32> -> vector<60x128xf32>
    %127 = arith.addf %121, %126 : vector<60x128xf32>
    %c0_117 = arith.constant 0 : index
    %c41 = arith.constant 41 : index
    %c0_118 = arith.constant 0 : index
    %128 = vector.load %arg1[%c0_117, %c41, %c0_118] : memref<1x104x16xbf16, #tpu.memory_space<vmem>>, vector<1x60x16xbf16>
    %129 = vector.shape_cast %128 : vector<1x60x16xbf16> to vector<60x16xbf16>
    %c21_119 = arith.constant 21 : index
    %c0_120 = arith.constant 0 : index
    %c0_121 = arith.constant 0 : index
    %130 = vector.load %arg2[%c21_119, %c0_120, %c0_121] : memref<25x16x128xbf16, #tpu.memory_space<vmem>>, vector<1x16x128xbf16>
    %131 = vector.shape_cast %130 : vector<1x16x128xbf16> to vector<16x128xbf16>
    %cst_122 = arith.constant dense<0.000000e+00> : vector<60x128xf32>
    %132 = tpu.matmul %129, %131, %cst_122 {dimension_numbers = #tpu.dot_dimension_numbers<[1], [0], [0], [1], [0, 0, 1, 1], [], []>} : vector<60x16xbf16>, vector<16x128xbf16>, vector<60x128xf32> -> vector<60x128xf32>
    %133 = arith.addf %127, %132 : vector<60x128xf32>
    %c0_123 = arith.constant 0 : index
    %c42 = arith.constant 42 : index
    %c0_124 = arith.constant 0 : index
    %134 = vector.load %arg1[%c0_123, %c42, %c0_124] : memref<1x104x16xbf16, #tpu.memory_space<vmem>>, vector<1x60x16xbf16>
    %135 = vector.shape_cast %134 : vector<1x60x16xbf16> to vector<60x16xbf16>
    %c22_125 = arith.constant 22 : index
    %c0_126 = arith.constant 0 : index
    %c0_127 = arith.constant 0 : index
    %136 = vector.load %arg2[%c22_125, %c0_126, %c0_127] : memref<25x16x128xbf16, #tpu.memory_space<vmem>>, vector<1x16x128xbf16>
    %137 = vector.shape_cast %136 : vector<1x16x128xbf16> to vector<16x128xbf16>
    %cst_128 = arith.constant dense<0.000000e+00> : vector<60x128xf32>
    %138 = tpu.matmul %135, %137, %cst_128 {dimension_numbers = #tpu.dot_dimension_numbers<[1], [0], [0], [1], [0, 0, 1, 1], [], []>} : vector<60x16xbf16>, vector<16x128xbf16>, vector<60x128xf32> -> vector<60x128xf32>
    %139 = arith.addf %133, %138 : vector<60x128xf32>
    %c0_129 = arith.constant 0 : index
    %c43 = arith.constant 43 : index
    %c0_130 = arith.constant 0 : index
    %140 = vector.load %arg1[%c0_129, %c43, %c0_130] : memref<1x104x16xbf16, #tpu.memory_space<vmem>>, vector<1x60x16xbf16>
    %141 = vector.shape_cast %140 : vector<1x60x16xbf16> to vector<60x16xbf16>
    %c23_131 = arith.constant 23 : index
    %c0_132 = arith.constant 0 : index
    %c0_133 = arith.constant 0 : index
    %142 = vector.load %arg2[%c23_131, %c0_132, %c0_133] : memref<25x16x128xbf16, #tpu.memory_space<vmem>>, vector<1x16x128xbf16>
    %143 = vector.shape_cast %142 : vector<1x16x128xbf16> to vector<16x128xbf16>
    %cst_134 = arith.constant dense<0.000000e+00> : vector<60x128xf32>
    %144 = tpu.matmul %141, %143, %cst_134 {dimension_numbers = #tpu.dot_dimension_numbers<[1], [0], [0], [1], [0, 0, 1, 1], [], []>} : vector<60x16xbf16>, vector<16x128xbf16>, vector<60x128xf32> -> vector<60x128xf32>
    %145 = arith.addf %139, %144 : vector<60x128xf32>
    %c0_135 = arith.constant 0 : index
    %c44 = arith.constant 44 : index
    %c0_136 = arith.constant 0 : index
    %146 = vector.load %arg1[%c0_135, %c44, %c0_136] : memref<1x104x16xbf16, #tpu.memory_space<vmem>>, vector<1x60x16xbf16>
    %147 = vector.shape_cast %146 : vector<1x60x16xbf16> to vector<60x16xbf16>
    %c24_137 = arith.constant 24 : index
    %c0_138 = arith.constant 0 : index
    %c0_139 = arith.constant 0 : index
    %148 = vector.load %arg2[%c24_137, %c0_138, %c0_139] : memref<25x16x128xbf16, #tpu.memory_space<vmem>>, vector<1x16x128xbf16>
    %149 = vector.shape_cast %148 : vector<1x16x128xbf16> to vector<16x128xbf16>
    %cst_140 = arith.constant dense<0.000000e+00> : vector<60x128xf32>
    %150 = tpu.matmul %147, %149, %cst_140 {dimension_numbers = #tpu.dot_dimension_numbers<[1], [0], [0], [1], [0, 0, 1, 1], [], []>} : vector<60x16xbf16>, vector<16x128xbf16>, vector<60x128xf32> -> vector<60x128xf32>
    %151 = arith.addf %145, %150 : vector<60x128xf32>
    %cst_141 = arith.constant 0.000000e+00 : f32
    %152 = vector.broadcast %cst_141 : f32 to vector<60x128xf32>
    %153 = arith.maximumf %151, %152 : vector<60x128xf32>
    %154 = arith.mulf %153, %153 : vector<60x128xf32>
    %c1_i32 = arith.constant 1 : i32
    %155 = tpu.dynamic_rotate %154 by %c1_i32 dim 1 : vector<60x128xf32>, i32 -> vector<60x128xf32>
    %156 = arith.addf %154, %155 : vector<60x128xf32>
    %c2_i32 = arith.constant 2 : i32
    %157 = tpu.dynamic_rotate %154 by %c2_i32 dim 1 : vector<60x128xf32>, i32 -> vector<60x128xf32>
    %158 = arith.addf %156, %157 : vector<60x128xf32>
    %c127_i32 = arith.constant 127 : i32
    %159 = tpu.dynamic_rotate %154 by %c127_i32 dim 1 : vector<60x128xf32>, i32 -> vector<60x128xf32>
    %160 = arith.addf %158, %159 : vector<60x128xf32>
    %c126_i32 = arith.constant 126 : i32
    %161 = tpu.dynamic_rotate %154 by %c126_i32 dim 1 : vector<60x128xf32>, i32 -> vector<60x128xf32>
    %162 = arith.addf %160, %161 : vector<60x128xf32>
    %cst_142 = arith.constant 2.000000e-05 : f32
    %163 = vector.broadcast %cst_142 : f32 to vector<60x128xf32>
    %164 = arith.mulf %163, %162 : vector<60x128xf32>
    %cst_143 = arith.constant 1.000000e+00 : f32
    %165 = vector.broadcast %cst_143 : f32 to vector<60x128xf32>
    %166 = arith.addf %165, %164 : vector<60x128xf32>
    %167 = math.rsqrt %166 : vector<60x128xf32>
    %168 = math.sqrt %166 : vector<60x128xf32>
    %169 = math.rsqrt %168 : vector<60x128xf32>
    %170 = arith.mulf %167, %169 : vector<60x128xf32>
    %171 = arith.mulf %153, %170 : vector<60x128xf32>
    %c0_144 = arith.constant 0 : index
    %c0_145 = arith.constant 0 : index
    %172 = vector.load %arg5[%c0_144, %c0_145] : memref<64x128xf32, #tpu.memory_space<vmem>>, vector<60x128xf32>
    tpu.vector_store %arg5[%c0_144, %c0_145], %171 {strides = array<i32>} : memref<64x128xf32, #tpu.memory_space<vmem>>, vector<60x128xf32>,
    %c0_146 = arith.constant 0 : index
    %c0_147 = arith.constant 0 : index
    %173 = tpu.strided_load %arg5[%c0_146, %c0_147] {strides = array<i32: 2, 1>} : memref<64x128xf32, #tpu.memory_space<vmem>>, vector<2x128xf32>
    %c1_148 = arith.constant 1 : index
    %c0_149 = arith.constant 0 : index
    %174 = tpu.strided_load %arg5[%c1_148, %c0_149] {strides = array<i32: 2, 1>} : memref<64x128xf32, #tpu.memory_space<vmem>>, vector<2x128xf32>
    %175 = arith.maximumf %173, %174 : vector<2x128xf32>
    %c2_150 = arith.constant 2 : index
    %c0_151 = arith.constant 0 : index
    %176 = tpu.strided_load %arg5[%c2_150, %c0_151] {strides = array<i32: 2, 1>} : memref<64x128xf32, #tpu.memory_space<vmem>>, vector<2x128xf32>
    %177 = arith.maximumf %175, %176 : vector<2x128xf32>
    %c10_152 = arith.constant 10 : index
    %c0_153 = arith.constant 0 : index
    %178 = tpu.strided_load %arg5[%c10_152, %c0_153] {strides = array<i32: 2, 1>} : memref<64x128xf32, #tpu.memory_space<vmem>>, vector<2x128xf32>
    %179 = arith.maximumf %177, %178 : vector<2x128xf32>
    %c11_154 = arith.constant 11 : index
    %c0_155 = arith.constant 0 : index
    %180 = tpu.strided_load %arg5[%c11_154, %c0_155] {strides = array<i32: 2, 1>} : memref<64x128xf32, #tpu.memory_space<vmem>>, vector<2x128xf32>
    %181 = arith.maximumf %179, %180 : vector<2x128xf32>
    %c12_156 = arith.constant 12 : index
    %c0_157 = arith.constant 0 : index
    %182 = tpu.strided_load %arg5[%c12_156, %c0_157] {strides = array<i32: 2, 1>} : memref<64x128xf32, #tpu.memory_space<vmem>>, vector<2x128xf32>
    %183 = arith.maximumf %181, %182 : vector<2x128xf32>
    %c20_158 = arith.constant 20 : index
    %c0_159 = arith.constant 0 : index
    %184 = tpu.strided_load %arg5[%c20_158, %c0_159] {strides = array<i32: 2, 1>} : memref<64x128xf32, #tpu.memory_space<vmem>>, vector<2x128xf32>
    %185 = arith.maximumf %183, %184 : vector<2x128xf32>
    %c21_160 = arith.constant 21 : index
    %c0_161 = arith.constant 0 : index
    %186 = tpu.strided_load %arg5[%c21_160, %c0_161] {strides = array<i32: 2, 1>} : memref<64x128xf32, #tpu.memory_space<vmem>>, vector<2x128xf32>
    %187 = arith.maximumf %185, %186 : vector<2x128xf32>
    %c22_162 = arith.constant 22 : index
    %c0_163 = arith.constant 0 : index
    %188 = tpu.strided_load %arg5[%c22_162, %c0_163] {strides = array<i32: 2, 1>} : memref<64x128xf32, #tpu.memory_space<vmem>>, vector<2x128xf32>
    %189 = arith.maximumf %187, %188 : vector<2x128xf32>
    %190 = vector.extract_strided_slice %189 {offsets = [0, 0], sizes = [2, 32], strides = [1, 1]} : vector<2x128xf32> to vector<2x32xf32>
    %191 = arith.truncf %190 : vector<2x32xf32> to vector<2x32xbf16>
    %c0_164 = arith.constant 0 : index
    %c0_165 = arith.constant 0 : index
    %c0_166 = arith.constant 0 : index
    %c0_167 = arith.constant 0 : index
    %192 = vector.load %arg4[%c0_164, %c0_165, %c0_166, %c0_167] : memref<1x2x2x32xbf16, #tpu.memory_space<vmem>>, vector<1x1x2x32xbf16>
    %193 = vector.shape_cast %192 : vector<1x1x2x32xbf16> to vector<2x32xbf16>
    %194 = vector.shape_cast %191 : vector<2x32xbf16> to vector<1x1x2x32xbf16>
    tpu.vector_store %arg4[%c0_164, %c0_165, %c0_166, %c0_167], %194 {strides = array<i32>} : memref<1x2x2x32xbf16, #tpu.memory_space<vmem>>, vector<1x1x2x32xbf16>,
    %c20_168 = arith.constant 20 : index
    %c0_169 = arith.constant 0 : index
    %195 = tpu.strided_load %arg5[%c20_168, %c0_169] {strides = array<i32: 2, 1>} : memref<64x128xf32, #tpu.memory_space<vmem>>, vector<2x128xf32>
    %c21_170 = arith.constant 21 : index
    %c0_171 = arith.constant 0 : index
    %196 = tpu.strided_load %arg5[%c21_170, %c0_171] {strides = array<i32: 2, 1>} : memref<64x128xf32, #tpu.memory_space<vmem>>, vector<2x128xf32>
    %197 = arith.maximumf %195, %196 : vector<2x128xf32>
    %c22_172 = arith.constant 22 : index
    %c0_173 = arith.constant 0 : index
    %198 = tpu.strided_load %arg5[%c22_172, %c0_173] {strides = array<i32: 2, 1>} : memref<64x128xf32, #tpu.memory_space<vmem>>, vector<2x128xf32>
    %199 = arith.maximumf %197, %198 : vector<2x128xf32>
    %c30_174 = arith.constant 30 : index
    %c0_175 = arith.constant 0 : index
    %200 = tpu.strided_load %arg5[%c30_174, %c0_175] {strides = array<i32: 2, 1>} : memref<64x128xf32, #tpu.memory_space<vmem>>, vector<2x128xf32>
    %201 = arith.maximumf %199, %200 : vector<2x128xf32>
    %c31_176 = arith.constant 31 : index
    %c0_177 = arith.constant 0 : index
    %202 = tpu.strided_load %arg5[%c31_176, %c0_177] {strides = array<i32: 2, 1>} : memref<64x128xf32, #tpu.memory_space<vmem>>, vector<2x128xf32>
    %203 = arith.maximumf %201, %202 : vector<2x128xf32>
    %c32_178 = arith.constant 32 : index
    %c0_179 = arith.constant 0 : index
    %204 = tpu.strided_load %arg5[%c32_178, %c0_179] {strides = array<i32: 2, 1>} : memref<64x128xf32, #tpu.memory_space<vmem>>, vector<2x128xf32>
    %205 = arith.maximumf %203, %204 : vector<2x128xf32>
    %c40_180 = arith.constant 40 : index
    %c0_181 = arith.constant 0 : index
    %206 = tpu.strided_load %arg5[%c40_180, %c0_181] {strides = array<i32: 2, 1>} : memref<64x128xf32, #tpu.memory_space<vmem>>, vector<2x128xf32>
    %207 = arith.maximumf %205, %206 : vector<2x128xf32>
    %c41_182 = arith.constant 41 : index
    %c0_183 = arith.constant 0 : index
    %208 = tpu.strided_load %arg5[%c41_182, %c0_183] {strides = array<i32: 2, 1>} : memref<64x128xf32, #tpu.memory_space<vmem>>, vector<2x128xf32>
    %209 = arith.maximumf %207, %208 : vector<2x128xf32>
    %c42_184 = arith.constant 42 : index
    %c0_185 = arith.constant 0 : index
    %210 = tpu.strided_load %arg5[%c42_184, %c0_185] {strides = array<i32: 2, 1>} : memref<64x128xf32, #tpu.memory_space<vmem>>, vector<2x128xf32>
    %211 = arith.maximumf %209, %210 : vector<2x128xf32>
    %212 = vector.extract_strided_slice %211 {offsets = [0, 0], sizes = [2, 32], strides = [1, 1]} : vector<2x128xf32> to vector<2x32xf32>
    %213 = arith.truncf %212 : vector<2x32xf32> to vector<2x32xbf16>
    %c0_186 = arith.constant 0 : index
    %c1_187 = arith.constant 1 : index
    %c0_188 = arith.constant 0 : index
    %c0_189 = arith.constant 0 : index
    %214 = vector.load %arg4[%c0_186, %c1_187, %c0_188, %c0_189] : memref<1x2x2x32xbf16, #tpu.memory_space<vmem>>, vector<1x1x2x32xbf16>
    %215 = vector.shape_cast %214 : vector<1x1x2x32xbf16> to vector<2x32xbf16>
    %216 = vector.shape_cast %213 : vector<2x32xbf16> to vector<1x1x2x32xbf16>
    tpu.vector_store %arg4[%c0_186, %c1_187, %c0_188, %c0_189], %216 {strides = array<i32>} : memref<1x2x2x32xbf16, #tpu.memory_space<vmem>>, vector<1x1x2x32xbf16>,
    return
  }
  func.func @transform_0(%arg0: i32) -> (i32, i32, i32) {
    %c0_i32 = arith.constant 0 : i32
    %c0_i32_0 = arith.constant 0 : i32
    %c0_i32_1 = arith.constant 0 : i32
    return %arg0, %c0_i32, %c0_i32_0 : i32, i32, i32
  }
  func.func @transform_1(%arg0: i32) -> (i32, i32, i32) {
    %c0_i32 = arith.constant 0 : i32
    %c0_i32_0 = arith.constant 0 : i32
    %c0_i32_1 = arith.constant 0 : i32
    %c0_i32_2 = arith.constant 0 : i32
    return %c0_i32, %c0_i32_0, %c0_i32_1 : i32, i32, i32
  }
  func.func @transform_2(%arg0: i32) -> (i32, i32) {
    %c0_i32 = arith.constant 0 : i32
    %c0_i32_0 = arith.constant 0 : i32
    %c0_i32_1 = arith.constant 0 : i32
    return %c0_i32, %c0_i32_0 : i32, i32
  }
  func.func @transform_3(%arg0: i32) -> (i32, i32, i32, i32) {
    %c0_i32 = arith.constant 0 : i32
    %c0_i32_0 = arith.constant 0 : i32
    %c0_i32_1 = arith.constant 0 : i32
    %c0_i32_2 = arith.constant 0 : i32
    return %arg0, %c0_i32, %c0_i32_0, %c0_i32_1 : i32, i32, i32, i32
  }
}

module attributes {stable_mosaic.version = 11 : i64} {
  func.func @_fused_block_kernel(%arg0: i32, %arg1: memref<1x24x32xbf16, #tpu.memory_space<vmem>>, %arg2: memref<9x32x128xbf16, #tpu.memory_space<vmem>>, %arg3: memref<1x128xf32, #tpu.memory_space<vmem>>, %arg4: memref<1x2x2x48xbf16, #tpu.memory_space<vmem>>) attributes {dimension_semantics = [#tpu.dimension_semantics<parallel>], iteration_bounds = array<i64: 2>, scalar_prefetch = 0 : i64, scratch_operands = 0 : i64, tpu.core_type = #tpu.core_type<tc>, window_params = [{transform_indices = @transform_0, window_bounds = array<i64: 1, 24, 32>}, {pipeline_mode = #tpu.pipeline_mode<synchronous>, transform_indices = @transform_1, window_bounds = array<i64: 9, 32, 128>}, {pipeline_mode = #tpu.pipeline_mode<synchronous>, transform_indices = @transform_2, window_bounds = array<i64: 1, 128>}, {transform_indices = @transform_3, window_bounds = array<i64: 1, 2, 2, 48>}]} {
    %c0 = arith.constant 0 : index
    %c0_0 = arith.constant 0 : index
    %0 = vector.load %arg3[%c0, %c0_0] : memref<1x128xf32, #tpu.memory_space<vmem>>, vector<1x128xf32>
    %c0_1 = arith.constant 0 : index
    %c0_2 = arith.constant 0 : index
    %c0_3 = arith.constant 0 : index
    %1 = vector.load %arg1[%c0_1, %c0_2, %c0_3] : memref<1x24x32xbf16, #tpu.memory_space<vmem>>, vector<1x8x32xbf16>
    %2 = vector.shape_cast %1 : vector<1x8x32xbf16> to vector<8x32xbf16>
    %c0_4 = arith.constant 0 : index
    %c0_5 = arith.constant 0 : index
    %c0_6 = arith.constant 0 : index
    %3 = vector.load %arg2[%c0_4, %c0_5, %c0_6] : memref<9x32x128xbf16, #tpu.memory_space<vmem>>, vector<1x32x128xbf16>
    %4 = vector.shape_cast %3 : vector<1x32x128xbf16> to vector<32x128xbf16>
    %cst = arith.constant dense<0.000000e+00> : vector<8x128xf32>
    %5 = tpu.matmul %2, %4, %cst {dimension_numbers = #tpu.dot_dimension_numbers<[1], [0], [0], [1], [0, 0, 1, 1], [], []>} : vector<8x32xbf16>, vector<32x128xbf16>, vector<8x128xf32> -> vector<8x128xf32>
    %6 = vector.broadcast %0 : vector<1x128xf32> to vector<8x128xf32>
    %7 = arith.addf %5, %6 : vector<8x128xf32>
    %c0_7 = arith.constant 0 : index
    %c1 = arith.constant 1 : index
    %c0_8 = arith.constant 0 : index
    %8 = vector.load %arg1[%c0_7, %c1, %c0_8] : memref<1x24x32xbf16, #tpu.memory_space<vmem>>, vector<1x8x32xbf16>
    %9 = vector.shape_cast %8 : vector<1x8x32xbf16> to vector<8x32xbf16>
    %c1_9 = arith.constant 1 : index
    %c0_10 = arith.constant 0 : index
    %c0_11 = arith.constant 0 : index
    %10 = vector.load %arg2[%c1_9, %c0_10, %c0_11] : memref<9x32x128xbf16, #tpu.memory_space<vmem>>, vector<1x32x128xbf16>
    %11 = vector.shape_cast %10 : vector<1x32x128xbf16> to vector<32x128xbf16>
    %cst_12 = arith.constant dense<0.000000e+00> : vector<8x128xf32>
    %12 = tpu.matmul %9, %11, %cst_12 {dimension_numbers = #tpu.dot_dimension_numbers<[1], [0], [0], [1], [0, 0, 1, 1], [], []>} : vector<8x32xbf16>, vector<32x128xbf16>, vector<8x128xf32> -> vector<8x128xf32>
    %13 = arith.addf %7, %12 : vector<8x128xf32>
    %c0_13 = arith.constant 0 : index
    %c2 = arith.constant 2 : index
    %c0_14 = arith.constant 0 : index
    %14 = vector.load %arg1[%c0_13, %c2, %c0_14] : memref<1x24x32xbf16, #tpu.memory_space<vmem>>, vector<1x8x32xbf16>
    %15 = vector.shape_cast %14 : vector<1x8x32xbf16> to vector<8x32xbf16>
    %c2_15 = arith.constant 2 : index
    %c0_16 = arith.constant 0 : index
    %c0_17 = arith.constant 0 : index
    %16 = vector.load %arg2[%c2_15, %c0_16, %c0_17] : memref<9x32x128xbf16, #tpu.memory_space<vmem>>, vector<1x32x128xbf16>
    %17 = vector.shape_cast %16 : vector<1x32x128xbf16> to vector<32x128xbf16>
    %cst_18 = arith.constant dense<0.000000e+00> : vector<8x128xf32>
    %18 = tpu.matmul %15, %17, %cst_18 {dimension_numbers = #tpu.dot_dimension_numbers<[1], [0], [0], [1], [0, 0, 1, 1], [], []>} : vector<8x32xbf16>, vector<32x128xbf16>, vector<8x128xf32> -> vector<8x128xf32>
    %19 = arith.addf %13, %18 : vector<8x128xf32>
    %c0_19 = arith.constant 0 : index
    %c4 = arith.constant 4 : index
    %c0_20 = arith.constant 0 : index
    %20 = vector.load %arg1[%c0_19, %c4, %c0_20] : memref<1x24x32xbf16, #tpu.memory_space<vmem>>, vector<1x8x32xbf16>
    %21 = vector.shape_cast %20 : vector<1x8x32xbf16> to vector<8x32xbf16>
    %c3 = arith.constant 3 : index
    %c0_21 = arith.constant 0 : index
    %c0_22 = arith.constant 0 : index
    %22 = vector.load %arg2[%c3, %c0_21, %c0_22] : memref<9x32x128xbf16, #tpu.memory_space<vmem>>, vector<1x32x128xbf16>
    %23 = vector.shape_cast %22 : vector<1x32x128xbf16> to vector<32x128xbf16>
    %cst_23 = arith.constant dense<0.000000e+00> : vector<8x128xf32>
    %24 = tpu.matmul %21, %23, %cst_23 {dimension_numbers = #tpu.dot_dimension_numbers<[1], [0], [0], [1], [0, 0, 1, 1], [], []>} : vector<8x32xbf16>, vector<32x128xbf16>, vector<8x128xf32> -> vector<8x128xf32>
    %25 = arith.addf %19, %24 : vector<8x128xf32>
    %c0_24 = arith.constant 0 : index
    %c5 = arith.constant 5 : index
    %c0_25 = arith.constant 0 : index
    %26 = vector.load %arg1[%c0_24, %c5, %c0_25] : memref<1x24x32xbf16, #tpu.memory_space<vmem>>, vector<1x8x32xbf16>
    %27 = vector.shape_cast %26 : vector<1x8x32xbf16> to vector<8x32xbf16>
    %c4_26 = arith.constant 4 : index
    %c0_27 = arith.constant 0 : index
    %c0_28 = arith.constant 0 : index
    %28 = vector.load %arg2[%c4_26, %c0_27, %c0_28] : memref<9x32x128xbf16, #tpu.memory_space<vmem>>, vector<1x32x128xbf16>
    %29 = vector.shape_cast %28 : vector<1x32x128xbf16> to vector<32x128xbf16>
    %cst_29 = arith.constant dense<0.000000e+00> : vector<8x128xf32>
    %30 = tpu.matmul %27, %29, %cst_29 {dimension_numbers = #tpu.dot_dimension_numbers<[1], [0], [0], [1], [0, 0, 1, 1], [], []>} : vector<8x32xbf16>, vector<32x128xbf16>, vector<8x128xf32> -> vector<8x128xf32>
    %31 = arith.addf %25, %30 : vector<8x128xf32>
    %c0_30 = arith.constant 0 : index
    %c6 = arith.constant 6 : index
    %c0_31 = arith.constant 0 : index
    %32 = vector.load %arg1[%c0_30, %c6, %c0_31] : memref<1x24x32xbf16, #tpu.memory_space<vmem>>, vector<1x8x32xbf16>
    %33 = vector.shape_cast %32 : vector<1x8x32xbf16> to vector<8x32xbf16>
    %c5_32 = arith.constant 5 : index
    %c0_33 = arith.constant 0 : index
    %c0_34 = arith.constant 0 : index
    %34 = vector.load %arg2[%c5_32, %c0_33, %c0_34] : memref<9x32x128xbf16, #tpu.memory_space<vmem>>, vector<1x32x128xbf16>
    %35 = vector.shape_cast %34 : vector<1x32x128xbf16> to vector<32x128xbf16>
    %cst_35 = arith.constant dense<0.000000e+00> : vector<8x128xf32>
    %36 = tpu.matmul %33, %35, %cst_35 {dimension_numbers = #tpu.dot_dimension_numbers<[1], [0], [0], [1], [0, 0, 1, 1], [], []>} : vector<8x32xbf16>, vector<32x128xbf16>, vector<8x128xf32> -> vector<8x128xf32>
    %37 = arith.addf %31, %36 : vector<8x128xf32>
    %c0_36 = arith.constant 0 : index
    %c8 = arith.constant 8 : index
    %c0_37 = arith.constant 0 : index
    %38 = vector.load %arg1[%c0_36, %c8, %c0_37] : memref<1x24x32xbf16, #tpu.memory_space<vmem>>, vector<1x8x32xbf16>
    %39 = vector.shape_cast %38 : vector<1x8x32xbf16> to vector<8x32xbf16>
    %c6_38 = arith.constant 6 : index
    %c0_39 = arith.constant 0 : index
    %c0_40 = arith.constant 0 : index
    %40 = vector.load %arg2[%c6_38, %c0_39, %c0_40] : memref<9x32x128xbf16, #tpu.memory_space<vmem>>, vector<1x32x128xbf16>
    %41 = vector.shape_cast %40 : vector<1x32x128xbf16> to vector<32x128xbf16>
    %cst_41 = arith.constant dense<0.000000e+00> : vector<8x128xf32>
    %42 = tpu.matmul %39, %41, %cst_41 {dimension_numbers = #tpu.dot_dimension_numbers<[1], [0], [0], [1], [0, 0, 1, 1], [], []>} : vector<8x32xbf16>, vector<32x128xbf16>, vector<8x128xf32> -> vector<8x128xf32>
    %43 = arith.addf %37, %42 : vector<8x128xf32>
    %c0_42 = arith.constant 0 : index
    %c9 = arith.constant 9 : index
    %c0_43 = arith.constant 0 : index
    %44 = vector.load %arg1[%c0_42, %c9, %c0_43] : memref<1x24x32xbf16, #tpu.memory_space<vmem>>, vector<1x8x32xbf16>
    %45 = vector.shape_cast %44 : vector<1x8x32xbf16> to vector<8x32xbf16>
    %c7 = arith.constant 7 : index
    %c0_44 = arith.constant 0 : index
    %c0_45 = arith.constant 0 : index
    %46 = vector.load %arg2[%c7, %c0_44, %c0_45] : memref<9x32x128xbf16, #tpu.memory_space<vmem>>, vector<1x32x128xbf16>
    %47 = vector.shape_cast %46 : vector<1x32x128xbf16> to vector<32x128xbf16>
    %cst_46 = arith.constant dense<0.000000e+00> : vector<8x128xf32>
    %48 = tpu.matmul %45, %47, %cst_46 {dimension_numbers = #tpu.dot_dimension_numbers<[1], [0], [0], [1], [0, 0, 1, 1], [], []>} : vector<8x32xbf16>, vector<32x128xbf16>, vector<8x128xf32> -> vector<8x128xf32>
    %49 = arith.addf %43, %48 : vector<8x128xf32>
    %c0_47 = arith.constant 0 : index
    %c10 = arith.constant 10 : index
    %c0_48 = arith.constant 0 : index
    %50 = vector.load %arg1[%c0_47, %c10, %c0_48] : memref<1x24x32xbf16, #tpu.memory_space<vmem>>, vector<1x8x32xbf16>
    %51 = vector.shape_cast %50 : vector<1x8x32xbf16> to vector<8x32xbf16>
    %c8_49 = arith.constant 8 : index
    %c0_50 = arith.constant 0 : index
    %c0_51 = arith.constant 0 : index
    %52 = vector.load %arg2[%c8_49, %c0_50, %c0_51] : memref<9x32x128xbf16, #tpu.memory_space<vmem>>, vector<1x32x128xbf16>
    %53 = vector.shape_cast %52 : vector<1x32x128xbf16> to vector<32x128xbf16>
    %cst_52 = arith.constant dense<0.000000e+00> : vector<8x128xf32>
    %54 = tpu.matmul %51, %53, %cst_52 {dimension_numbers = #tpu.dot_dimension_numbers<[1], [0], [0], [1], [0, 0, 1, 1], [], []>} : vector<8x32xbf16>, vector<32x128xbf16>, vector<8x128xf32> -> vector<8x128xf32>
    %55 = arith.addf %49, %54 : vector<8x128xf32>
    %cst_53 = arith.constant 0.000000e+00 : f32
    %56 = vector.broadcast %cst_53 : f32 to vector<8x128xf32>
    %57 = arith.maximumf %55, %56 : vector<8x128xf32>
    %58 = vector.extract_strided_slice %57 {offsets = [0, 0], sizes = [2, 48], strides = [1, 1]} : vector<8x128xf32> to vector<2x48xf32>
    %59 = arith.truncf %58 : vector<2x48xf32> to vector<2x48xbf16>
    %c0_54 = arith.constant 0 : index
    %c0_55 = arith.constant 0 : index
    %c0_56 = arith.constant 0 : index
    %c0_57 = arith.constant 0 : index
    %60 = vector.load %arg4[%c0_54, %c0_55, %c0_56, %c0_57] : memref<1x2x2x48xbf16, #tpu.memory_space<vmem>>, vector<1x1x2x48xbf16>
    %61 = vector.shape_cast %60 : vector<1x1x2x48xbf16> to vector<2x48xbf16>
    %62 = vector.shape_cast %59 : vector<2x48xbf16> to vector<1x1x2x48xbf16>
    tpu.vector_store %arg4[%c0_54, %c0_55, %c0_56, %c0_57], %62 {strides = array<i32>} : memref<1x2x2x48xbf16, #tpu.memory_space<vmem>>, vector<1x1x2x48xbf16>,
    %63 = vector.extract_strided_slice %57 {offsets = [4, 0], sizes = [2, 48], strides = [1, 1]} : vector<8x128xf32> to vector<2x48xf32>
    %64 = arith.truncf %63 : vector<2x48xf32> to vector<2x48xbf16>
    %c0_58 = arith.constant 0 : index
    %c1_59 = arith.constant 1 : index
    %c0_60 = arith.constant 0 : index
    %c0_61 = arith.constant 0 : index
    %65 = vector.load %arg4[%c0_58, %c1_59, %c0_60, %c0_61] : memref<1x2x2x48xbf16, #tpu.memory_space<vmem>>, vector<1x1x2x48xbf16>
    %66 = vector.shape_cast %65 : vector<1x1x2x48xbf16> to vector<2x48xbf16>
    %67 = vector.shape_cast %64 : vector<2x48xbf16> to vector<1x1x2x48xbf16>
    tpu.vector_store %arg4[%c0_58, %c1_59, %c0_60, %c0_61], %67 {strides = array<i32>} : memref<1x2x2x48xbf16, #tpu.memory_space<vmem>>, vector<1x1x2x48xbf16>,
    return
  }
  func.func @transform_0(%arg0: i32) -> (i32, i32, i32) {
    %c0_i32 = arith.constant 0 : i32
    %c0_i32_0 = arith.constant 0 : i32
    %c0_i32_1 = arith.constant 0 : i32
    return %arg0, %c0_i32, %c0_i32_0 : i32, i32, i32
  }
  func.func @transform_1(%arg0: i32) -> (i32, i32, i32) {
    %c0_i32 = arith.constant 0 : i32
    %c0_i32_0 = arith.constant 0 : i32
    %c0_i32_1 = arith.constant 0 : i32
    %c0_i32_2 = arith.constant 0 : i32
    return %c0_i32, %c0_i32_0, %c0_i32_1 : i32, i32, i32
  }
  func.func @transform_2(%arg0: i32) -> (i32, i32) {
    %c0_i32 = arith.constant 0 : i32
    %c0_i32_0 = arith.constant 0 : i32
    %c0_i32_1 = arith.constant 0 : i32
    return %c0_i32, %c0_i32_0 : i32, i32
  }
  func.func @transform_3(%arg0: i32) -> (i32, i32, i32, i32) {
    %c0_i32 = arith.constant 0 : i32
    %c0_i32_0 = arith.constant 0 : i32
    %c0_i32_1 = arith.constant 0 : i32
    %c0_i32_2 = arith.constant 0 : i32
    return %arg0, %c0_i32, %c0_i32_0, %c0_i32_1 : i32, i32, i32, i32
  }
}

module attributes {stable_mosaic.version = 11 : i64} {
  func.func @_fused_block_kernel(%arg0: i32, %arg1: memref<1x24x48xbf16, #tpu.memory_space<vmem>>, %arg2: memref<9x48x128xbf16, #tpu.memory_space<vmem>>, %arg3: memref<1x128xf32, #tpu.memory_space<vmem>>, %arg4: memref<1x2x2x48xbf16, #tpu.memory_space<vmem>>) attributes {dimension_semantics = [#tpu.dimension_semantics<parallel>], iteration_bounds = array<i64: 2>, scalar_prefetch = 0 : i64, scratch_operands = 0 : i64, tpu.core_type = #tpu.core_type<tc>, window_params = [{transform_indices = @transform_0, window_bounds = array<i64: 1, 24, 48>}, {pipeline_mode = #tpu.pipeline_mode<synchronous>, transform_indices = @transform_1, window_bounds = array<i64: 9, 48, 128>}, {pipeline_mode = #tpu.pipeline_mode<synchronous>, transform_indices = @transform_2, window_bounds = array<i64: 1, 128>}, {transform_indices = @transform_3, window_bounds = array<i64: 1, 2, 2, 48>}]} {
    %c0 = arith.constant 0 : index
    %c0_0 = arith.constant 0 : index
    %0 = vector.load %arg3[%c0, %c0_0] : memref<1x128xf32, #tpu.memory_space<vmem>>, vector<1x128xf32>
    %c0_1 = arith.constant 0 : index
    %c0_2 = arith.constant 0 : index
    %c0_3 = arith.constant 0 : index
    %1 = vector.load %arg1[%c0_1, %c0_2, %c0_3] : memref<1x24x48xbf16, #tpu.memory_space<vmem>>, vector<1x8x48xbf16>
    %2 = vector.shape_cast %1 : vector<1x8x48xbf16> to vector<8x48xbf16>
    %c0_4 = arith.constant 0 : index
    %c0_5 = arith.constant 0 : index
    %c0_6 = arith.constant 0 : index
    %3 = vector.load %arg2[%c0_4, %c0_5, %c0_6] : memref<9x48x128xbf16, #tpu.memory_space<vmem>>, vector<1x48x128xbf16>
    %4 = vector.shape_cast %3 : vector<1x48x128xbf16> to vector<48x128xbf16>
    %cst = arith.constant dense<0.000000e+00> : vector<8x128xf32>
    %5 = tpu.matmul %2, %4, %cst {dimension_numbers = #tpu.dot_dimension_numbers<[1], [0], [0], [1], [0, 0, 1, 1], [], []>} : vector<8x48xbf16>, vector<48x128xbf16>, vector<8x128xf32> -> vector<8x128xf32>
    %6 = vector.broadcast %0 : vector<1x128xf32> to vector<8x128xf32>
    %7 = arith.addf %5, %6 : vector<8x128xf32>
    %c0_7 = arith.constant 0 : index
    %c1 = arith.constant 1 : index
    %c0_8 = arith.constant 0 : index
    %8 = vector.load %arg1[%c0_7, %c1, %c0_8] : memref<1x24x48xbf16, #tpu.memory_space<vmem>>, vector<1x8x48xbf16>
    %9 = vector.shape_cast %8 : vector<1x8x48xbf16> to vector<8x48xbf16>
    %c1_9 = arith.constant 1 : index
    %c0_10 = arith.constant 0 : index
    %c0_11 = arith.constant 0 : index
    %10 = vector.load %arg2[%c1_9, %c0_10, %c0_11] : memref<9x48x128xbf16, #tpu.memory_space<vmem>>, vector<1x48x128xbf16>
    %11 = vector.shape_cast %10 : vector<1x48x128xbf16> to vector<48x128xbf16>
    %cst_12 = arith.constant dense<0.000000e+00> : vector<8x128xf32>
    %12 = tpu.matmul %9, %11, %cst_12 {dimension_numbers = #tpu.dot_dimension_numbers<[1], [0], [0], [1], [0, 0, 1, 1], [], []>} : vector<8x48xbf16>, vector<48x128xbf16>, vector<8x128xf32> -> vector<8x128xf32>
    %13 = arith.addf %7, %12 : vector<8x128xf32>
    %c0_13 = arith.constant 0 : index
    %c2 = arith.constant 2 : index
    %c0_14 = arith.constant 0 : index
    %14 = vector.load %arg1[%c0_13, %c2, %c0_14] : memref<1x24x48xbf16, #tpu.memory_space<vmem>>, vector<1x8x48xbf16>
    %15 = vector.shape_cast %14 : vector<1x8x48xbf16> to vector<8x48xbf16>
    %c2_15 = arith.constant 2 : index
    %c0_16 = arith.constant 0 : index
    %c0_17 = arith.constant 0 : index
    %16 = vector.load %arg2[%c2_15, %c0_16, %c0_17] : memref<9x48x128xbf16, #tpu.memory_space<vmem>>, vector<1x48x128xbf16>
    %17 = vector.shape_cast %16 : vector<1x48x128xbf16> to vector<48x128xbf16>
    %cst_18 = arith.constant dense<0.000000e+00> : vector<8x128xf32>
    %18 = tpu.matmul %15, %17, %cst_18 {dimension_numbers = #tpu.dot_dimension_numbers<[1], [0], [0], [1], [0, 0, 1, 1], [], []>} : vector<8x48xbf16>, vector<48x128xbf16>, vector<8x128xf32> -> vector<8x128xf32>
    %19 = arith.addf %13, %18 : vector<8x128xf32>
    %c0_19 = arith.constant 0 : index
    %c4 = arith.constant 4 : index
    %c0_20 = arith.constant 0 : index
    %20 = vector.load %arg1[%c0_19, %c4, %c0_20] : memref<1x24x48xbf16, #tpu.memory_space<vmem>>, vector<1x8x48xbf16>
    %21 = vector.shape_cast %20 : vector<1x8x48xbf16> to vector<8x48xbf16>
    %c3 = arith.constant 3 : index
    %c0_21 = arith.constant 0 : index
    %c0_22 = arith.constant 0 : index
    %22 = vector.load %arg2[%c3, %c0_21, %c0_22] : memref<9x48x128xbf16, #tpu.memory_space<vmem>>, vector<1x48x128xbf16>
    %23 = vector.shape_cast %22 : vector<1x48x128xbf16> to vector<48x128xbf16>
    %cst_23 = arith.constant dense<0.000000e+00> : vector<8x128xf32>
    %24 = tpu.matmul %21, %23, %cst_23 {dimension_numbers = #tpu.dot_dimension_numbers<[1], [0], [0], [1], [0, 0, 1, 1], [], []>} : vector<8x48xbf16>, vector<48x128xbf16>, vector<8x128xf32> -> vector<8x128xf32>
    %25 = arith.addf %19, %24 : vector<8x128xf32>
    %c0_24 = arith.constant 0 : index
    %c5 = arith.constant 5 : index
    %c0_25 = arith.constant 0 : index
    %26 = vector.load %arg1[%c0_24, %c5, %c0_25] : memref<1x24x48xbf16, #tpu.memory_space<vmem>>, vector<1x8x48xbf16>
    %27 = vector.shape_cast %26 : vector<1x8x48xbf16> to vector<8x48xbf16>
    %c4_26 = arith.constant 4 : index
    %c0_27 = arith.constant 0 : index
    %c0_28 = arith.constant 0 : index
    %28 = vector.load %arg2[%c4_26, %c0_27, %c0_28] : memref<9x48x128xbf16, #tpu.memory_space<vmem>>, vector<1x48x128xbf16>
    %29 = vector.shape_cast %28 : vector<1x48x128xbf16> to vector<48x128xbf16>
    %cst_29 = arith.constant dense<0.000000e+00> : vector<8x128xf32>
    %30 = tpu.matmul %27, %29, %cst_29 {dimension_numbers = #tpu.dot_dimension_numbers<[1], [0], [0], [1], [0, 0, 1, 1], [], []>} : vector<8x48xbf16>, vector<48x128xbf16>, vector<8x128xf32> -> vector<8x128xf32>
    %31 = arith.addf %25, %30 : vector<8x128xf32>
    %c0_30 = arith.constant 0 : index
    %c6 = arith.constant 6 : index
    %c0_31 = arith.constant 0 : index
    %32 = vector.load %arg1[%c0_30, %c6, %c0_31] : memref<1x24x48xbf16, #tpu.memory_space<vmem>>, vector<1x8x48xbf16>
    %33 = vector.shape_cast %32 : vector<1x8x48xbf16> to vector<8x48xbf16>
    %c5_32 = arith.constant 5 : index
    %c0_33 = arith.constant 0 : index
    %c0_34 = arith.constant 0 : index
    %34 = vector.load %arg2[%c5_32, %c0_33, %c0_34] : memref<9x48x128xbf16, #tpu.memory_space<vmem>>, vector<1x48x128xbf16>
    %35 = vector.shape_cast %34 : vector<1x48x128xbf16> to vector<48x128xbf16>
    %cst_35 = arith.constant dense<0.000000e+00> : vector<8x128xf32>
    %36 = tpu.matmul %33, %35, %cst_35 {dimension_numbers = #tpu.dot_dimension_numbers<[1], [0], [0], [1], [0, 0, 1, 1], [], []>} : vector<8x48xbf16>, vector<48x128xbf16>, vector<8x128xf32> -> vector<8x128xf32>
    %37 = arith.addf %31, %36 : vector<8x128xf32>
    %c0_36 = arith.constant 0 : index
    %c8 = arith.constant 8 : index
    %c0_37 = arith.constant 0 : index
    %38 = vector.load %arg1[%c0_36, %c8, %c0_37] : memref<1x24x48xbf16, #tpu.memory_space<vmem>>, vector<1x8x48xbf16>
    %39 = vector.shape_cast %38 : vector<1x8x48xbf16> to vector<8x48xbf16>
    %c6_38 = arith.constant 6 : index
    %c0_39 = arith.constant 0 : index
    %c0_40 = arith.constant 0 : index
    %40 = vector.load %arg2[%c6_38, %c0_39, %c0_40] : memref<9x48x128xbf16, #tpu.memory_space<vmem>>, vector<1x48x128xbf16>
    %41 = vector.shape_cast %40 : vector<1x48x128xbf16> to vector<48x128xbf16>
    %cst_41 = arith.constant dense<0.000000e+00> : vector<8x128xf32>
    %42 = tpu.matmul %39, %41, %cst_41 {dimension_numbers = #tpu.dot_dimension_numbers<[1], [0], [0], [1], [0, 0, 1, 1], [], []>} : vector<8x48xbf16>, vector<48x128xbf16>, vector<8x128xf32> -> vector<8x128xf32>
    %43 = arith.addf %37, %42 : vector<8x128xf32>
    %c0_42 = arith.constant 0 : index
    %c9 = arith.constant 9 : index
    %c0_43 = arith.constant 0 : index
    %44 = vector.load %arg1[%c0_42, %c9, %c0_43] : memref<1x24x48xbf16, #tpu.memory_space<vmem>>, vector<1x8x48xbf16>
    %45 = vector.shape_cast %44 : vector<1x8x48xbf16> to vector<8x48xbf16>
    %c7 = arith.constant 7 : index
    %c0_44 = arith.constant 0 : index
    %c0_45 = arith.constant 0 : index
    %46 = vector.load %arg2[%c7, %c0_44, %c0_45] : memref<9x48x128xbf16, #tpu.memory_space<vmem>>, vector<1x48x128xbf16>
    %47 = vector.shape_cast %46 : vector<1x48x128xbf16> to vector<48x128xbf16>
    %cst_46 = arith.constant dense<0.000000e+00> : vector<8x128xf32>
    %48 = tpu.matmul %45, %47, %cst_46 {dimension_numbers = #tpu.dot_dimension_numbers<[1], [0], [0], [1], [0, 0, 1, 1], [], []>} : vector<8x48xbf16>, vector<48x128xbf16>, vector<8x128xf32> -> vector<8x128xf32>
    %49 = arith.addf %43, %48 : vector<8x128xf32>
    %c0_47 = arith.constant 0 : index
    %c10 = arith.constant 10 : index
    %c0_48 = arith.constant 0 : index
    %50 = vector.load %arg1[%c0_47, %c10, %c0_48] : memref<1x24x48xbf16, #tpu.memory_space<vmem>>, vector<1x8x48xbf16>
    %51 = vector.shape_cast %50 : vector<1x8x48xbf16> to vector<8x48xbf16>
    %c8_49 = arith.constant 8 : index
    %c0_50 = arith.constant 0 : index
    %c0_51 = arith.constant 0 : index
    %52 = vector.load %arg2[%c8_49, %c0_50, %c0_51] : memref<9x48x128xbf16, #tpu.memory_space<vmem>>, vector<1x48x128xbf16>
    %53 = vector.shape_cast %52 : vector<1x48x128xbf16> to vector<48x128xbf16>
    %cst_52 = arith.constant dense<0.000000e+00> : vector<8x128xf32>
    %54 = tpu.matmul %51, %53, %cst_52 {dimension_numbers = #tpu.dot_dimension_numbers<[1], [0], [0], [1], [0, 0, 1, 1], [], []>} : vector<8x48xbf16>, vector<48x128xbf16>, vector<8x128xf32> -> vector<8x128xf32>
    %55 = arith.addf %49, %54 : vector<8x128xf32>
    %cst_53 = arith.constant 0.000000e+00 : f32
    %56 = vector.broadcast %cst_53 : f32 to vector<8x128xf32>
    %57 = arith.maximumf %55, %56 : vector<8x128xf32>
    %58 = vector.extract_strided_slice %57 {offsets = [0, 0], sizes = [2, 48], strides = [1, 1]} : vector<8x128xf32> to vector<2x48xf32>
    %59 = arith.truncf %58 : vector<2x48xf32> to vector<2x48xbf16>
    %c0_54 = arith.constant 0 : index
    %c0_55 = arith.constant 0 : index
    %c0_56 = arith.constant 0 : index
    %c0_57 = arith.constant 0 : index
    %60 = vector.load %arg4[%c0_54, %c0_55, %c0_56, %c0_57] : memref<1x2x2x48xbf16, #tpu.memory_space<vmem>>, vector<1x1x2x48xbf16>
    %61 = vector.shape_cast %60 : vector<1x1x2x48xbf16> to vector<2x48xbf16>
    %62 = vector.shape_cast %59 : vector<2x48xbf16> to vector<1x1x2x48xbf16>
    tpu.vector_store %arg4[%c0_54, %c0_55, %c0_56, %c0_57], %62 {strides = array<i32>} : memref<1x2x2x48xbf16, #tpu.memory_space<vmem>>, vector<1x1x2x48xbf16>,
    %63 = vector.extract_strided_slice %57 {offsets = [4, 0], sizes = [2, 48], strides = [1, 1]} : vector<8x128xf32> to vector<2x48xf32>
    %64 = arith.truncf %63 : vector<2x48xf32> to vector<2x48xbf16>
    %c0_58 = arith.constant 0 : index
    %c1_59 = arith.constant 1 : index
    %c0_60 = arith.constant 0 : index
    %c0_61 = arith.constant 0 : index
    %65 = vector.load %arg4[%c0_58, %c1_59, %c0_60, %c0_61] : memref<1x2x2x48xbf16, #tpu.memory_space<vmem>>, vector<1x1x2x48xbf16>
    %66 = vector.shape_cast %65 : vector<1x1x2x48xbf16> to vector<2x48xbf16>
    %67 = vector.shape_cast %64 : vector<2x48xbf16> to vector<1x1x2x48xbf16>
    tpu.vector_store %arg4[%c0_58, %c1_59, %c0_60, %c0_61], %67 {strides = array<i32>} : memref<1x2x2x48xbf16, #tpu.memory_space<vmem>>, vector<1x1x2x48xbf16>,
    return
  }
  func.func @transform_0(%arg0: i32) -> (i32, i32, i32) {
    %c0_i32 = arith.constant 0 : i32
    %c0_i32_0 = arith.constant 0 : i32
    %c0_i32_1 = arith.constant 0 : i32
    return %arg0, %c0_i32, %c0_i32_0 : i32, i32, i32
  }
  func.func @transform_1(%arg0: i32) -> (i32, i32, i32) {
    %c0_i32 = arith.constant 0 : i32
    %c0_i32_0 = arith.constant 0 : i32
    %c0_i32_1 = arith.constant 0 : i32
    %c0_i32_2 = arith.constant 0 : i32
    return %c0_i32, %c0_i32_0, %c0_i32_1 : i32, i32, i32
  }
  func.func @transform_2(%arg0: i32) -> (i32, i32) {
    %c0_i32 = arith.constant 0 : i32
    %c0_i32_0 = arith.constant 0 : i32
    %c0_i32_1 = arith.constant 0 : i32
    return %c0_i32, %c0_i32_0 : i32, i32
  }
  func.func @transform_3(%arg0: i32) -> (i32, i32, i32, i32) {
    %c0_i32 = arith.constant 0 : i32
    %c0_i32_0 = arith.constant 0 : i32
    %c0_i32_1 = arith.constant 0 : i32
    %c0_i32_2 = arith.constant 0 : i32
    return %arg0, %c0_i32, %c0_i32_0, %c0_i32_1 : i32, i32, i32, i32
  }
}

</mosaic_0001>

<bundles_post_ra>
// kernel: forward.4
= control target key start
LH: loop header
LB: loop body
LE: loop exit
PB: predicated region body
PF: predicated region fallthrough
CT: control target
= control target key end

     0   :  { %s1708_s12 = smov 0   ;;  %s2341_s0 = inlined_call_operand.vmem [shape: bf16[2,196,75], index: 0, kind: input, shape index: {}]   ;;  %s2342_s1 = inlined_call_operand.vmem [shape: bf16[1,75,128], index: 1, kind: input, shape index: {}]   ;;  %s2343_s2 = inlined_call_operand.vmem [shape: f32[1,128], index: 2, kind: input, shape index: {}]   ;;  %s2344_s3 = inlined_call_operand.vmem [shape: bf16[2,6,6,16], index: 3, kind: output, shape index: {}]  }
   0x1 LB: > { %s1402_s13 = sadd.s32 4294967295, %s1679_s12   ;;  %p1406_p0 = scmp.ge.s32.totalorder %s1679_s12, 1  ;;  %s1679_s12 = sphi %s1708_s12, %s13_s12  }
   0x2   : > { %p137_p1 = scmp.lt.s32.totalorder %s1679_s12, 3 }
   0x4   : > { %p138_p2 = pnand %p1406_p0, %p137_p1 }
   0x5   : > { %v1555_v0 = vld [vmem:[%s2342_s1] sm:$0xff] (!%p138_p2)   ;;  %v1681_v1 = vmov (!%p138_p2), 0.0   ;;  %v1556_v2 = vld [vmem:[%s2342_s1 + $0x8] sm:$0xff] (!%p138_p2)   ;;  %vm346_vm0 = vcmask (!%p138_p2), 1044480   ;;  %p161_p3 = scmp.lt.s32.totalorder (!%p138_p2), %s1402_s13, 1  ;;  %v1557_v3 = vld [vmem:[%s2342_s1 + $0x10] sm:$0xff] (!%p138_p2)  }
   0x6   : > { %141 = sbr.rel (%p138_p2) target bundleno = 600 (0x258), region = 32  ;;  %1466 = vmatprep.subr.bf16.mxu0 (!%p138_p2), %v1681_v1  ;;  %1528 = vmatprep.subr.bf16.mxu1 (!%p138_p2), %v1681_v1  ;;  %vm347_vm1 = vcmask (!%p138_p2), 1045504   ;;  %v1682_v4 = vmov (!%p138_p2), 65535   ;;  %vm1683_vm2 = vmmov (!%p138_p2), 0   ;;  %v1558_v6 = vld [vmem:[%s2342_s1 + $0x18] sm:$0xff] (!%p138_p2)   ;;  %vm306_vm3 = vcmask (!%p138_p2), 613376  }
   0x7   : > { %1467 = vmatpush3.bf16.msra.mxu0 (!%p138_p2), %v1555_v0  ;;  %1533 = vmatpush3.bf16.msra.mxu1 (!%p138_p2), %v1555_v0  ;;  %v348_v5 = vsel (!%p138_p2), %vm346_vm0, 4294967295, %v1682_v4  ;;  %v1559_v7 = vld [vmem:[%s2342_s1 + $0x20] sm:$0x3f] (!%p138_p2)   ;;  %s1684_s30 = smov (!%p138_p2), 2   ;;  %s1685_s4 = smov (!%p138_p2), 1  }
   0x8   : > { %1468 = vmatprep.subr.bf16.mxu0 (!%p138_p2), %v1681_v1  ;;  %1529 = vmatprep.subr.bf16.mxu1 (!%p138_p2), %v1681_v1  ;;  %v349_v8 = vsel (!%p138_p2), %vm347_vm1, %v348_v5, 0  ;;  %v1804_v23 = vld [vmem:[%s2343_s2] ss:$0 sm:$0xff] (!%p138_p2)  ;;  %s1686_s5 = smov (!%p138_p2), 127   ;;  %s1687_s6 = smov (!%p138_p2), 126  }
   0x9   : > { %1476 = vmatprep.mubr.msk.bf16.mxu0 (!%p138_p2), %vm1683_vm2, %v1681_v1  ;;  %1504 = vmatprep.mubr.msk.bf16.mxu1 (!%p138_p2), %vm1683_vm2, %v1681_v1  ;;  %v351_v9 = vand.u32 (!%p138_p2), %v1559_v7, %v349_v8 }
   0xb   : > { %1469 = vmatpush3.bf16.msra.mxu0 (!%p138_p2), %v1556_v2  ;;  %1534 = vmatpush3.bf16.msra.mxu1 (!%p138_p2), %v1556_v2 }
   0xc   : > { %1470 = vmatprep.subr.bf16.mxu0 (!%p138_p2), %v1681_v1  ;;  %1530 = vmatprep.subr.bf16.mxu1 (!%p138_p2), %v1681_v1 }
   0xd   : > { %s2346_s13 = smov (!%p161_p3, %s1402_s13), 1 }
   0xe   : > { %s1538_s20 = smul.u32 100, %s2346_s13 }
   0xf   : > { %1471 = vmatpush3.bf16.msra.mxu0 %v1557_v3  ;;  %1535 = vmatpush3.bf16.msra.mxu1 %v1557_v3  ;;  %s1539_s7 = smul.u32 24, %s2346_s13 }
  0x10   : > { %1472 = vmatprep.subr.bf16.mxu0 %v1681_v1  ;;  %1531 = vmatprep.subr.bf16.mxu1 %v1681_v1  ;;  %s1749_s27 = scalar_lea.vmem %s2341_s0, %s1538_s20 }
  0x11   : > { %v1560_v10 = vld [vmem:[%s1749_s27] sm:$0xff]   ;;  %v1561_v11 = vld [vmem:[%s1749_s27 + $0x38] sm:$0xff]   ;;  %v1562_v12 = vld [vmem:[%s1749_s27 + $0x8] sm:$0xff]   ;;  %s2290_s10 = scalar_lea.vmem %s2344_s3, %s1539_s7 }
  0x12   : > { %v1563_v13 = vld [vmem:[%s1749_s27 + $0x40] sm:$0xff]   ;;  %v1564_v14 = vld [vmem:[%s1749_s27 + $0x10] sm:$0xff]   ;;  %v1565_v15 = vld [vmem:[%s1749_s27 + $0x48] sm:$0xff]  }
  0x13   : > { %1473 = vmatpush3.bf16.msra.mxu0 %v1558_v6  ;;  %1536 = vmatpush3.bf16.msra.mxu1 %v1558_v6  ;;  %v1566_v16 = vld [vmem:[%s1749_s27 + $0x18] sm:$0xff]   ;;  %v1567_v17 = vld [vmem:[%s1749_s27 + $0x50] sm:$0xff]   ;;  %v1568_v18 = vld [vmem:[%s1749_s27 + $0x20] sm:$0xff]  }
  0x14   : > { %1474 = vmatprep.subr.bf16.mxu0 %v1681_v1  ;;  %1532 = vmatprep.subr.bf16.mxu1 %v1681_v1  ;;  %v1569_v19 = vld [vmem:[%s1749_s27 + $0x58] sm:$0xff]   ;;  %v1570_v20 = vld [vmem:[%s1749_s27 + $0x28] sm:$0xff]   ;;  %v1571_v21 = vld [vmem:[%s1749_s27 + $0x60] ss:$0 sps:$4 sm:$0x33]  }
  0x15   : > { %v1572_v22 = vld [vmem:[%s1749_s27 + $0x30] sm:$0xff]  }
  0x17   : > { %1475 = vmatpush3.bf16.msra.mxu0 %v351_v9  ;;  %1537 = vmatpush3.bf16.msra.mxu1 %v351_v9 }
  0x1a   : > { %1477 = vmatmul.mubr.msk.bf16.vlgmr.msra.gmra.mrb[0].mxu0 %vm306_vm3, %v1560_v10  ;;  %1505 = vmatmul.mubr.msk.bf16.vlgmr.msra.gmra.mrb[0].mxu1 %vm306_vm3, %v1561_v11 }
  0x1b   : > { %1480 = vmatprep.mubr.msk.bf16.mxu0 %vm1683_vm2, %v1681_v1  ;;  %1508 = vmatprep.mubr.msk.bf16.mxu1 %vm1683_vm2, %v1681_v1 }
  0x22   : > { %1481 = vmatmul.mubr.msk.bf16.gmra.mrb[4].mxu0 %vm306_vm3, %v1562_v12  ;;  %1509 = vmatmul.mubr.msk.bf16.gmra.mrb[4].mxu1 %vm306_vm3, %v1563_v13 }
  0x23   : > { %1484 = vmatprep.mubr.msk.bf16.mxu0 %vm1683_vm2, %v1681_v1  ;;  %1512 = vmatprep.mubr.msk.bf16.mxu1 %vm1683_vm2, %v1681_v1 }
  0x2a   : > { %1485 = vmatmul.mubr.msk.bf16.gmra.mrb[8].mxu0 %vm306_vm3, %v1564_v14  ;;  %1513 = vmatmul.mubr.msk.bf16.gmra.mrb[8].mxu1 %vm306_vm3, %v1565_v15 }
  0x2b   : > { %1488 = vmatprep.mubr.msk.bf16.mxu0 %vm1683_vm2, %v1681_v1  ;;  %1516 = vmatprep.mubr.msk.bf16.mxu1 %vm1683_vm2, %v1681_v1 }
  0x32   : > { %1489 = vmatmul.mubr.msk.bf16.gmra.mrb[12].mxu0 %vm306_vm3, %v1566_v16  ;;  %1517 = vmatmul.mubr.msk.bf16.gmra.mrb[12].mxu1 %vm306_vm3, %v1567_v17 }
  0x33   : > { %1492 = vmatprep.mubr.msk.bf16.mxu0 %vm1683_vm2, %v1681_v1  ;;  %1520 = vmatprep.mubr.msk.bf16.mxu1 %vm1683_vm2, %v1681_v1 }
  0x3a   : > { %1493 = vmatmul.mubr.msk.bf16.gmra.mrb[16].mxu0 %vm306_vm3, %v1568_v18  ;;  %1521 = vmatmul.mubr.msk.bf16.gmra.mrb[16].mxu1 %vm306_vm3, %v1569_v19 }
  0x3b   : > { %1496 = vmatprep.mubr.msk.bf16.mxu0 %vm1683_vm2, %v1681_v1  ;;  %1524 = vmatprep.mubr.msk.bf16.mxu1 %vm1683_vm2, %v1681_v1 }
  0x42   : > { %1497 = vmatmul.mubr.msk.bf16.gmra.mrb[20].mxu0 %vm306_vm3, %v1570_v20  ;;  %1525 = vmatmul.mubr.msk.bf16.gmra.mrb[20].mxu1 %vm306_vm3, %v1571_v21 }
  0x43   : > { %1500 = vmatprep.mubr.msk.bf16.mxu0 %vm1683_vm2, %v1681_v1 }
  0x4a   : > { %1501 = vmatmul.mubr.msk.bf16.gmra.mrb[24].mxu0 %vm306_vm3, %v1572_v22 }
  0xed   : > { %v387_v24 = vpop.f32.mrb[0].mxu0  ;;  %v443_v25 = vpop.f32.mrb[0].mxu1 }
  0xee   : > { %v388_v26 = vadd.f32 %v1804_v23, %v387_v24  ;;  %v1478_v27 = vpop.f32.mrb[1].mxu0  ;;  %v444_v28 = vadd.f32 %v1804_v23, %v443_v25  ;;  %v1506_v29 = vpop.f32.mrb[1].mxu1 }
  0xef   : > { %v390_v30 = vpop.f32.mrb[2].mxu0  ;;  %v446_v31 = vpop.f32.mrb[2].mxu1 }
  0xf0   : > { %v1808_v32 = vmax.f32 %v388_v26, 0.0  ;;  %v1810_v33 = vmax.f32 %v444_v28, 0.0  ;;  %v1479_v34 = vpop.f32.mrb[3].mxu0  ;;  %v1507_v35 = vpop.f32.mrb[3].mxu1  ;;  %v391_v40 = vadd.f32 %v1804_v23, %v390_v30  ;;  %v447_v51 = vadd.f32 %v1804_v23, %v446_v31 }
  0xf2   : > { %v1814_v36 = vmul.f32 %v1808_v32, %v1808_v32  ;;  %v1818_v37 = vmul.f32 %v1810_v33, %v1810_v33  ;;  %v1833_v47 = vmax.f32 %v391_v40, 0.0  ;;  %v1859_v61 = vmax.f32 %v447_v51, 0.0 }
  0xf4   : > { %614 = vrot.lane.b32.xlu1 %v1814_v36, %s1684_s30  ;;  %539 = vrot.lane.b32.xlu0 %v1814_v36, %s1685_s4  ;;  %v1843_v50 = vmul.f32 %v1833_v47, %v1833_v47  ;;  %v1868_v1 = vmul.f32 %v1859_v61, %v1859_v61 }
  0xf5   : > { %v395_v38 = vpop.f32.mrb[4].mxu0  ;;  %v451_v39 = vpop.f32.mrb[4].mxu1 }
  0xf6   : > { %v1482_v41 = vpop.f32.mrb[5].mxu0  ;;  %v1510_v42 = vpop.f32.mrb[5].mxu1  ;;  %v396_v62 = vadd.f32 %v1804_v23, %v395_v38  ;;  %v452_v14 = vadd.f32 %v1804_v23, %v451_v39 }
  0xf7   : > { %v1825_v43 = vpop.f32.mrb[6].mxu0  ;;  %v1827_v44 = vpop.f32.mrb[6].mxu1 }
  0xf8   : > { %689 = vrot.lane.b32.xlu1 %v1814_v36, %s1686_s5  ;;  %567 = vrot.lane.b32.xlu0 %v1818_v37, %s1685_s4  ;;  %v1483_v45 = vpop.f32.mrb[7].mxu0  ;;  %v1511_v46 = vpop.f32.mrb[7].mxu1  ;;  %v1876_v8 = vmax.f32 %v396_v62, 0.0  ;;  %v1903_v24 = vmax.f32 %v452_v14, 0.0  ;;  %v399_v34 = vadd.f32 %v1804_v23, %v1825_v43  ;;  %v455_v51 = vadd.f32 %v1804_v23, %v1827_v44 }
  0xfa   : > { %v1890_v13 = vmul.f32 %v1876_v8, %v1876_v8  ;;  %v1917_v29 = vmul.f32 %v1903_v24, %v1903_v24 }
  0xfc   : > { %717 = vrot.lane.b32.xlu1 %v1818_v37, %s1686_s5  ;;  %642 = vrot.lane.b32.xlu0 %v1818_v37, %s1684_s30 }
  0xfd   : > { %v1839_v48 = vpop.f32.mrb[8].mxu0  ;;  %v459_v49 = vpop.f32.mrb[8].mxu1 }
  0xfe   : > { %v1486_v52 = vpop.f32.mrb[9].mxu0  ;;  %v1847_v53 = vadd.f32 %v1804_v23, %v459_v49  ;;  %v1514_v54 = vpop.f32.mrb[9].mxu1  ;;  %v1938_v49 = vmax.f32 %v399_v34, 0.0 }
  0xff   : > { %v406_v55 = vpop.f32.mrb[10].mxu0  ;;  %v462_v56 = vpop.f32.mrb[10].mxu1 }
 0x100   : > { %764 = vrot.lane.b32.xlu1 %v1814_v36, %s1687_s6  ;;  %541 = vrot.lane.b32.xlu0 %v1843_v50, %s1685_s4  ;;  %v1854_v57 = vadd.f32 %v1804_v23, %v406_v55  ;;  %v1487_v58 = vpop.f32.mrb[11].mxu0  ;;  %v1857_v59 = vadd.f32 %v1804_v23, %v462_v56  ;;  %v1515_v60 = vpop.f32.mrb[11].mxu1  ;;  %v1948_v54 = vmul.f32 %v1938_v49, %v1938_v49  ;;  %v1950_v55 = vmax.f32 %v455_v51, 0.0 }
 0x104   : > { %792 = vrot.lane.b32.xlu1 %v1818_v37, %s1687_s6  ;;  %616 = vrot.lane.b32.xlu0 %v1843_v50, %s1684_s30 }
 0x105   : > { %v411_v63 = vpop.f32.mrb[12].mxu0  ;;  %v467_v0 = vpop.f32.mrb[12].mxu1 }
 0x106   : > { %v1871_v2 = vadd.f32 %v1804_v23, %v411_v63  ;;  %v1490_v3 = vpop.f32.mrb[13].mxu0  ;;  %v1874_v4 = vadd.f32 %v1804_v23, %v467_v0  ;;  %v1518_v5 = vpop.f32.mrb[13].mxu1  ;;  %v1964_v63 = vmul.f32 %v1950_v55, %v1950_v55  ;;  %v404_v0 = vadd.f32 %v1804_v23, %v1839_v48 }
 0x107   : > { %v414_v6 = vpop.f32.mrb[14].mxu0  ;;  %v470_v7 = vpop.f32.mrb[14].mxu1  ;;  %v2006_v48 = vmax.f32 %v1854_v57, 0.0 }
 0x108   : > { %569 = vrot.lane.b32.xlu1 %v1868_v1, %s1685_s4  ;;  %691 = vrot.lane.b32.xlu0 %v1843_v50, %s1686_s5  ;;  %v1883_v9 = vadd.f32 %v1804_v23, %v414_v6  ;;  %v1491_v10 = vpop.f32.mrb[15].mxu0  ;;  %v1886_v11 = vadd.f32 %v1804_v23, %v470_v7  ;;  %v1519_v12 = vpop.f32.mrb[15].mxu1  ;;  %v1972_v3 = vmax.f32 %v404_v0, 0.0  ;;  %v1983_v6 = vmax.f32 %v1847_v53, 0.0 }
 0x109   : > { %v2014_v53 = vmul.f32 %v2006_v48, %v2006_v48  ;;  %v2017_v7 = vmax.f32 %v1857_v59, 0.0  ;;  %v2032_v10 = vmax.f32 %v1871_v2, 0.0  ;;  %v2043_v12 = vmax.f32 %v1874_v4, 0.0 }
 0x10a   : > { %v1980_v5 = vmul.f32 %v1972_v3, %v1972_v3  ;;  %v2066_v4 = vmax.f32 %v1883_v9, 0.0 }
 0x10b   : > { %v2025_v57 = vmul.f32 %v2017_v7, %v2017_v7  ;;  %v2040_v59 = vmul.f32 %v2032_v10, %v2032_v10  ;;  %v2051_v2 = vmul.f32 %v2043_v12, %v2043_v12 }
 0x10c   : > { %644 = vrot.lane.b32.xlu1 %v1868_v1, %s1684_s30  ;;  %719 = vrot.lane.b32.xlu0 %v1868_v1, %s1686_s5  ;;  %v2074_v14 = vmul.f32 %v2066_v4, %v2066_v4 }
 0x10d   : > { %v419_v15 = vpop.f32.mrb[16].mxu0  ;;  %v475_v16 = vpop.f32.mrb[16].mxu1 }
 0x10e   : > { %v1898_v17 = vadd.f32 %v1804_v23, %v419_v15  ;;  %v1494_v18 = vpop.f32.mrb[17].mxu0  ;;  %v1901_v19 = vadd.f32 %v1804_v23, %v475_v16  ;;  %v1522_v20 = vpop.f32.mrb[17].mxu1  ;;  %v2077_v15 = vmax.f32 %v1886_v11, 0.0 }
 0x10f   : > { %v422_v21 = vpop.f32.mrb[18].mxu0  ;;  %v478_v22 = vpop.f32.mrb[18].mxu1 }
 0x110   : > { %766 = vrot.lane.b32.xlu0 %v1843_v50, %s1687_s6  ;;  %543 = vrot.lane.b32.xlu1 %v1890_v13, %s1685_s4  ;;  %v1910_v25 = vadd.f32 %v1804_v23, %v422_v21  ;;  %v1495_v26 = vpop.f32.mrb[19].mxu0  ;;  %v1913_v27 = vadd.f32 %v1804_v23, %v478_v22  ;;  %v1523_v28 = vpop.f32.mrb[19].mxu1  ;;  %v2085_v9 = vmul.f32 %v2077_v15, %v2077_v15  ;;  %v2092_v11 = vmax.f32 %v1898_v17, 0.0 }
 0x111   : > { %v2104_v28 = vmax.f32 %v1901_v19, 0.0 }
 0x112   : > { %v2101_v26 = vmul.f32 %v2092_v11, %v2092_v11 }
 0x113   : > { %v2113_v34 = vmul.f32 %v2104_v28, %v2104_v28 }
 0x114   : > { %794 = vrot.lane.b32.xlu0 %v1868_v1, %s1687_s6  ;;  %618 = vrot.lane.b32.xlu1 %v1890_v13, %s1684_s30 }
 0x115   : > { %v427_v30 = vpop.f32.mrb[20].mxu0  ;;  %v483_v31 = vpop.f32.mrb[20].mxu1 }
 0x116   : > { %v1926_v35 = vadd.f32 %v1804_v23, %v427_v30  ;;  %v1498_v38 = vpop.f32.mrb[21].mxu0  ;;  %v1929_v39 = vadd.f32 %v1804_v23, %v483_v31  ;;  %v1526_v40 = vpop.f32.mrb[21].mxu1 }
 0x117   : > { %v430_v41 = vpop.f32.mrb[22].mxu0  ;;  %v486_v42 = vpop.f32.mrb[22].mxu1  ;;  %v2120_v40 = vmax.f32 %v1910_v25, 0.0 }
 0x118   : > { %571 = vrot.lane.b32.xlu0 %v1917_v29, %s1685_s4  ;;  %693 = vrot.lane.b32.xlu1 %v1890_v13, %s1686_s5  ;;  %v1936_v45 = vadd.f32 %v1804_v23, %v430_v41  ;;  %v1499_v43 = vpop.f32.mrb[23].mxu0  ;;  %v1527_v46 = vpop.f32.mrb[23].mxu1 }
 0x119   : > { %v2128_v51 = vmul.f32 %v2120_v40, %v2120_v40 }
 0x11c   : > { %646 = vrot.lane.b32.xlu0 %v1917_v29, %s1684_s30  ;;  %721 = vrot.lane.b32.xlu1 %v1917_v29, %s1686_s5 }
 0x11d   : > { %v435_v52 = vpop.f32.mrb[24].mxu0 }
 0x11e   : > { %v1953_v56 = vadd.f32 %v1804_v23, %v435_v52  ;;  %v1502_v58 = vpop.f32.mrb[25].mxu0  ;;  %v512_v52 = vmax.f32 %v1913_v27, 0.0 }
 0x11f   : > { %v438_v60 = vpop.f32.mrb[26].mxu0 }
 0x120   : > { %768 = vrot.lane.b32.xlu0 %v1890_v13, %s1687_s6  ;;  %545 = vrot.lane.b32.xlu1 %v1948_v54, %s1685_s4  ;;  %v1960_v44 = vadd.f32 %v1804_v23, %v438_v60  ;;  %v1503_v62 = vpop.f32.mrb[27].mxu0  ;;  %v1991_v23 = vmul.f32 %v1983_v6, %v1983_v6  ;;  %v2135_v0 = vmul.f32 %v512_v52, %v512_v52 }
 0x124   : > { %796 = vrot.lane.b32.xlu0 %v1917_v29, %s1687_s6  ;;  %573 = vrot.lane.b32.xlu1 %v1964_v63, %s1685_s4 }
 0x128   : > { %620 = vrot.lane.b32.xlu0 %v1948_v54, %s1684_s30  ;;  %695 = vrot.lane.b32.xlu1 %v1948_v54, %s1686_s5 }
 0x12c   : > { %648 = vrot.lane.b32.xlu0 %v1964_v63, %s1684_s30  ;;  %723 = vrot.lane.b32.xlu1 %v1964_v63, %s1686_s5 }
 0x130   : > { %770 = vrot.lane.b32.xlu1 %v1948_v54, %s1687_s6  ;;  %547 = vrot.lane.b32.xlu0 %v1980_v5, %s1685_s4 }
 0x134   : > { %798 = vrot.lane.b32.xlu1 %v1964_v63, %s1687_s6  ;;  %575 = vrot.lane.b32.xlu0 %v1991_v23, %s1685_s4 }
 0x138   : > { %622 = vrot.lane.b32.xlu1 %v1980_v5, %s1684_s30  ;;  %697 = vrot.lane.b32.xlu0 %v1980_v5, %s1686_s5 }
 0x13c   : > { %650 = vrot.lane.b32.xlu1 %v1991_v23, %s1684_s30  ;;  %725 = vrot.lane.b32.xlu0 %v1991_v23, %s1686_s5 }
 0x140   : > { %772 = vrot.lane.b32.xlu0 %v1980_v5, %s1687_s6  ;;  %549 = vrot.lane.b32.xlu1 %v2014_v53, %s1685_s4 }
 0x144   : > { %800 = vrot.lane.b32.xlu0 %v1991_v23, %s1687_s6  ;;  %577 = vrot.lane.b32.xlu1 %v2025_v57, %s1685_s4 }
 0x148   : > { %624 = vrot.lane.b32.xlu0 %v2014_v53, %s1684_s30  ;;  %774 = vrot.lane.b32.xlu1 %v2014_v53, %s1687_s6 }
 0x14c   : > { %652 = vrot.lane.b32.xlu0 %v2025_v57, %s1684_s30  ;;  %802 = vrot.lane.b32.xlu1 %v2025_v57, %s1687_s6 }
 0x150   : > { %699 = vrot.lane.b32.xlu0 %v2014_v53, %s1686_s5  ;;  %626 = vrot.lane.b32.xlu1 %v2040_v59, %s1684_s30 }
 0x154   : > { %727 = vrot.lane.b32.xlu0 %v2025_v57, %s1686_s5  ;;  %654 = vrot.lane.b32.xlu1 %v2051_v2, %s1684_s30 }
 0x158   : > { %776 = vrot.lane.b32.xlu1 %v2040_v59, %s1687_s6  ;;  %551 = vrot.lane.b32.xlu0 %v2040_v59, %s1685_s4 }
 0x15c   : > { %804 = vrot.lane.b32.xlu1 %v2051_v2, %s1687_s6  ;;  %579 = vrot.lane.b32.xlu0 %v2051_v2, %s1685_s4 }
 0x160   : > { %701 = vrot.lane.b32.xlu0 %v2040_v59, %s1686_s5  ;;  %553 = vrot.lane.b32.xlu1 %v2074_v14, %s1685_s4 }
 0x164   : > { %729 = vrot.lane.b32.xlu0 %v2051_v2, %s1686_s5  ;;  %581 = vrot.lane.b32.xlu1 %v2085_v9, %s1685_s4 }
 0x166   : > { %v615_v16 = vpop.permute.xlu1 %614  ;;  %v540_v18 = vpop.permute.xlu0 %539 }
 0x167   : > { %v589_v20 = vadd.f32 %v540_v18, %v1814_v36 }
 0x168   : > { %628 = vrot.lane.b32.xlu0 %v2074_v14, %s1684_s30  ;;  %703 = vrot.lane.b32.xlu1 %v2074_v14, %s1686_s5 }
 0x169   : > { %v664_v17 = vadd.f32 %v615_v16, %v589_v20 }
 0x16a   : > { %v690_v21 = vpop.permute.xlu1 %689  ;;  %v568_v22 = vpop.permute.xlu0 %567 }
 0x16b   : > { %v603_v36 = vadd.f32 %v568_v22, %v1818_v37  ;;  %v739_v19 = vadd.f32 %v690_v21, %v664_v17  ;;  %v2138_v22 = vmax.f32 %v1926_v35, 0.0 }
 0x16c   : > { %656 = vrot.lane.b32.xlu0 %v2085_v9, %s1684_s30  ;;  %778 = vrot.lane.b32.xlu1 %v2074_v14, %s1687_s6 }
 0x16e   : > { %v718_v30 = vpop.permute.xlu1 %717  ;;  %v643_v31 = vpop.permute.xlu0 %642 }
 0x16f   : > { %v678_v38 = vadd.f32 %v643_v31, %v603_v36 }
 0x170   : > { %630 = vrot.lane.b32.xlu1 %v2101_v26, %s1684_s30  ;;  %555 = vrot.lane.b32.xlu0 %v2101_v26, %s1685_s4 }
 0x171   : > { %v753_v46 = vadd.f32 %v718_v30, %v678_v38 }
 0x172   : > { %v765_v41 = vpop.permute.xlu1 %764  ;;  %v542_v42 = vpop.permute.xlu0 %541 }
 0x173   : > { %v814_v43 = vadd.f32 %v765_v41, %v739_v19  ;;  %v590_v27 = vadd.f32 %v542_v42, %v1843_v50  ;;  %v2148_v19 = vmul.f32 %v2138_v22, %v2138_v22 }
 0x174   : > { %658 = vrot.lane.b32.xlu1 %v2113_v34, %s1684_s30  ;;  %583 = vrot.lane.b32.xlu0 %v2113_v34, %s1685_s4 }
 0x175   : > { %v839_v37 = vmul.f32 2e-05, %v814_v43 }
 0x176   : > { %v793_v58 = vpop.permute.xlu1 %792  ;;  %v617_v25 = vpop.permute.xlu0 %616 }
 0x177   : > { %v864_v60 = vadd.f32 1.0, %v839_v37  ;;  %v828_v62 = vadd.f32 %v793_v58, %v753_v46  ;;  %v665_v31 = vadd.f32 %v617_v25, %v590_v27  ;;  %v513_v46 = vmax.f32 %v1929_v39, 0.0 }
 0x178   : > { %705 = vrot.lane.b32.xlu0 %v2101_v26, %s1686_s5  ;;  %557 = vrot.lane.b32.xlu1 %v2128_v51, %s1685_s4 }
 0x179   : > { %1573 = vrsqrt.f32 %v864_v60  ;;  %v853_v16 = vmul.f32 2e-05, %v828_v62  ;;  %vm916_vm4 = vcmp.eq.f32.partialorder %v864_v60, inf  ;;  %vm918_vm5 = vcmp.eq.f32.partialorder %v864_v60, 0.0 }
 0x17a   : > { %v570_v18 = vpop.permute.xlu1 %569  ;;  %v692_v20 = vpop.permute.xlu0 %691  ;;  %v2159_v39 = vmul.f32 %v513_v46, %v513_v46  ;;  %v2169_v46 = vmax.f32 %v1953_v56, 0.0 }
 0x17b   : > { %v878_v21 = vadd.f32 1.0, %v853_v16  ;;  %v604_v36 = vadd.f32 %v570_v18, %v1868_v1  ;;  %v740_v35 = vadd.f32 %v692_v20, %v665_v31  ;;  %v919_v1 = vand.u32 2147483648, %v864_v60 }
 0x17c   : > { %780 = vrot.lane.b32.xlu0 %v2101_v26, %s1687_s6  ;;  %585 = vrot.lane.b32.xlu1 %v2135_v0, %s1685_s4 }
 0x17d   : > { %1575 = vrsqrt.f32 %v878_v21  ;;  %vm1014_vm6 = vcmp.eq.f32.partialorder %v878_v21, inf  ;;  %vm1016_vm7 = vcmp.eq.f32.partialorder %v878_v21, 0.0 }
 0x17e   : > { %v645_v17 = vpop.permute.xlu1 %644  ;;  %v720_v30 = vpop.permute.xlu0 %719 }
 0x17f   : > { %v679_v38 = vadd.f32 %v645_v17, %v604_v36 }
 0x180   : > { %632 = vrot.lane.b32.xlu0 %v2128_v51, %s1684_s30  ;;  %707 = vrot.lane.b32.xlu1 %v2128_v51, %s1686_s5 }
 0x181   : > { %v754_v52 = vadd.f32 %v720_v30, %v679_v38  ;;  %v1017_v30 = vand.u32 2147483648, %v878_v21 }
 0x182   : > { %v767_v41 = vpop.permute.xlu0 %766  ;;  %v544_v50 = vpop.permute.xlu1 %543 }
 0x183   : > { %v1574_v42 = vpop.eup %1573  ;;  %v815_v43 = vadd.f32 %v767_v41, %v740_v35 }
 0x184   : > { %v915_v37 = vmul.f32 %v1574_v42, %v864_v60  ;;  %782 = vrot.lane.b32.xlu0 %v2128_v51, %s1687_s6  ;;  %634 = vrot.lane.b32.xlu1 %v2148_v19, %s1684_s30 }
 0x185   : > { %v840_v58 = vmul.f32 2e-05, %v815_v43 }
 0x186   : > { %v917_v25 = vsel %vm916_vm4, %v864_v60, %v915_v37  ;;  %v795_v62 = vpop.permute.xlu0 %794  ;;  %v619_v16 = vpop.permute.xlu1 %618  ;;  %v2166_v60 = vmax.f32 %v1936_v45, 0.0  ;;  %v591_v45 = vadd.f32 %v544_v50, %v1890_v13 }
 0x187   : > { %v920_v18 = vsel %vm918_vm5, %v919_v1, %v917_v25  ;;  %v865_v20 = vadd.f32 1.0, %v840_v58  ;;  %v829_v27 = vadd.f32 %v795_v62, %v754_v52  ;;  %v1576_v17 = vpop.eup %1575  ;;  %v2183_v25 = vmul.f32 %v2169_v46, %v2169_v46 }
 0x188   : > { %1577 = vrsqrt.f32 %v920_v18  ;;  %709 = vrot.lane.b32.xlu1 %v2148_v19, %s1686_s5  ;;  %559 = vrot.lane.b32.xlu0 %v2148_v19, %s1685_s4  ;;  %v1013_v31 = vmul.f32 %v1576_v17, %v878_v21  ;;  %v2178_v1 = vmul.f32 %v2166_v60, %v2166_v60  ;;  %v666_v58 = vadd.f32 %v619_v16, %v591_v45 }
 0x189   : > { %1579 = vrsqrt.f32 %v865_v20  ;;  %v854_v36 = vmul.f32 2e-05, %v829_v27  ;;  %vm923_vm8 = vcmp.eq.f32.partialorder %v865_v20, inf  ;;  %vm925_vm9 = vcmp.eq.f32.partialorder %v865_v20, 0.0 }
 0x18a   : > { %v572_v35 = vpop.permute.xlu0 %571  ;;  %v694_v38 = vpop.permute.xlu1 %693  ;;  %v1015_v41 = vsel %vm1014_vm6, %v878_v21, %v1013_v31 }
 0x18b   : > { %v1018_v43 = vsel %vm1016_vm7, %v1017_v30, %v1015_v41  ;;  %v879_v37 = vadd.f32 1.0, %v854_v36  ;;  %v605_v56 = vadd.f32 %v572_v35, %v1917_v29  ;;  %v741_v13 = vadd.f32 %v694_v38, %v666_v58 }
 0x18c   : > { %784 = vrot.lane.b32.xlu1 %v2148_v19, %s1687_s6  ;;  %587 = vrot.lane.b32.xlu0 %v2159_v39, %s1685_s4  ;;  %1581 = vrsqrt.f32 %v1018_v43  ;;  %v2190_v29 = vmax.f32 %v1960_v44, 0.0  ;;  %v926_v38 = vand.u32 2147483648, %v865_v20 }
 0x18d   : > { %1583 = vrsqrt.f32 %v879_v37  ;;  %vm1021_vm10 = vcmp.eq.f32.partialorder %v879_v37, inf  ;;  %vm1023_vm11 = vcmp.eq.f32.partialorder %v879_v37, 0.0 }
 0x18e   : > { %v647_v21 = vpop.permute.xlu0 %646  ;;  %v722_v52 = vpop.permute.xlu1 %721 }
 0x18f   : > { %v680_v50 = vadd.f32 %v647_v21, %v605_v56 }
 0x190   : > { %636 = vrot.lane.b32.xlu0 %v2178_v1, %s1684_s30  ;;  %561 = vrot.lane.b32.xlu1 %v2178_v1, %s1685_s4 }
 0x191   : > { %v755_v41 = vadd.f32 %v722_v52, %v680_v50  ;;  %v1024_v50 = vand.u32 2147483648, %v879_v37 }
 0x192   : > { %v1578_v62 = vpop.eup %1577  ;;  %v769_v18 = vpop.permute.xlu0 %768 }
 0x193   : > { %v546_v27 = vpop.permute.xlu1 %545  ;;  %v1580_v31 = vpop.eup %1579  ;;  %v1114_v30 = vmul.f32 %v1578_v62, %v1574_v42  ;;  %v816_v16 = vadd.f32 %v769_v18, %v741_v13 }
 0x194   : > { %v922_v36 = vmul.f32 %v1580_v31, %v865_v20  ;;  %711 = vrot.lane.b32.xlu0 %v2178_v1, %s1686_s5  ;;  %638 = vrot.lane.b32.xlu1 %v2183_v25, %s1684_s30 }
 0x195   : > { %v1139_v35 = vmul.f32 %v1114_v30, %v1808_v32  ;;  %v841_v43 = vmul.f32 2e-05, %v816_v16 }
 0x196   : > { %v924_v45 = vsel %vm923_vm8, %v865_v20, %v922_v36  ;;  %v797_v42 = vpop.permute.xlu0 %796  ;;  %v1582_v58 = vpop.eup %1581  ;;  %v2203_v20 = vmul.f32 %v2190_v29, %v2190_v29 }
 0x197   : > { %v574_v21 = vpop.permute.xlu1 %573  ;;  %1164 = vst [vmem:[#allocation2] sm:$0xff] %v1139_v35  ;;  %v927_v56 = vsel %vm925_vm9, %v926_v38, %v924_v45  ;;  %v866_v44 = vadd.f32 1.0, %v841_v43  ;;  %v830_v13 = vadd.f32 %v797_v42, %v755_v41  ;;  %v1584_v62 = vpop.eup %1583  ;;  %v1128_v18 = vmul.f32 %v1582_v58, %v1576_v17 }
 0x198   : > { %1585 = vrsqrt.f32 %v927_v56  ;;  %786 = vrot.lane.b32.xlu0 %v2178_v1, %s1687_s6  ;;  %713 = vrot.lane.b32.xlu1 %v2183_v25, %s1686_s5  ;;  %v1020_v32 = vmul.f32 %v1584_v62, %v879_v37  ;;  %v592_v35 = vadd.f32 %v546_v27, %v1948_v54  ;;  %v606_v42 = vadd.f32 %v574_v21, %v1964_v63 }
 0x199   : > { %1587 = vrsqrt.f32 %v866_v44  ;;  %v1153_v52 = vmul.f32 %v1128_v18, %v1810_v33  ;;  %v855_v30 = vmul.f32 2e-05, %v830_v13  ;;  %vm930_vm12 = vcmp.eq.f32.partialorder %v866_v44, inf }
 0x19a   : > { %v621_v16 = vpop.permute.xlu0 %620  ;;  %v1022_v36 = vsel %vm1021_vm10, %v879_v37, %v1020_v32  ;;  %v933_v21 = vand.u32 2147483648, %v866_v44  ;;  %vm932_vm13 = vcmp.eq.f32.partialorder %v866_v44, 0.0 }
 0x19b   : > { %v696_v17 = vpop.permute.xlu1 %695  ;;  %1178 = vst [vmem:[#allocation2 + $0x70] sm:$0xff] %v1153_v52  ;;  %v1025_v38 = vsel %vm1023_vm11, %v1024_v50, %v1022_v36  ;;  %v880_v41 = vadd.f32 1.0, %v855_v30  ;;  %v667_v33 = vadd.f32 %v621_v16, %v592_v35 }
 0x19c   : > { %563 = vrot.lane.b32.xlu0 %v2183_v25, %s1685_s4  ;;  %565 = vrot.lane.b32.xlu1 %v2203_v20, %s1685_s4  ;;  %1589 = vrsqrt.f32 %v1025_v38 }
 0x19d   : > { %1591 = vrsqrt.f32 %v880_v41  ;;  %v742_v54 = vadd.f32 %v696_v17, %v667_v33  ;;  %vm1028_vm14 = vcmp.eq.f32.partialorder %v880_v41, inf  ;;  %vm1030_vm15 = vcmp.eq.f32.partialorder %v880_v41, 0.0 }
 0x19e   : > { %v649_v43 = vpop.permute.xlu0 %648 }
 0x19f   : > { %v724_v45 = vpop.permute.xlu1 %723  ;;  %v681_v37 = vadd.f32 %v649_v43, %v606_v42 }
 0x1a0   : > { %788 = vrot.lane.b32.xlu0 %v2183_v25, %s1687_s6  ;;  %640 = vrot.lane.b32.xlu1 %v2203_v20, %s1684_s30 }
 0x1a1   : > { %v756_v50 = vadd.f32 %v724_v45, %v681_v37  ;;  %v1031_v45 = vand.u32 2147483648, %v880_v41 }
 0x1a2   : > { %v1586_v27 = vpop.eup %1585  ;;  %v548_v56 = vpop.permute.xlu0 %547 }
 0x1a3   : > { %v771_v58 = vpop.permute.xlu1 %770  ;;  %v1588_v13 = vpop.eup %1587  ;;  %v1115_v18 = vmul.f32 %v1586_v27, %v1580_v31 }
 0x1a4   : > { %v817_v32 = vadd.f32 %v771_v58, %v742_v54  ;;  %v929_v52 = vmul.f32 %v1588_v13, %v866_v44  ;;  %715 = vrot.lane.b32.xlu0 %v2203_v20, %s1686_s5  ;;  %790 = vrot.lane.b32.xlu1 %v2203_v20, %s1687_s6 }
 0x1a5   : > { %v1140_v63 = vmul.f32 %v1115_v18, %v1833_v47 }
 0x1a6   : > { %v842_v30 = vmul.f32 2e-05, %v817_v32  ;;  %v931_v16 = vsel %vm930_vm12, %v866_v44, %v929_v52  ;;  %v576_v36 = vpop.permute.xlu0 %575  ;;  %v1590_v35 = vpop.eup %1589 }
 0x1a7   : > { %v799_v17 = vpop.permute.xlu1 %798  ;;  %1165 = vst [vmem:[#allocation2 + $0x8] sm:$0xff] %v1140_v63  ;;  %v934_v31 = vsel %vm932_vm13, %v933_v21, %v931_v16  ;;  %v1592_v43 = vpop.eup %1591  ;;  %v1129_v42 = vmul.f32 %v1590_v35, %v1584_v62  ;;  %v593_v62 = vadd.f32 %v548_v56, %v1980_v5  ;;  %v607_v21 = vadd.f32 %v576_v36, %v1991_v23 }
 0x1a8   : > { %v867_v38 = vadd.f32 1.0, %v842_v30  ;;  %v831_v33 = vadd.f32 %v799_v17, %v756_v50  ;;  %1593 = vrsqrt.f32 %v934_v31  ;;  %731 = vrot.lane.b32.xlu0 %v2085_v9, %s1686_s5  ;;  %733 = vrot.lane.b32.xlu1 %v2113_v34, %s1686_s5  ;;  %v1027_v47 = vmul.f32 %v1592_v43, %v880_v41 }
 0x1a9   : > { %v1154_v44 = vmul.f32 %v1129_v42, %v1859_v61 }
 0x1aa   : > { %1595 = vrsqrt.f32 %v867_v38  ;;  %v856_v54 = vmul.f32 2e-05, %v831_v33  ;;  %v698_v27 = vpop.permute.xlu0 %697  ;;  %v1029_v58 = vsel %vm1028_vm14, %v880_v41, %v1027_v47  ;;  %vm937_vm0 = vcmp.eq.f32.partialorder %v867_v38, inf }
 0x1ab   : > { %v623_v37 = vpop.permute.xlu1 %622  ;;  %1179 = vst [vmem:[#allocation2 + $0x78] sm:$0xff] %v1154_v44  ;;  %v1032_v18 = vsel %vm1030_vm15, %v1031_v45, %v1029_v58  ;;  %v940_v36 = vand.u32 2147483648, %v867_v38  ;;  %vm939_vm1 = vcmp.eq.f32.partialorder %v867_v38, 0.0 }
 0x1ac   : > { %v881_v32 = vadd.f32 1.0, %v856_v54  ;;  %806 = vrot.lane.b32.xlu0 %v2085_v9, %s1687_s6  ;;  %808 = vrot.lane.b32.xlu1 %v2113_v34, %s1687_s6  ;;  %1597 = vrsqrt.f32 %v1032_v18  ;;  %v668_v61 = vadd.f32 %v623_v37, %v593_v62 }
 0x1ae   : > { %1599 = vrsqrt.f32 %v881_v32  ;;  %v726_v63 = vpop.permute.xlu0 %725  ;;  %v743_v5 = vadd.f32 %v698_v27, %v668_v61  ;;  %vm1035_vm2 = vcmp.eq.f32.partialorder %v881_v32, inf  ;;  %v1038_v61 = vand.u32 2147483648, %v881_v32 }
 0x1af   : > { %v651_v52 = vpop.permute.xlu1 %650  ;;  %vm1037_vm3 = vcmp.eq.f32.partialorder %v881_v32, 0.0 }
 0x1b0   : > { %660 = vrot.lane.b32.xlu0 %v2135_v0, %s1684_s30  ;;  %662 = vrot.lane.b32.xlu1 %v2159_v39, %s1684_s30  ;;  %v682_v41 = vadd.f32 %v651_v52, %v607_v21 }
 0x1b2   : > { %v1594_v56 = vpop.eup %1593  ;;  %v773_v50 = vpop.permute.xlu0 %772  ;;  %v757_v33 = vadd.f32 %v726_v63, %v682_v41 }
 0x1b3   : > { %v550_v30 = vpop.permute.xlu1 %549  ;;  %v1116_v17 = vmul.f32 %v1594_v56, %v1588_v13  ;;  %v818_v35 = vadd.f32 %v773_v50, %v743_v5 }
 0x1b4   : > { %v1596_v16 = vpop.eup %1595  ;;  %735 = vrot.lane.b32.xlu0 %v2135_v0, %s1686_s5  ;;  %737 = vrot.lane.b32.xlu1 %v2159_v39, %s1686_s5  ;;  %v594_v50 = vadd.f32 %v550_v30, %v2014_v53 }
 0x1b5   : > { %v936_v31 = vmul.f32 %v1596_v16, %v867_v38  ;;  %v1141_v23 = vmul.f32 %v1116_v17, %v1876_v8  ;;  %v843_v47 = vmul.f32 2e-05, %v818_v35 }
 0x1b6   : > { %v801_v44 = vpop.permute.xlu0 %800  ;;  %v1598_v54 = vpop.eup %1597 }
 0x1b7   : > { %v938_v42 = vsel %vm937_vm0, %v867_v38, %v936_v31  ;;  %v578_v45 = vpop.permute.xlu1 %577  ;;  %1166 = vst [vmem:[#allocation2 + $0x10] sm:$0xff] %v1141_v23  ;;  %v832_v37 = vadd.f32 %v801_v44, %v757_v33  ;;  %v1130_v58 = vmul.f32 %v1598_v54, %v1592_v43  ;;  %v868_v62 = vadd.f32 1.0, %v843_v47 }
 0x1b8   : > { %v941_v13 = vsel %vm939_vm1, %v940_v36, %v938_v42  ;;  %v1600_v27 = vpop.eup %1599  ;;  %810 = vrot.lane.b32.xlu0 %v2135_v0, %s1687_s6  ;;  %812 = vrot.lane.b32.xlu1 %v2159_v39, %s1687_s6  ;;  %v608_v36 = vadd.f32 %v578_v45, %v2025_v57  ;;  %vm1215_vm0 = vcmask 124928  }
 0x1b9   : > { %1601 = vrsqrt.f32 %v941_v13  ;;  %v1034_v8 = vmul.f32 %v1600_v27, %v881_v32  ;;  %v857_v18 = vmul.f32 2e-05, %v832_v37  ;;  %v1155_v38 = vmul.f32 %v1130_v58, %v1903_v24 }
 0x1ba   : > { %1603 = vrsqrt.f32 %v868_v62  ;;  %v625_v52 = vpop.permute.xlu0 %624  ;;  %vm944_vm4 = vcmp.eq.f32.partialorder %v868_v62, inf  ;;  %v947_v13 = vand.u32 2147483648, %v868_v62  ;;  %vm946_vm5 = vcmp.eq.f32.partialorder %v868_v62, 0.0 }
 0x1bb   : > { %v775_v63 = vpop.permute.xlu1 %774  ;;  %v1036_v21 = vsel %vm1035_vm2, %v881_v32, %v1034_v8  ;;  %v882_v43 = vadd.f32 1.0, %v857_v18  ;;  %1180 = vst [vmem:[#allocation2 + $0x80] sm:$0xff] %v1155_v38  ;;  %v669_v17 = vadd.f32 %v625_v52, %v594_v50 }
 0x1bc   : > { %v1039_v5 = vsel %vm1037_vm3, %v1038_v61, %v1036_v21 }
 0x1bd   : > { %1605 = vrsqrt.f32 %v1039_v5  ;;  %vm1042_vm6 = vcmp.eq.f32.partialorder %v882_v43, inf  ;;  %vm1044_vm7 = vcmp.eq.f32.partialorder %v882_v43, 0.0 }
 0x1be   : > { %1607 = vrsqrt.f32 %v882_v43  ;;  %v653_v41 = vpop.permute.xlu0 %652 }
 0x1bf   : > { %v803_v56 = vpop.permute.xlu1 %802  ;;  %v683_v44 = vadd.f32 %v653_v41, %v608_v36 }
 0x1c2   : > { %v700_v31 = vpop.permute.xlu0 %699 }
 0x1c3   : > { %v1602_v35 = vpop.eup %1601  ;;  %v627_v24 = vpop.permute.xlu1 %626  ;;  %v744_v33 = vadd.f32 %v700_v31, %v669_v17 }
 0x1c4   : > { %v1117_v23 = vmul.f32 %v1602_v35, %v1596_v16  ;;  %v1604_v42 = vpop.eup %1603 }
 0x1c5   : > { %v943_v47 = vmul.f32 %v1604_v42, %v868_v62  ;;  %v819_v54 = vadd.f32 %v775_v63, %v744_v33  ;;  %v1045_v63 = vand.u32 2147483648, %v882_v43 }
 0x1c6   : > { %v1142_v32 = vmul.f32 %v1117_v23, %v1938_v49  ;;  %v728_v37 = vpop.permute.xlu0 %727 }
 0x1c7   : > { %v655_v58 = vpop.permute.xlu1 %654  ;;  %v1606_v8 = vpop.eup %1605  ;;  %v945_v53 = vsel %vm944_vm4, %v868_v62, %v943_v47  ;;  %v844_v30 = vmul.f32 2e-05, %v819_v54  ;;  %v758_v18 = vadd.f32 %v728_v37, %v683_v44 }
 0x1c8   : > { %1167 = vst [vmem:[#allocation2 + $0x18] sm:$0xff] %v1142_v32  ;;  %v1608_v16 = vpop.eup %1607  ;;  %v1131_v38 = vmul.f32 %v1606_v8, %v1600_v27  ;;  %v948_v57 = vsel %vm946_vm5, %v947_v13, %v945_v53  ;;  %v1189_v13 = vld [vmem:[#allocation2] ss:$2 sm:$0x3f] }
 0x1c9   : > { %1609 = vrsqrt.f32 %v948_v57  ;;  %v1041_v45 = vmul.f32 %v1608_v16, %v882_v43  ;;  %v869_v61 = vadd.f32 1.0, %v844_v30  ;;  %v833_v49 = vadd.f32 %v803_v56, %v758_v18 }
 0x1ca   : > { %v1156_v52 = vmul.f32 %v1131_v38, %v1950_v55  ;;  %v552_v5 = vpop.permute.xlu0 %551  ;;  %v1191_v38 = vld [vmem:[#allocation2 + $0x1] ss:$2 sm:$0x3f] }
 0x1cb   : > { %v777_v21 = vpop.permute.xlu1 %776  ;;  %v1043_v41 = vsel %vm1042_vm6, %v882_v43, %v1041_v45  ;;  %1611 = vrsqrt.f32 %v869_v61  ;;  %v858_v50 = vmul.f32 2e-05, %v833_v49  ;;  %v595_v27 = vadd.f32 %v552_v5, %v2040_v59 }
 0x1cc   : > { %1181 = vst [vmem:[#allocation2 + $0x88] sm:$0xff] %v1156_v52  ;;  %v1046_v62 = vsel %vm1044_vm7, %v1045_v63, %v1043_v41  ;;  %vm951_vm8 = vcmp.eq.f32.partialorder %v869_v61, inf  ;;  %v954_v18 = vand.u32 2147483648, %v869_v61  ;;  %vm953_vm9 = vcmp.eq.f32.partialorder %v869_v61, 0.0 }
 0x1cd   : > { %1613 = vrsqrt.f32 %v1046_v62  ;;  %v883_v31 = vadd.f32 1.0, %v858_v50  ;;  %v670_v55 = vadd.f32 %v627_v24, %v595_v27  ;;  %v1192_v41 = vmax.f32 %v1189_v13, %v1191_v38  ;;  %v1194_v62 = vld [vmem:[#allocation2 + $0x2] ss:$2 sm:$0x3f] }
 0x1ce   : > { %v580_v35 = vpop.permute.xlu0 %579  ;;  %v1295_v50 = vld [vmem:[#allocation2 + $0x70] ss:$2 sm:$0x3f] }
 0x1cf   : > { %v805_v17 = vpop.permute.xlu1 %804  ;;  %1615 = vrsqrt.f32 %v883_v31  ;;  %v609_v56 = vadd.f32 %v580_v35, %v2051_v2  ;;  %vm1049_vm10 = vcmp.eq.f32.partialorder %v883_v31, inf  ;;  %vm1051_vm11 = vcmp.eq.f32.partialorder %v883_v31, 0.0 }
 0x1d1   : > { %v684_v54 = vadd.f32 %v655_v58, %v609_v56  ;;  %v1052_v56 = vand.u32 2147483648, %v883_v31 }
 0x1d2   : > { %v702_v23 = vpop.permute.xlu0 %701 }
 0x1d3   : > { %v554_v36 = vpop.permute.xlu1 %553  ;;  %v1610_v33 = vpop.eup %1609  ;;  %v745_v32 = vadd.f32 %v702_v23, %v670_v55 }
 0x1d4   : > { %v1118_v47 = vmul.f32 %v1610_v33, %v1604_v42  ;;  %v1195_v33 = vmax.f32 %v1192_v41, %v1194_v62 }
 0x1d5   : > { %v1612_v43 = vpop.eup %1611  ;;  %v820_v44 = vadd.f32 %v777_v21, %v745_v32 }
 0x1d6   : > { %v1143_v37 = vmul.f32 %v1118_v47, %v1972_v3  ;;  %v950_v8 = vmul.f32 %v1612_v43, %v869_v61  ;;  %v730_v59 = vpop.permute.xlu0 %729  ;;  %v596_v3 = vadd.f32 %v554_v36, %v2074_v14 }
 0x1d7   : > { %v2253_v53 = vpop.permute.xlu1 %581  ;;  %v1614_v30 = vpop.eup %1613  ;;  %v845_v2 = vmul.f32 2e-05, %v820_v44  ;;  %v759_v24 = vadd.f32 %v730_v59, %v684_v54  ;;  %v1298_v59 = vld [vmem:[#allocation2 + $0x72] ss:$2 sm:$0x3f] }
 0x1d8   : > { %1168 = vst [vmem:[#allocation2 + $0x20] sm:$0xff] %v1143_v37  ;;  %v1132_v57 = vmul.f32 %v1614_v30, %v1608_v16  ;;  %v952_v45 = vsel %vm951_vm8, %v869_v61, %v950_v8  ;;  %v1296_v61 = vld [vmem:[#allocation2 + $0x71] ss:$2 sm:$0x3f] }
 0x1d9   : > { %v955_v42 = vsel %vm953_vm9, %v954_v18, %v952_v45  ;;  %v870_v49 = vadd.f32 1.0, %v845_v2  ;;  %v834_v58 = vadd.f32 %v805_v17, %v759_v24  ;;  %v1616_v5 = vpop.eup %1615  ;;  %v1197_v17 = vld [vmem:[#allocation2 + $0xe] ss:$2 sm:$0x3f]  ;;  %v1297_v47 = vmax.f32 %v1295_v50, %v1296_v61 }
 0x1da   : > { %v1157_v52 = vmul.f32 %v1132_v57, %v1983_v6  ;;  %1617 = vrsqrt.f32 %v955_v42  ;;  %v629_v63 = vpop.permute.xlu0 %628  ;;  %v1048_v27 = vmul.f32 %v1616_v5, %v883_v31  ;;  %v1198_v54 = vmax.f32 %v1195_v33, %v1197_v17  ;;  %v1301_v30 = vld [vmem:[#allocation2 + $0x7e] ss:$2 sm:$0x3f]  ;;  %v1200_v2 = vld [vmem:[#allocation2 + $0xf] ss:$2 sm:$0x3f] }
 0x1db   : > { %v704_v21 = vpop.permute.xlu1 %703  ;;  %1619 = vrsqrt.f32 %v870_v49  ;;  %v859_v16 = vmul.f32 2e-05, %v834_v58  ;;  %v671_v35 = vadd.f32 %v629_v63, %v596_v3  ;;  %v1299_v18 = vmax.f32 %v1297_v47, %v1298_v59  ;;  %v1203_v63 = vld [vmem:[#allocation2 + $0x10] ss:$2 sm:$0x3f] }
 0x1dc   : > { %1182 = vst [vmem:[#allocation2 + $0x90] sm:$0xff] %v1157_v52  ;;  %v1050_v55 = vsel %vm1049_vm10, %v883_v31, %v1048_v27  ;;  %v1201_v38 = vmax.f32 %v1198_v54, %v1200_v2  ;;  %vm958_vm12 = vcmp.eq.f32.partialorder %v870_v49, inf  ;;  %v961_v41 = vand.u32 2147483648, %v870_v49  ;;  %v1304_v61 = vld [vmem:[#allocation2 + $0x7f] ss:$2 sm:$0x3f] }
 0x1dd   : > { %v2257_v6 = vadd.f32 1.0, %v859_v16  ;;  %v746_v14 = vadd.f32 %v704_v21, %v671_v35  ;;  %v1053_v32 = vsel %vm1051_vm11, %v1052_v56, %v1050_v55  ;;  %v1302_v42 = vmax.f32 %v1299_v18, %v1301_v30 }
 0x1de   : > { %v2259_v23 = vpop.permute.xlu0 %656  ;;  %1621 = vrsqrt.f32 %v1053_v32  ;;  %vm960_vm13 = vcmp.eq.f32.partialorder %v870_v49, 0.0  ;;  %v1204_v27 = vmax.f32 %v1201_v38, %v1203_v63  ;;  %v1307_v32 = vld [vmem:[#allocation2 + $0x80] ss:$2 sm:$0x3f] }
 0x1df   : > { %v779_v36 = vpop.permute.xlu1 %778  ;;  %1623 = vrsqrt.f32 %v2257_v6  ;;  %v1206_v50 = vld [vmem:[#allocation2 + $0x1c] ss:$2 sm:$0x3f]  ;;  %vm1056_vm14 = vcmp.eq.f32.partialorder %v2257_v6, inf  ;;  %vm1058_vm15 = vcmp.eq.f32.partialorder %v2257_v6, 0.0 }
 0x1e0   : > { %v821_v44 = vadd.f32 %v779_v36, %v746_v14  ;;  %v1207_v14 = vmax.f32 %v1204_v27, %v1206_v50 }
 0x1e2   : > { %v846_v13 = vmul.f32 2e-05, %v821_v44  ;;  %v556_v8 = vpop.permute.xlu0 %555  ;;  %v1059_v44 = vand.u32 2147483648, %v2257_v6 }
 0x1e3   : > { %v631_v37 = vpop.permute.xlu1 %630  ;;  %v597_v62 = vadd.f32 %v556_v8, %v2101_v26  ;;  %v1313_v27 = vld [vmem:[#allocation2 + $0x8d] ss:$2 sm:$0x3f] }
 0x1e4   : > { %v1618_v31 = vpop.eup %1617  ;;  %v2264_v45 = vadd.f32 1.0, %v846_v13  ;;  %v1310_v13 = vld [vmem:[#allocation2 + $0x8c] ss:$2 sm:$0x3f] }
 0x1e5   : > { %v2262_v24 = vpop.eup %1619  ;;  %v1119_v57 = vmul.f32 %v1618_v31, %v1612_v43  ;;  %v672_v33 = vadd.f32 %v631_v37, %v597_v62 }
 0x1e6   : > { %v957_v58 = vmul.f32 %v2262_v24, %v870_v49  ;;  %v2269_v3 = vpop.permute.xlu0 %583  ;;  %1625 = vrsqrt.f32 %v2264_v45  ;;  %vm965_vm1 = vcmp.eq.f32.partialorder %v2264_v45, inf  ;;  %v968_v62 = vand.u32 2147483648, %v2264_v45 }
 0x1e7   : > { %v2267_v52 = vpop.permute.xlu1 %658  ;;  %v1144_v21 = vmul.f32 %v1119_v57, %v2006_v48  ;;  %v1305_v48 = vmax.f32 %v1302_v42, %v1304_v61  ;;  %vm967_vm2 = vcmp.eq.f32.partialorder %v2264_v45, 0.0 }
 0x1e8   : > { %v959_v43 = vsel %vm958_vm12, %v870_v49, %v957_v58  ;;  %v1622_v35 = vpop.eup %1621  ;;  %v1209_v49 = vld [vmem:[#allocation2 + $0x1d] ss:$2 sm:$0x3f] }
 0x1e9   : > { %1169 = vst [vmem:[#allocation2 + $0x28] sm:$0xff] %v1144_v21  ;;  %v962_v16 = vsel %vm960_vm13, %v961_v41, %v959_v43  ;;  %v2274_v55 = vpop.eup %1623  ;;  %v1133_v36 = vmul.f32 %v1622_v35, %v1616_v5  ;;  %v1308_v59 = vmax.f32 %v1305_v48, %v1307_v32  ;;  %v1210_v30 = vmax.f32 %v1207_v14, %v1209_v49 }
 0x1ea   : > { %1627 = vrsqrt.f32 %v962_v16  ;;  %v706_v56 = vpop.permute.xlu0 %705  ;;  %v1055_v26 = vmul.f32 %v2274_v55, %v2257_v6 }
 0x1eb   : > { %v558_v17 = vpop.permute.xlu1 %557  ;;  %v1158_v47 = vmul.f32 %v1133_v36, %v2017_v7  ;;  %v747_v54 = vadd.f32 %v706_v56, %v672_v33  ;;  %v1311_v38 = vmax.f32 %v1308_v59, %v1310_v13 }
 0x1ec   : > { %v1057_v8 = vsel %vm1056_vm14, %v2257_v6, %v1055_v26  ;;  %v598_v42 = vadd.f32 %v558_v17, %v2128_v51 }
 0x1ed   : > { %1183 = vst [vmem:[#allocation2 + $0x98] sm:$0xff] %v1158_v47  ;;  %v1060_v31 = vsel %vm1058_vm15, %v1059_v44, %v1057_v8  ;;  %v1314_v35 = vmax.f32 %v1311_v38, %v1313_v27 }
 0x1ee   : > { %v781_v5 = vpop.permute.xlu0 %780  ;;  %1629 = vrsqrt.f32 %v1060_v31 }
 0x1ef   : > { %v2284_v37 = vpop.permute.xlu1 %585  ;;  %v822_v18 = vadd.f32 %v781_v5, %v747_v54 }
 0x1f0   : > { %v1212_v7 = vld [vmem:[#allocation2 + $0x1e] ss:$2 sm:$0x3f]  ;;  %v1626_v2 = vpop.eup %1625 }
 0x1f1   : > { %v1213_v57 = vmax.f32 %v1210_v30, %v1212_v7  ;;  %v847_v58 = vmul.f32 2e-05, %v822_v18  ;;  %v964_v6 = vmul.f32 %v1626_v2, %v2264_v45 }
 0x1f2   : > { %v633_v63 = vpop.permute.xlu0 %632 }
 0x1f3   : > { %v708_v21 = vpop.permute.xlu1 %707  ;;  %v1214_v41 = vpack.c.bf16 %v1213_v57, %v1213_v57  ;;  %v872_v50 = vadd.f32 1.0, %v847_v58  ;;  %v673_v43 = vadd.f32 %v633_v63, %v598_v42  ;;  %v966_v16 = vsel %vm965_vm1, %v2264_v45, %v964_v6 }
 0x1f4   : > { %v1628_v51 = vpop.eup %1627  ;;  %v969_v56 = vsel %vm967_vm2, %v968_v62, %v966_v16  ;;  %v1316_v17 = vld [vmem:[#allocation2 + $0x8e] ss:$2 sm:$0x3f]  ;;  %v1217_v16 = vld [vmem:[#allocation2 + $0x1c] ss:$2 sm:$0x3f] }
 0x1f5   : > { %1216 = vst.msk [vmem:[%s2290_s10] sm:$0x7] %vm1215_vm0, %v1214_v41  ;;  %v1120_v61 = vmul.f32 %v1628_v51, %v2262_v24  ;;  %1631 = vrsqrt.f32 %v872_v50  ;;  %v748_v48 = vadd.f32 %v708_v21, %v673_v43  ;;  %v1317_v33 = vmax.f32 %v1314_v35, %v1316_v17 }
 0x1f6   : > { %1633 = vrsqrt.f32 %v969_v56  ;;  %v783_v14 = vpop.permute.xlu0 %782  ;;  %vm972_vm3 = vcmp.eq.f32.partialorder %v872_v50, inf  ;;  %v975_v42 = vand.u32 2147483648, %v872_v50  ;;  %vm974_vm4 = vcmp.eq.f32.partialorder %v872_v50, 0.0 }
 0x1f7   : > { %v635_v36 = vpop.permute.xlu1 %634  ;;  %v1145_v32 = vmul.f32 %v1120_v61, %v2032_v10  ;;  %v823_v26 = vadd.f32 %v783_v14, %v748_v48  ;;  %v1318_v49 = vpack.c.bf16 %v1317_v33, %v1317_v33 }
 0x1f8   : > { %v1630_v45 = vpop.eup %1629 }
 0x1f9   : > { %1170 = vst [vmem:[#allocation2 + $0x30] sm:$0xff] %v1145_v32  ;;  %v848_v47 = vmul.f32 2e-05, %v823_v26  ;;  %1444 = vst.msk [vmem:[%s2290_s10 + $0x10] sm:$0x7] %vm1215_vm0, %v1318_v49  ;;  %v1134_v24 = vmul.f32 %v1630_v45, %v2274_v55 }
 0x1fa   : > { %v560_v54 = vpop.permute.xlu0 %559 }
 0x1fb   : > { %v710_v44 = vpop.permute.xlu1 %709  ;;  %v599_v13 = vadd.f32 %v560_v54, %v2148_v19  ;;  %v873_v8 = vadd.f32 1.0, %v848_v47  ;;  %v1159_v5 = vmul.f32 %v1134_v24, %v2043_v12 }
 0x1fd   : > { %v674_v59 = vadd.f32 %v635_v36, %v599_v13  ;;  %1635 = vrsqrt.f32 %v873_v8  ;;  %1184 = vst [vmem:[#allocation2 + $0xa0] sm:$0xff] %v1159_v5  ;;  %vm979_vm5 = vcmp.eq.f32.partialorder %v873_v8, inf  ;;  %v982_v56 = vand.u32 2147483648, %v873_v8  ;;  %v1220_v36 = vld [vmem:[#allocation2 + $0x1e] ss:$2 sm:$0x3f] }
 0x1fe   : > { %v2306_v10 = vpop.permute.xlu0 %587  ;;  %vm981_vm6 = vcmp.eq.f32.partialorder %v873_v8, 0.0 }
 0x1ff   : > { %v785_v30 = vpop.permute.xlu1 %784  ;;  %v1632_v31 = vpop.eup %1631  ;;  %v749_v18 = vadd.f32 %v710_v44, %v674_v59 }
 0x200   : > { %v1634_v7 = vpop.eup %1633  ;;  %v971_v38 = vmul.f32 %v1632_v31, %v872_v50  ;;  %v1223_v49 = vld [vmem:[#allocation2 + $0x2a] ss:$2 sm:$0x3f] }
 0x201   : > { %v1121_v57 = vmul.f32 %v1634_v7, %v1626_v2  ;;  %v824_v58 = vadd.f32 %v785_v30, %v749_v18 }
 0x202   : > { %v973_v55 = vsel %vm972_vm3, %v872_v50, %v971_v38  ;;  %v637_v19 = vpop.permute.xlu0 %636  ;;  %v1218_v50 = vld [vmem:[#allocation2 + $0x1d] ss:$2 sm:$0x3f] }
 0x203   : > { %v562_v6 = vpop.permute.xlu1 %561  ;;  %v1146_v12 = vmul.f32 %v1121_v57, %v2066_v4  ;;  %v976_v63 = vsel %vm974_vm4, %v975_v42, %v973_v55  ;;  %v849_v21 = vmul.f32 2e-05, %v824_v58  ;;  %v1219_v33 = vmax.f32 %v1217_v16, %v1218_v50  ;;  %v1226_v58 = vld [vmem:[#allocation2 + $0x2b] ss:$2 sm:$0x3f] }
 0x204   : > { %1637 = vrsqrt.f32 %v976_v63  ;;  %v600_v41 = vadd.f32 %v562_v6, %v2178_v1 }
 0x205   : > { %1171 = vst [vmem:[#allocation2 + $0x38] sm:$0xff] %v1146_v12  ;;  %v874_v62 = vadd.f32 1.0, %v849_v21  ;;  %v1221_v44 = vmax.f32 %v1219_v33, %v1220_v36 }
 0x206   : > { %v712_v43 = vpop.permute.xlu0 %711  ;;  %v675_v51 = vadd.f32 %v637_v19, %v600_v41 }
 0x207   : > { %v639_v27 = vpop.permute.xlu1 %638  ;;  %1639 = vrsqrt.f32 %v874_v62  ;;  %v1636_v2 = vpop.eup %1635  ;;  %v1224_v59 = vmax.f32 %v1221_v44, %v1223_v49  ;;  %vm986_vm7 = vcmp.eq.f32.partialorder %v874_v62, inf  ;;  %v989_v57 = vand.u32 2147483648, %v874_v62 }
 0x208   : > { %v978_v35 = vmul.f32 %v1636_v2, %v873_v8  ;;  %v750_v61 = vadd.f32 %v712_v43, %v675_v51  ;;  %vm988_vm8 = vcmp.eq.f32.partialorder %v874_v62, 0.0  ;;  %v1229_v43 = vld [vmem:[#allocation2 + $0x2c] ss:$2 sm:$0x3f] }
 0x209   : > { %v1227_v19 = vmax.f32 %v1224_v59, %v1226_v58 }
 0x20a   : > { %v787_v17 = vpop.permute.xlu0 %786  ;;  %v980_v48 = vsel %vm979_vm5, %v873_v8, %v978_v35 }
 0x20b   : > { %v714_v4 = vpop.permute.xlu1 %713  ;;  %v825_v14 = vadd.f32 %v787_v17, %v750_v61  ;;  %v983_v1 = vsel %vm981_vm6, %v982_v56, %v980_v48 }
 0x20c   : > { %1641 = vrsqrt.f32 %v983_v1 }
 0x20d   : > { %v850_v32 = vmul.f32 2e-05, %v825_v14 }
 0x20e   : > { %v1638_v26 = vpop.eup %1637  ;;  %v564_v45 = vpop.permute.xlu0 %563 }
 0x20f   : > { %v566_v47 = vpop.permute.xlu1 %565  ;;  %v1122_v54 = vmul.f32 %v1638_v26, %v1632_v31  ;;  %v875_v24 = vadd.f32 1.0, %v850_v32  ;;  %v601_v13 = vadd.f32 %v564_v45, %v2183_v25 }
 0x210   : > { %v602_v42 = vadd.f32 %v566_v47, %v2203_v20  ;;  %v610_v20 = vadd.f32 %v2253_v53, %v2085_v9 }
 0x211   : > { %v1640_v5 = vpop.eup %1639  ;;  %v1147_v30 = vmul.f32 %v1122_v54, %v2092_v11  ;;  %1643 = vrsqrt.f32 %v875_v24  ;;  %v676_v18 = vadd.f32 %v639_v27, %v601_v13  ;;  %v1230_v27 = vmax.f32 %v1227_v19, %v1229_v43 }
 0x212   : > { %v985_v8 = vmul.f32 %v1640_v5, %v874_v62  ;;  %v789_v7 = vpop.permute.xlu0 %788  ;;  %v685_v14 = vadd.f32 %v2259_v23, %v610_v20  ;;  %vm993_vm9 = vcmp.eq.f32.partialorder %v875_v24, inf  ;;  %v996_v33 = vand.u32 2147483648, %v875_v24 }
 0x213   : > { %v641_v38 = vpop.permute.xlu1 %640  ;;  %1172 = vst [vmem:[#allocation2 + $0x40] sm:$0xff] %v1147_v30  ;;  %v751_v31 = vadd.f32 %v714_v4, %v676_v18  ;;  %vm995_vm10 = vcmp.eq.f32.partialorder %v875_v24, 0.0 }
 0x214   : > { %v987_v55 = vsel %vm986_vm7, %v874_v62, %v985_v8  ;;  %v677_v6 = vadd.f32 %v641_v38, %v602_v42  ;;  %v611_v62 = vadd.f32 %v2269_v3, %v2113_v34  ;;  %v613_v42 = vadd.f32 %v2306_v10, %v2159_v39 }
 0x215   : > { %v990_v25 = vsel %vm988_vm8, %v989_v57, %v987_v55  ;;  %v826_v12 = vadd.f32 %v789_v7, %v751_v31  ;;  %v612_v57 = vadd.f32 %v2284_v37, %v2135_v0 }
 0x216   : > { %1645 = vrsqrt.f32 %v990_v25  ;;  %v716_v11 = vpop.permute.xlu0 %715  ;;  %v1642_v21 = vpop.eup %1641  ;;  %v686_v34 = vadd.f32 %v2267_v52, %v611_v62 }
 0x217   : > { %v791_v63 = vpop.permute.xlu1 %790  ;;  %v752_v41 = vadd.f32 %v716_v11, %v677_v6  ;;  %v1123_v51 = vmul.f32 %v1642_v21, %v1636_v2  ;;  %v851_v16 = vmul.f32 2e-05, %v826_v12 }
 0x219   : > { %v827_v35 = vadd.f32 %v791_v63, %v752_v41  ;;  %v1148_v50 = vmul.f32 %v1123_v51, %v2120_v40  ;;  %v876_v32 = vadd.f32 1.0, %v851_v16 }
 0x21a   : > { %v1232_v61 = vld [vmem:[#allocation2 + $0x38] ss:$2 sm:$0x3f]  ;;  %v732_v56 = vpop.permute.xlu0 %731  ;;  %v1235_v36 = vld [vmem:[#allocation2 + $0x39] ss:$2 sm:$0x3f] }
 0x21b   : > { %v734_v17 = vpop.permute.xlu1 %733  ;;  %v1644_v4 = vpop.eup %1643  ;;  %v1233_v48 = vmax.f32 %v1230_v27, %v1232_v61  ;;  %1173 = vst [vmem:[#allocation2 + $0x48] sm:$0xff] %v1148_v50  ;;  %v852_v9 = vmul.f32 2e-05, %v827_v35  ;;  %v1238_v53 = vld [vmem:[#allocation2 + $0x3a] ss:$2 sm:$0x3f]  ;;  %1647 = vrsqrt.f32 %v876_v32  ;;  %v760_v23 = vadd.f32 %v732_v56, %v685_v14 }
 0x21c   : > { %v992_v2 = vmul.f32 %v1644_v4, %v875_v24  ;;  %v761_v44 = vadd.f32 %v734_v17, %v686_v34  ;;  %vm1000_vm11 = vcmp.eq.f32.partialorder %v876_v32, inf  ;;  %v1243_v37 = vld [vmem:[#allocation2 + $0x38] ss:$2 sm:$0x3f]  ;;  %v1003_v43 = vand.u32 2147483648, %v876_v32 }
 0x21d   : > { %v1236_v1 = vmax.f32 %v1233_v48, %v1235_v36  ;;  %v877_v59 = vadd.f32 1.0, %v852_v9  ;;  %v1244_v51 = vld [vmem:[#allocation2 + $0x39] ss:$2 sm:$0x3f]  ;;  %vm1002_vm12 = vcmp.eq.f32.partialorder %v876_v32, 0.0 }
 0x21e   : > { %v994_v26 = vsel %vm993_vm9, %v875_v24, %v992_v2  ;;  %v807_v40 = vpop.permute.xlu0 %806  ;;  %v1245_v56 = vmax.f32 %v1243_v37, %v1244_v51 }
 0x21f   : > { %v809_v3 = vpop.permute.xlu1 %808  ;;  %v1239_v49 = vmax.f32 %v1236_v1, %v1238_v53  ;;  %v997_v45 = vsel %vm995_vm10, %v996_v33, %v994_v26  ;;  %v835_v30 = vadd.f32 %v807_v40, %v760_v23  ;;  %vm1007_vm13 = vcmp.eq.f32.partialorder %v877_v59, inf  ;;  %v1246_v1 = vld [vmem:[#allocation2 + $0x3a] ss:$2 sm:$0x3f] }
 0x220   : > { %v1646_v47 = vpop.eup %1645  ;;  %1649 = vrsqrt.f32 %v997_v45  ;;  %v836_v8 = vadd.f32 %v809_v3, %v761_v44  ;;  %v1010_v17 = vand.u32 2147483648, %v877_v59  ;;  %vm1009_vm14 = vcmp.eq.f32.partialorder %v877_v59, 0.0 }
 0x221   : > { %v1240_v54 = vpack.c.bf16 %v1239_v49, %v1239_v49  ;;  %v1124_v13 = vmul.f32 %v1646_v47, %v1640_v5  ;;  %1651 = vrsqrt.f32 %v877_v59  ;;  %v860_v24 = vmul.f32 2e-05, %v835_v30 }
 0x222   : > { %v661_v18 = vpop.permute.xlu0 %660  ;;  %v861_v38 = vmul.f32 2e-05, %v836_v8 }
 0x223   : > { %v663_v7 = vpop.permute.xlu1 %662  ;;  %1441 = vst.msk [vmem:[%s2290_s10 + $0x4] sm:$0x7] %vm1215_vm0, %v1240_v54  ;;  %v1149_v52 = vmul.f32 %v1124_v13, %v2138_v22  ;;  %v885_v5 = vadd.f32 1.0, %v860_v24  ;;  %v687_v19 = vadd.f32 %v661_v18, %v612_v57 }
 0x224   : > { %v886_v58 = vadd.f32 1.0, %v861_v38  ;;  %v688_v25 = vadd.f32 %v663_v7, %v613_v42  ;;  %v1321_v38 = vld [vmem:[#allocation2 + $0x8c] ss:$2 sm:$0x3f] }
 0x225   : > { %1174 = vst [vmem:[#allocation2 + $0x50] sm:$0xff] %v1149_v52  ;;  %1653 = vrsqrt.f32 %v885_v5  ;;  %v1648_v6 = vpop.eup %1647  ;;  %vm1063_vm15 = vcmp.eq.f32.partialorder %v885_v5, inf  ;;  %vm1065_vm1 = vcmp.eq.f32.partialorder %v885_v5, 0.0  ;;  %v1066_v53 = vand.u32 2147483648, %v885_v5 }
 0x226   : > { %v736_v55 = vpop.permute.xlu0 %735  ;;  %1655 = vrsqrt.f32 %v886_v58  ;;  %v999_v63 = vmul.f32 %v1648_v6, %v876_v32  ;;  %vm1070_vm2 = vcmp.eq.f32.partialorder %v886_v58, inf  ;;  %v1073_v3 = vand.u32 2147483648, %v886_v58 }
 0x227   : > { %v738_v31 = vpop.permute.xlu1 %737  ;;  %v762_v22 = vadd.f32 %v736_v55, %v687_v19  ;;  %vm1072_vm3 = vcmp.eq.f32.partialorder %v886_v58, 0.0 }
 0x228   : > { %v763_v12 = vadd.f32 %v738_v31, %v688_v25  ;;  %v1001_v27 = vsel %vm1000_vm11, %v876_v32, %v999_v63  ;;  %v1247_v32 = vmax.f32 %v1245_v56, %v1246_v1 }
 0x229   : > { %v1004_v20 = vsel %vm1002_vm12, %v1003_v43, %v1001_v27 }
 0x22a   : > { %v1650_v11 = vpop.eup %1649  ;;  %v811_v21 = vpop.permute.xlu0 %810  ;;  %1657 = vrsqrt.f32 %v1004_v20 }
 0x22b   : > { %v813_v0 = vpop.permute.xlu1 %812  ;;  %v1125_v41 = vmul.f32 %v1650_v11, %v1644_v4  ;;  %v837_v39 = vadd.f32 %v811_v21, %v762_v22  ;;  %v1652_v16 = vpop.eup %1651  ;;  %v1324_v22 = vld [vmem:[#allocation2 + $0x8e] ss:$2 sm:$0x3f]  ;;  %v1327_v21 = vld [vmem:[#allocation2 + $0x9a] ss:$2 sm:$0x3f] }
 0x22c   : > { %v838_v10 = vadd.f32 %v813_v0, %v763_v12  ;;  %v1006_v61 = vmul.f32 %v1652_v16, %v877_v59  ;;  %v1249_v33 = vld [vmem:[#allocation2 + $0x46] ss:$2 sm:$0x3f]  ;;  %v1252_v44 = vld [vmem:[#allocation2 + $0x47] ss:$2 sm:$0x3f] }
 0x22d   : > { %v1150_v35 = vmul.f32 %v1125_v41, %v2166_v60  ;;  %v862_v62 = vmul.f32 2e-05, %v837_v39  ;;  %v1250_v34 = vmax.f32 %v1247_v32, %v1249_v33  ;;  %v1255_v18 = vld [vmem:[#allocation2 + $0x48] ss:$2 sm:$0x3f] }
 0x22e   : > { %v863_v50 = vmul.f32 2e-05, %v838_v10  ;;  %v1008_v4 = vsel %vm1007_vm13, %v877_v59, %v1006_v61 }
 0x22f   : > { %1175 = vst [vmem:[#allocation2 + $0x58] sm:$0xff] %v1150_v35  ;;  %v887_v48 = vadd.f32 1.0, %v862_v62  ;;  %v1011_v36 = vsel %vm1009_vm14, %v1010_v17, %v1008_v4  ;;  %v1654_v2 = vpop.eup %1653  ;;  %v1253_v54 = vmax.f32 %v1250_v34, %v1252_v44  ;;  %v1330_v4 = vld [vmem:[#allocation2 + $0x9b] ss:$2 sm:$0x3f] }
 0x230   : > { %v888_v14 = vadd.f32 1.0, %v863_v50  ;;  %v1656_v60 = vpop.eup %1655  ;;  %v1062_v9 = vmul.f32 %v1654_v2, %v885_v5  ;;  %v1290_v44 = vld [vmem:[#allocation2 + $0x72] ss:$2 sm:$0x3f] }
 0x231   : > { %1659 = vrsqrt.f32 %v887_v48  ;;  %v1069_v26 = vmul.f32 %v1656_v60, %v886_v58  ;;  %v1256_v57 = vmax.f32 %v1253_v54, %v1255_v18  ;;  %vm1077_vm4 = vcmp.eq.f32.partialorder %v887_v48, inf }
 0x232   : > { %1661 = vrsqrt.f32 %v1011_v36  ;;  %v1064_v40 = vsel %vm1063_vm15, %v885_v5, %v1062_v9  ;;  %v1080_v5 = vand.u32 2147483648, %v887_v48  ;;  %vm1079_vm5 = vcmp.eq.f32.partialorder %v887_v48, 0.0 }
 0x233   : > { %1663 = vrsqrt.f32 %v888_v14  ;;  %v1067_v49 = vsel %vm1065_vm1, %v1066_v53, %v1064_v40  ;;  %v1071_v45 = vsel %vm1070_vm2, %v886_v58, %v1069_v26  ;;  %v1322_v58 = vld [vmem:[#allocation2 + $0x8d] ss:$2 sm:$0x3f]  ;;  %vm1084_vm6 = vcmp.eq.f32.partialorder %v888_v14, inf }
 0x234   : > { %1665 = vrsqrt.f32 %v1067_v49  ;;  %v1074_v23 = vsel %vm1072_vm3, %v1073_v3, %v1071_v45  ;;  %v1658_v47 = vpop.eup %1657  ;;  %vm1086_vm7 = vcmp.eq.f32.partialorder %v888_v14, 0.0  ;;  %v1323_v63 = vmax.f32 %v1321_v38, %v1322_v58  ;;  %v1287_v49 = vld [vmem:[#allocation2 + $0x71] ss:$2 sm:$0x3f] }
 0x235   : > { %1667 = vrsqrt.f32 %v1074_v23  ;;  %v1126_v13 = vmul.f32 %v1658_v47, %v1648_v6  ;;  %v1087_v6 = vand.u32 2147483648, %v888_v14 }
 0x236   : > { %v1258_v7 = vld [vmem:[#allocation2 + $0x54] ss:$2 sm:$0x3f]  ;;  %v1261_v0 = vld [vmem:[#allocation2 + $0x55] ss:$2 sm:$0x3f]  ;;  %v1325_v51 = vmax.f32 %v1323_v63, %v1324_v22 }
 0x237   : > { %v1151_v30 = vmul.f32 %v1126_v13, %v2169_v46  ;;  %v1259_v19 = vmax.f32 %v1256_v57, %v1258_v7  ;;  %v1269_v43 = vld [vmem:[#allocation2 + $0x54] ss:$2 sm:$0x3f]  ;;  %v1270_v39 = vld [vmem:[#allocation2 + $0x55] ss:$2 sm:$0x3f] }
 0x238   : > { %v1328_v62 = vmax.f32 %v1325_v51, %v1327_v21  ;;  %v1271_v61 = vmax.f32 %v1269_v43, %v1270_v39 }
 0x239   : > { %1176 = vst [vmem:[#allocation2 + $0x60] sm:$0xff] %v1151_v30  ;;  %v1262_v27 = vmax.f32 %v1259_v19, %v1261_v0 }
 0x23a   : > { %v1331_v36 = vmax.f32 %v1328_v62, %v1330_v4 }
 0x23b   : > { %v1660_v59 = vpop.eup %1659 }
 0x23c   : > { %v1662_v8 = vpop.eup %1661  ;;  %v1076_v52 = vmul.f32 %v1660_v59, %v887_v48 }
 0x23d   : > { %v1664_v24 = vpop.eup %1663  ;;  %v1127_v42 = vmul.f32 %v1662_v8, %v1652_v16 }
 0x23e   : > { %v1078_v55 = vsel %vm1077_vm4, %v887_v48, %v1076_v52  ;;  %v1083_v31 = vmul.f32 %v1664_v24, %v888_v14  ;;  %v1666_v11 = vpop.eup %1665 }
 0x23f   : > { %v1152_v25 = vmul.f32 %v1127_v42, %v2190_v29  ;;  %v1081_v46 = vsel %vm1079_vm5, %v1080_v5, %v1078_v55  ;;  %v1668_v41 = vpop.eup %1667  ;;  %v1135_v10 = vmul.f32 %v1666_v11, %v1654_v2 }
 0x240   : > { %1669 = vrsqrt.f32 %v1081_v46  ;;  %v1085_v12 = vsel %vm1084_vm6, %v888_v14, %v1083_v31  ;;  %v1136_v29 = vmul.f32 %v1668_v41, %v1656_v60  ;;  %v1264_v16 = vld [vmem:[#allocation2 + $0x56] ss:$2 sm:$0x3f] }
 0x241   : > { %1177 = vst [vmem:[#allocation2 + $0x68] sm:$0xff] %v1152_v25  ;;  %v1088_v37 = vsel %vm1086_vm7, %v1087_v6, %v1085_v12  ;;  %v1272_v35 = vld [vmem:[#allocation2 + $0x56] ss:$2 sm:$0x3f]  ;;  %v1160_v20 = vmul.f32 %v1135_v10, %v2077_v15  ;;  %v1265_v50 = vmax.f32 %v1262_v27, %v1264_v16 }
 0x242   : > { %1671 = vrsqrt.f32 %v1088_v37  ;;  %v1161_v56 = vmul.f32 %v1136_v29, %v2104_v28  ;;  %v1273_v48 = vmax.f32 %v1271_v61, %v1272_v35  ;;  %v1333_v15 = vld [vmem:[#allocation2 + $0x9c] ss:$2 sm:$0x3f]  ;;  %v1284_v28 = vld [vmem:[#allocation2 + $0x70] ss:$2 sm:$0x3f] }
 0x243   : > { %1185 = vst [vmem:[#allocation2 + $0xa8] sm:$0xff] %v1160_v20  ;;  %v1266_v17 = vpack.c.bf16 %v1265_v50, %v1265_v50  ;;  %v1334_v26 = vmax.f32 %v1331_v36, %v1333_v15 }
 0x244   : > { %1186 = vst [vmem:[#allocation2 + $0xb0] sm:$0xff] %v1161_v56 }
 0x245   : > { %1442 = vst.msk [vmem:[%s2290_s10 + $0x8] sm:$0x7] %vm1215_vm0, %v1266_v17 }
 0x248   : > { %v1275_v14 = vld [vmem:[#allocation2 + $0x62] ss:$2 sm:$0x3f]  ;;  %v1278_v33 = vld [vmem:[#allocation2 + $0x63] ss:$2 sm:$0x3f] }
 0x249   : > { %v1276_v2 = vmax.f32 %v1273_v48, %v1275_v14  ;;  %v1281_v9 = vld [vmem:[#allocation2 + $0x64] ss:$2 sm:$0x3f] }
 0x24a   : > { %v1670_v1 = vpop.eup %1669 }
 0x24b   : > { %v1279_v60 = vmax.f32 %v1276_v2, %v1278_v33  ;;  %v1336_v34 = vld [vmem:[#allocation2 + $0xa8] ss:$2 sm:$0x3f]  ;;  %v1339_v45 = vld [vmem:[#allocation2 + $0xa9] ss:$2 sm:$0x3f] }
 0x24c   : > { %v1672_v32 = vpop.eup %1671  ;;  %v1337_v3 = vmax.f32 %v1334_v26, %v1336_v34  ;;  %v1342_v54 = vld [vmem:[#allocation2 + $0xaa] ss:$2 sm:$0x3f] }
 0x24d   : > { %v1282_v53 = vmax.f32 %v1279_v60, %v1281_v9 }
 0x24e   : > { %v1340_v47 = vmax.f32 %v1337_v3, %v1339_v45 }
 0x24f   : > { %v1285_v40 = vmax.f32 %v1282_v53, %v1284_v28 }
 0x250   : > { %v1343_v59 = vmax.f32 %v1340_v47, %v1342_v54 }
 0x251   : > { %v1288_v23 = vmax.f32 %v1285_v40, %v1287_v49 }
 0x252   : > { %v1344_v8 = vpack.c.bf16 %v1343_v59, %v1343_v59 }
 0x253   : > { %v1291_v13 = vmax.f32 %v1288_v23, %v1290_v44 }
 0x254   : > { %1445 = vst.msk [vmem:[%s2290_s10 + $0x14] sm:$0x7] %vm1215_vm0, %v1344_v8 }
 0x255   : > { %v1292_v30 = vpack.c.bf16 %v1291_v13, %v1291_v13 }
 0x257   : > { %1443 = vst.msk [vmem:[%s2290_s10 + $0xc] sm:$0x7] %vm1215_vm0, %v1292_v30 }
 0x258 PF: > { %s13_s12 = sadd.s32 1, %s1679_s12  }
 0x259   : > { %p10_p4 = scmp.ge.s32.totalorder %s13_s12, 4  }
 0x25b   :  { %12 = sbr.rel (!%p10_p4) target bundleno = 1 (0x1), region = 105 }

// kernel: forward.6
= control target key start
LH: loop header
LB: loop body
LE: loop exit
PB: predicated region body
PF: predicated region fallthrough
CT: control target
= control target key end

     0   :  { %s1140_s12 = smov 0   ;;  %s1281_s0 = inlined_call_operand.vmem [shape: bf16[2,24,32], index: 0, kind: input, shape index: {}]   ;;  %s1282_s1 = inlined_call_operand.vmem [shape: bf16[9,32,128], index: 1, kind: input, shape index: {}]   ;;  %s1283_s2 = inlined_call_operand.vmem [shape: f32[1,128], index: 2, kind: input, shape index: {}]   ;;  %s1284_s3 = inlined_call_operand.vmem [shape: bf16[2,2,2,48], index: 3, kind: output, shape index: {}]  }
   0x1 LB: > { %s866_s13 = sadd.s32 4294967295, %s1115_s12   ;;  %p870_p0 = scmp.ge.s32.totalorder %s1115_s12, 1  ;;  %s1115_s12 = sphi %s1140_s12, %s13_s12  }
   0x2   : > { %p137_p1 = scmp.lt.s32.totalorder %s1115_s12, 3 }
   0x4   : > { %p138_p2 = pnand %p870_p0, %p137_p1 }
   0x5   : > { %v1084_v0 = vld [vmem:[%s1282_s1] sm:$0xff] (!%p138_p2)   ;;  %v1117_v1 = vmov (!%p138_p2), 0.0   ;;  %v1085_v2 = vld [vmem:[%s1282_s1 + $0x8] sm:$0xff] (!%p138_p2)   ;;  %vm1118_vm0 = vmmov (!%p138_p2), 0   ;;  %p160_p3 = scmp.lt.s32.totalorder (!%p138_p2), %s866_s13, 1  ;;  %vm194_vm1 = vcmask (!%p138_p2), 261120   ;;  %v798_v61 = vlaneseq (!%p138_p2) }
   0x6   : > { %141 = sbr.rel (%p138_p2) target bundleno = 300 (0x12c), region = 32  ;;  %970 = vmatprep.subr.bf16.mxu1 (!%p138_p2), %v1117_v1  ;;  %1002 = vmatprep.subr.bf16.mxu0 (!%p138_p2), %v1117_v1  ;;  %v1086_v3 = vld [vmem:[%s1282_s1 + $0x40] sm:$0xff] (!%p138_p2)   ;;  %v1087_v4 = vld [vmem:[%s1282_s1 + $0x48] sm:$0xff] (!%p138_p2)   ;;  %v1088_v5 = vld [vmem:[%s1282_s1 + $0x10] sm:$0xff] (!%p138_p2)   ;;  %v1119_v59 = vmov (!%p138_p2), 1966171168  }
   0x7   : > { %971 = vmatpush3.bf16.msra.mxu1 (!%p138_p2), %v1084_v0  ;;  %974 = vmatprep.mubr.msk.bf16.mxu1 (!%p138_p2), %vm1118_vm0, %v1117_v1  ;;  %v1091_v12 = vld [vmem:[%s1282_s1 + $0x18] sm:$0xff] (!%p138_p2)   ;;  %v1090_v20 = vld [vmem:[%s1282_s1 + $0x50] sm:$0xff] (!%p138_p2)   ;;  %v1094_v25 = vld [vmem:[%s1282_s1 + $0x20] sm:$0xff] (!%p138_p2)   ;;  %v796_v60 = vunpack.c.l.s4 (!%p138_p2), %v1119_v59  ;;  %vm792_vm2 = vcmask (!%p138_p2), 385024  }
   0x8   : > { %972 = vmatprep.subr.bf16.mxu1 (!%p138_p2), %v1117_v1  ;;  %1006 = vmatprep.mubr.msk.bf16.mxu0 (!%p138_p2), %vm1118_vm0, %v1117_v1  ;;  %v1093_v24 = vld [vmem:[%s1282_s1 + $0x58] sm:$0xff] (!%p138_p2)   ;;  %v1097_v28 = vld [vmem:[%s1282_s1 + $0x28] sm:$0xff] (!%p138_p2)   ;;  %v1096_v32 = vld [vmem:[%s1282_s1 + $0x60] sm:$0xff] (!%p138_p2)  }
   0x9   : > { %1003 = vmatpush3.bf16.msra.mxu0 (!%p138_p2), %v1086_v3  ;;  %v1099_v34 = vld [vmem:[%s1282_s1 + $0x68] sm:$0xff] (!%p138_p2)   ;;  %v1100_v35 = vld [vmem:[%s1282_s1 + $0x30] sm:$0xff] (!%p138_p2)   ;;  %v1102_v36 = vld [vmem:[%s1282_s1 + $0x38] sm:$0xff] (!%p138_p2)   ;;  %v797_v0 = vunpack.c.0.s8 (!%p138_p2), %v796_v60 }
   0xa   : > { %1004 = vmatprep.subr.bf16.mxu0 (!%p138_p2), %v1117_v1  ;;  %v1101_v43 = vld [vmem:[%s1282_s1 + $0x70] sm:$0xff] (!%p138_p2)   ;;  %v1104_v46 = vld [vmem:[%s1282_s1 + $0x78] sm:$0xff] (!%p138_p2)   ;;  %v1106_v50 = vld [vmem:[%s1282_s1 + $0x80] sm:$0xff] (!%p138_p2)  }
   0xb   : > { %973 = vmatpush3.bf16.msra.mxu1 (!%p138_p2), %v1085_v2  ;;  %v1107_v51 = vld [vmem:[%s1282_s1 + $0x88] sm:$0xff] (!%p138_p2)   ;;  %v873_v62 = vld [vmem:[%s1283_s2] ss:$0 sm:$0xff] (!%p138_p2) }
   0xc   : > { %978 = vmatprep.subr.bf16.mxu1 (!%p138_p2), %v1117_v1 }
   0xd   : > { %s1286_s13 = smov (!%p160_p3, %s866_s13), 1  ;;  %1005 = vmatpush3.bf16.msra.mxu0 %v1087_v4 }
   0xe   : > { %s1072_s22 = smul.u32 12, %s1286_s13  ;;  %1010 = vmatprep.subr.bf16.mxu0 %v1117_v1 }
  0x10   : > { %s1178_s27 = scalar_lea.vmem %s1281_s0, %s1072_s22 }
  0x11   : > { %v171_v6 = vld [vmem:[%s1178_s27] sm:$0xf]  ;;  %v448_v8 = vld [vmem:[%s1178_s27 + $0x4] sm:$0x7]  ;;  %v650_v39 = vld [vmem:[%s1178_s27 + $0x8] sm:$0x1] }
  0x12   : > { %v1183_v7 = vld [vmem:[%s1178_s27] sm:$0xc]  ;;  %975 = vmatmul.mubr.msk.bf16.vlgmr.msra.gmra.mrb[0].mxu1 %vm194_vm1, %v171_v6  ;;  %v239_v11 = vld [vmem:[%s1178_s27 + $0x4] sm:$0x1]  ;;  %v724_v52 = vld [vmem:[%s1178_s27 + $0x4] sm:$0xe] }
  0x13   : > { %v905_v9 = vcombine.low %v1183_v7, %v448_v8  ;;  %v238_v10 = vld [vmem:[%s1178_s27] sm:$0xf]  ;;  %979 = vmatpush3.bf16.msra.mxu1 %v1088_v5  ;;  %982 = vmatprep.mubr.msk.bf16.mxu1 %vm1118_vm0, %v1117_v1  ;;  %v380_v37 = vld [vmem:[%s1178_s27 + $0x4] sm:$0x3]  ;;  %v936_v53 = vcombine.low %v724_v52, %v650_v39 }
  0x14   : > { %v881_v13 = vcombine.low %v238_v10, %v239_v11  ;;  %980 = vmatprep.subr.bf16.mxu1 %v1117_v1  ;;  %v521_v26 = vld [vmem:[%s1178_s27] sm:$0x8]  ;;  %v649_v38 = vld [vmem:[%s1178_s27 + $0x4] sm:$0xf]  ;;  %v897_v40 = vcombine.low %v1183_v7, %v380_v37 }
  0x15   : > { %v458_v14 = vshrl.u32 %v905_v9, 16  ;;  %v461_v15 = vshll.u32 %v905_v9, 16  ;;  %v913_v27 = vcombine.low %v521_v26, %v448_v8  ;;  %v313_v29 = vld [vmem:[%s1178_s27] sm:$0xe]  ;;  %v928_v41 = vcombine.low %v649_v38, %v650_v39  ;;  %v587_v42 = vld [vmem:[%s1178_s27 + $0x4] sm:$0xf] }
  0x16   : > { %v251_v16 = vshrl.u32 %v881_v13, 16  ;;  %v253_v17 = vshll.u32 %v881_v13, 16  ;;  %v889_v31 = vcombine.low %v313_v29, %v239_v11  ;;  %v391_v44 = vrot.slane %v897_v40, 2  ;;  %s872_s27 = sshll.u32 %s1286_s13, 1 }
  0x17   : > { %v460_v18 = vrot.slane %v458_v14, 2  ;;  %v463_v19 = vrot.slane %v461_v15, 3  ;;  %981 = vmatpush3.bf16.msra.mxu1 %v1091_v12  ;;  %v530_v30 = vrot.slane %v913_v27, 3  ;;  %v664_v45 = vshll.u32 %v928_v41, 16  ;;  %s168_s7 = scalar_lea.vmem %s1284_s3, %s872_s27 }
  0x18   : > { %v255_v21 = vrot.slane %v253_v17, 1  ;;  %986 = vmatprep.subr.bf16.mxu1 %v1117_v1  ;;  %v322_v33 = vrot.slane %v889_v31, 1  ;;  %v662_v47 = vshrl.u32 %v928_v41, 16  ;;  %v733_v54 = vrot.slane %v936_v53, 1 }
  0x19   : > { %v464_v22 = vor.u32 %v463_v19, %v460_v18  ;;  %v666_v48 = vrot.slane %v664_v45, 1 }
  0x1a   : > { %v256_v23 = vor.u32 %v255_v21, %v251_v16 }
  0x1b   : > { %1007 = vmatmul.mubr.msk.bf16.vlgmr.msra.gmra.mrb[0].mxu0 %vm194_vm1, %v464_v22  ;;  %v667_v49 = vor.u32 %v666_v48, %v662_v47 }
  0x1c   : > { %1011 = vmatpush3.bf16.msra.mxu0 %v1090_v20  ;;  %1014 = vmatprep.mubr.msk.bf16.mxu0 %vm1118_vm0, %v1117_v1 }
  0x1d   : > { %1012 = vmatprep.subr.bf16.mxu0 %v1117_v1 }
  0x1e   : > { %983 = vmatmul.mubr.msk.bf16.vlgmr.msra.gmra.mrb[0].mxu1 %vm194_vm1, %v256_v23 }
  0x1f   : > { %987 = vmatpush3.bf16.msra.mxu1 %v1094_v25  ;;  %990 = vmatprep.mubr.msk.bf16.mxu1 %vm1118_vm0, %v1117_v1 }
  0x20   : > { %1013 = vmatpush3.bf16.msra.mxu0 %v1093_v24  ;;  %988 = vmatprep.subr.bf16.mxu1 %v1117_v1 }
  0x21   : > { %1018 = vmatprep.subr.bf16.mxu0 %v1117_v1 }
  0x23   : > { %989 = vmatpush3.bf16.msra.mxu1 %v1097_v28 }
  0x24   : > { %994 = vmatprep.subr.bf16.mxu1 %v1117_v1 }
  0x27   : > { %1015 = vmatmul.mubr.msk.bf16.vlgmr.msra.gmra.mrb[0].mxu0 %vm194_vm1, %v530_v30 }
  0x28   : > { %1019 = vmatpush3.bf16.msra.mxu0 %v1096_v32  ;;  %1022 = vmatprep.mubr.msk.bf16.mxu0 %vm1118_vm0, %v1117_v1 }
  0x29   : > { %1020 = vmatprep.subr.bf16.mxu0 %v1117_v1 }
  0x2a   : > { %991 = vmatmul.mubr.msk.bf16.vlgmr.msra.gmra.mrb[0].mxu1 %vm194_vm1, %v322_v33 }
  0x2b   : > { %995 = vmatpush3.bf16.msra.mxu1 %v1100_v35  ;;  %998 = vmatprep.mubr.msk.bf16.mxu1 %vm1118_vm0, %v1117_v1 }
  0x2c   : > { %1021 = vmatpush3.bf16.msra.mxu0 %v1099_v34  ;;  %996 = vmatprep.subr.bf16.mxu1 %v1117_v1 }
  0x2d   : > { %1026 = vmatprep.subr.bf16.mxu0 %v1117_v1 }
  0x2f   : > { %997 = vmatpush3.bf16.msra.mxu1 %v1102_v36 }
  0x33   : > { %1023 = vmatmul.mubr.msk.bf16.vlgmr.msra.gmra.mrb[0].mxu0 %vm194_vm1, %v587_v42 }
  0x34   : > { %1027 = vmatpush3.bf16.msra.mxu0 %v1101_v43  ;;  %1030 = vmatprep.mubr.msk.bf16.mxu0 %vm1118_vm0, %v1117_v1 }
  0x35   : > { %1028 = vmatprep.subr.bf16.mxu0 %v1117_v1 }
  0x36   : > { %999 = vmatmul.mubr.msk.bf16.vlgmr.msra.gmra.mrb[0].mxu1 %vm194_vm1, %v391_v44 }
  0x38   : > { %1029 = vmatpush3.bf16.msra.mxu0 %v1104_v46 }
  0x39   : > { %1034 = vmatprep.subr.bf16.mxu0 %v1117_v1 }
  0x3f   : > { %1031 = vmatmul.mubr.msk.bf16.vlgmr.msra.gmra.mrb[0].mxu0 %vm194_vm1, %v667_v49 }
  0x40   : > { %1035 = vmatpush3.bf16.msra.mxu0 %v1106_v50  ;;  %1038 = vmatprep.mubr.msk.bf16.mxu0 %vm1118_vm0, %v1117_v1 }
  0x41   : > { %1036 = vmatprep.subr.bf16.mxu0 %v1117_v1  ;;  %v799_v1 = vshrl.u32 %v798_v61, 7 }
  0x43   : > { %v800_v7 = vsub.s32 %v797_v0, %v799_v1 }
  0x44   : > { %1037 = vmatpush3.bf16.msra.mxu0 %v1107_v51 }
  0x4b   : > { %1039 = vmatmul.mubr.msk.bf16.vlgmr.msra.gmra.mrb[0].mxu0 %vm194_vm1, %v733_v54 }
 0x109   : > { %v441_v55 = vpop.f32.mrb[0].mxu1 }
 0x10a   : > { %v1000_v56 = vpop.f32.mrb[1].mxu1  ;;  %v1042_v63 = vadd.f32 %v873_v62, %v441_v55 }
 0x10b   : > { %v444_v57 = vpop.f32.mrb[2].mxu1 }
 0x10c   : > { %v1001_v58 = vpop.f32.mrb[3].mxu1 }
 0x11e   : > { %v783_v2 = vpop.f32.mrb[0].mxu0 }
 0x11f   : > { %v1043_v3 = vadd.f32 %v1042_v63, %v783_v2  ;;  %v1040_v4 = vpop.f32.mrb[1].mxu0 }
 0x120   : > { %v786_v5 = vpop.f32.mrb[2].mxu0 }
 0x121   : > { %v790_v6 = vmax.f32 %v1043_v3, 0.0  ;;  %v1041_v8 = vpop.f32.mrb[3].mxu0 }
 0x123   : > { %v791_v9 = vpack.c.bf16 %v790_v6, %v790_v6 }
 0x125   : > { %793 = vst.msk [vmem:[%s168_s7] sm:$0x1] %vm792_vm2, %v791_v9  ;;  %v801_v10 = vrot.slane %v791_v9, %v800_v7 }
 0x127   : > { %v808_v11 = vrot.slane %v801_v10, %v800_v7 }
 0x129   : > { %v809_v12 = vcombine.high %v808_v11, %v808_v11 }
 0x12b   : > { %940 = vst.msk [vmem:[%s168_s7 + $0x1] sm:$0x1] %vm792_vm2, %v809_v12 }
 0x12c PF: > { %s13_s12 = sadd.s32 1, %s1115_s12  }
 0x12d   : > { %p10_p4 = scmp.ge.s32.totalorder %s13_s12, 4  }
 0x12f   :  { %12 = sbr.rel (!%p10_p4) target bundleno = 1 (0x1), region = 71 }

// kernel: forward.5
= control target key start
LH: loop header
LB: loop body
LE: loop exit
PB: predicated region body
PF: predicated region fallthrough
CT: control target
= control target key end

     0   :  { %s4499_s12 = smov 0   ;;  %s5268_s0 = inlined_call_operand.vmem [shape: bf16[2,104,16], index: 0, kind: input, shape index: {}]   ;;  %s5269_s1 = inlined_call_operand.vmem [shape: bf16[25,16,128], index: 1, kind: input, shape index: {}]   ;;  %s5270_s2 = inlined_call_operand.vmem [shape: f32[1,128], index: 2, kind: input, shape index: {}]   ;;  %s5271_s3 = inlined_call_operand.vmem [shape: bf16[2,2,2,32], index: 3, kind: output, shape index: {}]  }
   0x1 LB: > { %s3524_s13 = sadd.s32 4294967295, %s4473_s12   ;;  %p3528_p0 = scmp.ge.s32.totalorder %s4473_s12, 1  ;;  %s4473_s12 = sphi %s4499_s12, %s13_s12  }
   0x2   : > { %p137_p1 = scmp.lt.s32.totalorder %s4473_s12, 3 }
   0x4   : > { %p138_p2 = pnand %p3528_p0, %p137_p1 }
   0x5   : > { %v4353_v0 = vld [vmem:[%s5269_s1] sm:$0xff] (!%p138_p2)   ;;  %p160_p3 = scmp.lt.s32.totalorder (!%p138_p2), %s3524_s13, 1  ;;  %v4361_v2 = vld [vmem:[%s5269_s1 + $0x68] sm:$0xff] (!%p138_p2)   ;;  %vm213_vm0 = vcmask (!%p138_p2), 130048   ;;  %v4534_v6 = vld [vmem:[%s5269_s1 + $0x10] sm:$0xff] (!%p138_p2)   ;;  %vm1295_vm1 = vcmask (!%p138_p2), 1044480  }
   0x6   : > { %141 = sbr.rel (%p138_p2) target bundleno = 648 (0x288), region = 32  ;;  %v4354_v1 = vld [vmem:[%s5269_s1 + $0x60] sm:$0xff] (!%p138_p2)   ;;  %3888 = vmatprep.subr.bf16.mxu1 (!%p138_p2), %v4353_v0  ;;  %v4367_v3 = vld [vmem:[%s5269_s1 + $0x8] sm:$0xff] (!%p138_p2)   ;;  %vm1787_vm2 = vsmask.f32 (!%p138_p2), 4352  ;;  %v4587_v32 = vld [vmem:[%s5269_s1 + $0x70] sm:$0xff] (!%p138_p2)  }
   0x7   : > { %3889 = vmatpush3.bf16.msra.mxu1 (!%p138_p2), %v4353_v0  ;;  %4008 = vmatprep.subr.bf16.mxu0 (!%p138_p2), %v4354_v1  ;;  %vm298_vm3 = vsmask.f32 (!%p138_p2), 7424  ;;  %vm425_vm4 = vcmask (!%p138_p2), 1046528   ;;  %vm531_vm5 = vsmask.f32 (!%p138_p2), 6400  ;;  %vm655_vm6 = vcmask (!%p138_p2), 1045504  }
   0x8   : > { %4009 = vmatpush3.bf16.msra.mxu0 (!%p138_p2), %v4354_v1  ;;  %3898 = vmatprep.subr.bf16.mxu1 (!%p138_p2), %v4367_v3  ;;  %vm1156_vm7 = vsmask.f32 (!%p138_p2), 5376  ;;  %s4475_s22 = smov (!%p138_p2), 127   ;;  %s4476_s23 = smov (!%p138_p2), 1  }
   0x9   : > { %4018 = vmatprep.subr.bf16.mxu0 (!%p138_p2), %v4361_v2  ;;  %s4477_s24 = smov (!%p138_p2), 2   ;;  %s4478_s26 = smov (!%p138_p2), 126  }
   0xd   : > { %s5273_s13 = smov (!%p160_p3, %s3524_s13), 1 }
   0xe   : > { %s4340_s20 = smul.u32 52, %s5273_s13  ;;  %s3530_s27 = sshll.u32 %s5273_s13, 1 }
   0xf   : > { %s168_s30 = scalar_lea.vmem %s5271_s3, %s3530_s27 }
  0x10   : > { %s4525_s25 = scalar_lea.vmem %s5268_s0, %s4340_s20 }
  0x11   : > { %v171_v4 = vld [vmem:[%s4525_s25] sm:$0xf]  ;;  %v4529_v5 = vld [vmem:[%s4525_s25 + $0x4] sm:$0xf]  ;;  %v4538_v8 = vld [vmem:[%s4525_s25 + $0x8] sm:$0xff]  }
  0x12   : > { %v3532_v7 = vcombine.low %v171_v4, %v4529_v5  ;;  %v4541_v9 = vld [vmem:[%s4525_s25 + $0xc] sm:$0xf]  ;;  %v4544_v10 = vld [vmem:[%s4525_s25 + $0x10] sm:$0xf]  ;;  %v4547_v11 = vld [vmem:[%s4525_s25 + $0x14] sm:$0xf] }
  0x13   : > { %v4551_v14 = vld [vmem:[%s4525_s25 + $0x18] sm:$0xf]  ;;  %v4555_v15 = vcombine.low %v4544_v10, %v4547_v11  ;;  %v1673_v16 = vld [vmem:[%s4525_s25 + $0x8] sm:$0x8]  ;;  %v4562_v18 = vld [vmem:[%s4525_s25 + $0x1c] sm:$0xf] }
  0x14   : > { %3890 = vmatprep.mubr.msk.bf16.mxu1 %vm213_vm0, %v3532_v7  ;;  %v299_v12 = vshrl.u32 %v3532_v7, 16  ;;  %v301_v13 = vshll.u32 %v3532_v7, 16  ;;  %v3645_v17 = vcombine.low %v1673_v16, %v4541_v9  ;;  %v4567_v21 = vcombine.low %v4551_v14, %v4562_v18  ;;  %v4570_v22 = vld [vmem:[%s4525_s25 + $0x10] sm:$0xff]   ;;  %v4573_v23 = vld [vmem:[%s4525_s25 + $0x18] sm:$0xf] }
  0x15   : > { %3891 = vmatmul.mubr.msk.bf16.vlgmr.msra.gmra.mrb[0].mxu1 %vm213_vm0, %v4538_v8  ;;  %v1681_v20 = vrot.slane %v4555_v15, 3  ;;  %v1551_v24 = vshrl.u32 %v4555_v15, 16  ;;  %v178_v26 = vld [vmem:[%s4525_s25 + $0x1c] sm:$0x3]  ;;  %v1554_v28 = vshll.u32 %v4555_v15, 16  ;;  %v305_v44 = vshll.u32 %v4538_v8, 16 }
  0x16   : > { %v303_v19 = vrot.slane %v301_v13, 1  ;;  %3899 = vmatpush3.bf16.msra.mxu1 %v4367_v3  ;;  %v1680_v25 = vrot.slane %v3645_v17, 3  ;;  %v291_v27 = vld [vmem:[%s4525_s25 + $0x1c] sm:$0x7]  ;;  %v1683_v29 = vrot.slane %v4567_v21, 3  ;;  %3894 = vmatprep.mubr.msk.bf16.mxu1 %vm213_vm0, %v4570_v22  ;;  %v3535_v30 = vcombine.low %v4573_v23, %v178_v26  ;;  %v4429_v15 = vld [vmem:[%s5269_s1 + $0xc0] sm:$0xff]  }
  0x17   : > { %3908 = vmatprep.subr.bf16.mxu1 %v4534_v6  ;;  %v1789_v31 = vshrl.u32 %v3645_v17, 16  ;;  %v4591_v34 = vcombine.low %v4573_v23, %v291_v27  ;;  %v1792_v35 = vshll.u32 %v3645_v17, 16  ;;  %v1796_v36 = vrot.slane %v1551_v24, 3  ;;  %v4596_v37 = vld [vmem:[%s4525_s25 + $0x20] sm:$0xf]  ;;  %v4376_v26 = vld [vmem:[%s5269_s1 + $0x18] sm:$0xff]  }
  0x18   : > { %v1682_v33 = vsel %vm1295_vm1, %v1680_v25, %v1681_v20  ;;  %v4599_v38 = vld [vmem:[%s4525_s25 + $0x24] sm:$0xf]  ;;  %v1684_v39 = vsel %vm1295_vm1, %v1681_v20, %v1683_v29  ;;  %v1797_v41 = vrot.slane %v1554_v28, 4  ;;  %v304_v42 = vor.u32 %v303_v19, %v299_v12  ;;  %v4631_v59 = vld [vmem:[%s4525_s25 + $0x28] sm:$0x3] }
  0x19   : > { %4010 = vmatprep.mubr.msk.bf16.mxu0 %vm213_vm0, %v1682_v33  ;;  %v1791_v40 = vrot.slane %v1789_v31, 3  ;;  %v1794_v43 = vrot.slane %v1792_v35, 4  ;;  %v309_v45 = vshrl.u32 %v4538_v8, 16  ;;  %v1560_v46 = vshrl.u32 %v4567_v21, 16  ;;  %v418_v0 = vld [vmem:[%s4525_s25] sm:$0xe] }
  0x1a   : > { %4011 = vmatmul.mubr.msk.bf16.vlgmr.msra.gmra.mrb[0].mxu0 %vm213_vm0, %v1684_v39  ;;  %v1798_v47 = vor.u32 %v1797_v41, %v1796_v36  ;;  %v1563_v48 = vshll.u32 %v4567_v21, 16  ;;  %v312_v49 = vshll.u32 %v4570_v22, 16  ;;  %v4615_v50 = vcombine.low %v4596_v37, %v4599_v38  ;;  %v4373_v36 = vld [vmem:[%s5269_s1 + $0x78] sm:$0xff]  }
  0x1b   : > { %4019 = vmatpush3.bf16.msra.mxu0 %v4361_v2  ;;  %v1795_v51 = vor.u32 %v1794_v43, %v1791_v40  ;;  %v307_v52 = vrot.slane %v305_v44, 1  ;;  %v1800_v53 = vrot.slane %v1560_v46, 3  ;;  %v316_v54 = vshrl.u32 %v4570_v22, 16 }
  0x1c   : > { %4028 = vmatprep.subr.bf16.mxu0 %v4587_v32  ;;  %v1801_v55 = vrot.slane %v1563_v48, 4  ;;  %v314_v56 = vrot.slane %v312_v49, 1  ;;  %v1569_v57 = vshrl.u32 %v4615_v50, 16  ;;  %v1572_v58 = vshll.u32 %v4615_v50, 16 }
  0x1d   : > { %3895 = vmatmul.mubr.msk.bf16.gmra.mrb[4].mxu1 %vm213_vm0, %v3535_v30  ;;  %v1799_v60 = vsel %vm1787_vm2, %v1795_v51, %v1798_v47  ;;  %v308_v61 = vsel %vm298_vm3, %v304_v42, %v307_v52  ;;  %v311_v62 = vor.u32 %v309_v45, %v307_v52  ;;  %v320_v63 = vshll.u32 %v4591_v34, 16  ;;  %v524_v52 = vld [vmem:[%s4525_s25 + $0x1c] sm:$0xf] }
  0x1e   : > { %4020 = vmatprep.mubr.msk.bf16.mxu0 %vm213_vm0, %v1799_v60  ;;  %3900 = vmatprep.mubr.msk.bf16.mxu1 %vm213_vm0, %v308_v61  ;;  %v1802_v1 = vor.u32 %v1801_v55, %v1800_v53  ;;  %v1804_v2 = vrot.slane %v1569_v57, 3  ;;  %v1805_v3 = vrot.slane %v1572_v58, 4  ;;  %v318_v4 = vor.u32 %v316_v54, %v314_v56  ;;  %v4681_v60 = vld [vmem:[%s4525_s25 + $0x10] sm:$0xf] }
  0x1f   : > { %v322_v7 = vrot.slane %v320_v63, 1  ;;  %v3653_v12 = vcombine.low %v4631_v59, %v4631_v59  ;;  %v315_v13 = vsel %vm298_vm3, %v311_v62, %v314_v56  ;;  %v3551_v17 = vcombine.low %v418_v0, %v4529_v5  ;;  %v2006_v56 = vld [vmem:[%s4525_s25 + $0xc] sm:$0x8]  ;;  %v4691_v62 = vld [vmem:[%s4525_s25 + $0x14] sm:$0xf] }
  0x20   : > { %v1806_v16 = vor.u32 %v1805_v3, %v1804_v2  ;;  %v1803_v27 = vsel %vm1787_vm2, %v1798_v47, %v1802_v1  ;;  %v324_v35 = vshrl.u32 %v4591_v34, 16  ;;  %v427_v40 = vrot.slane %v4538_v8, 1  ;;  %v2009_v63 = vld [vmem:[%s4525_s25 + $0x18] sm:$0xf] }
  0x21   : > { %v323_v19 = vsel %vm298_vm3, %v318_v4, %v322_v7  ;;  %v1809_v20 = vshrl.u32 %v3653_v12, 16  ;;  %v1812_v25 = vshll.u32 %v3653_v12, 16  ;;  %v426_v39 = vrot.slane %v3551_v17, 1 }
  0x22   : > { %v1807_v30 = vsel %vm1787_vm2, %v1802_v1, %v1806_v16  ;;  %v326_v42 = vor.u32 %v324_v35, %v322_v7  ;;  %v3661_v47 = vcombine.low %v4541_v9, %v4544_v10  ;;  %v431_v51 = vrot.slane %v4591_v34, 1 }
  0x23   : > { %v1811_v31 = vrot.slane %v1809_v20, 3  ;;  %v1814_v33 = vrot.slane %v1812_v25, 4  ;;  %v428_v43 = vsel %vm425_vm4, %v426_v39, %v427_v40  ;;  %v533_v53 = vshrl.u32 %v3551_v17, 16  ;;  %v4728_v20 = vld [vmem:[%s4525_s25 + $0x28] sm:$0xf] }
  0x24   : > { %v536_v55 = vshll.u32 %v3551_v17, 16  ;;  %v3662_v9 = vcombine.low %v4547_v11, %v4551_v14  ;;  %v4686_v10 = vcombine.low %v4573_v23, %v524_v52  ;;  %v540_v2 = vrot.slane %v309_v45, 1  ;;  %v4701_v11 = vld [vmem:[%s5269_s1 + $0x20] sm:$0xff]   ;;  %v4383_v52 = vld [vmem:[%s4525_s25 + $0x2c] ss:$0 sps:$4 sm:$0x11]  }
  0x25   : > { %3901 = vmatmul.mubr.msk.bf16.vlgmr.msra.gmra.mrb[0].mxu1 %vm213_vm0, %v315_v13  ;;  %v1815_v41 = vor.u32 %v1814_v33, %v1811_v31  ;;  %v535_v0 = vrot.slane %v533_v53, 1  ;;  %v541_v3 = vrot.slane %v305_v44, 2  ;;  %v3663_v14 = vcombine.low %v4562_v18, %v4596_v37  ;;  %v4711_v44 = vld [vmem:[%s5269_s1 + $0x80] sm:$0xff]   ;;  %v2010_v18 = vld [vmem:[%s4525_s25 + $0x1c] sm:$0xf] }
  0x26   : > { %3904 = vmatprep.mubr.msk.bf16.mxu1 %vm213_vm0, %v323_v19  ;;  %3909 = vmatpush3.bf16.msra.mxu1 %v4534_v6  ;;  %v538_v1 = vrot.slane %v536_v55, 2  ;;  %v3672_v23 = vcombine.low %v2006_v56, %v4681_v60  ;;  %v3673_v4 = vcombine.low %v4691_v62, %v2009_v63  ;;  %v549_v7 = vshrl.u32 %v4686_v10, 16  ;;  %v4721_v13 = vld [vmem:[%s4525_s25 + $0x20] sm:$0xf]  ;;  %v4754_v55 = vld [vmem:[%s5269_s1 + $0x28] sm:$0xff]  }
  0x27   : > { %4021 = vmatmul.mubr.msk.bf16.vlgmr.msra.gmra.mrb[0].mxu0 %vm213_vm0, %v1803_v27  ;;  %3918 = vmatprep.subr.bf16.mxu1 %v4376_v26  ;;  %v1816_v6 = vsel %vm1787_vm2, %v1806_v16, %v1815_v41  ;;  %v542_v45 = vor.u32 %v541_v3, %v540_v2  ;;  %v552_v12 = vshll.u32 %v4686_v10, 16  ;;  %v4724_v16 = vld [vmem:[%s4525_s25 + $0x24] sm:$0xf]  ;;  %v544_v25 = vrot.slane %v316_v54, 1 }
  0x28   : > { %4029 = vmatpush3.bf16.msra.mxu0 %v4587_v32  ;;  %4024 = vmatprep.mubr.msk.bf16.mxu0 %vm213_vm0, %v1807_v30  ;;  %v429_v32 = vrot.slane %v4570_v22, 1  ;;  %v539_v37 = vor.u32 %v538_v1, %v535_v0  ;;  %v2041_v17 = vrot.slane %v3672_v23, 3  ;;  %v2042_v19 = vrot.slane %v3673_v4, 3  ;;  %v4764_v1 = vld [vmem:[%s5269_s1 + $0x88] sm:$0xff]  }
  0x29   : > { %4038 = vmatprep.subr.bf16.mxu0 %v4373_v36  ;;  %v3664_v27 = vcombine.low %v4599_v38, %v4631_v59  ;;  %v551_v31 = vrot.slane %v549_v7, 1  ;;  %v554_v33 = vrot.slane %v552_v12, 2  ;;  %v3674_v35 = vcombine.low %v2010_v18, %v4721_v13  ;;  %v648_v59 = vld [vmem:[%s4525_s25] sm:$0xc] }
  0x2a   : > { %v430_v61 = vsel %vm425_vm4, %v427_v40, %v429_v32  ;;  %v432_v34 = vsel %vm425_vm4, %v429_v32, %v431_v51  ;;  %v543_v30 = vsel %vm531_vm5, %v539_v37, %v542_v45  ;;  %v2043_v54 = vsel %vm1295_vm1, %v2041_v17, %v2042_v19 }
  0x2b   : > { %v555_v38 = vor.u32 %v554_v33, %v551_v31  ;;  %v2044_v39 = vrot.slane %v3674_v35, 3  ;;  %v2149_v41 = vshrl.u32 %v3672_v23, 16  ;;  %v3567_v53 = vcombine.low %v648_v59, %v4529_v5 }
  0x2c   : > { %v2166_v37 = vshrl.u32 %v3674_v35, 16 }
  0x2d   : > { %3905 = vmatmul.mubr.msk.bf16.gmra.mrb[4].mxu1 %vm213_vm0, %v326_v42  ;;  %v2152_v42 = vshll.u32 %v3672_v23, 16  ;;  %v2151_v0 = vrot.slane %v2149_v41, 3  ;;  %v2048_v23 = vrot.slane %v4383_v52, 3 }
  0x2e   : > { %3910 = vmatprep.mubr.msk.bf16.mxu1 %vm213_vm0, %v428_v43  ;;  %v2507_v43 = vld [vmem:[%s4525_s25 + $0x10] sm:$0xe] }
  0x2f   : > { %4025 = vmatmul.mubr.msk.bf16.gmra.mrb[4].mxu0 %vm213_vm0, %v1816_v6  ;;  %v2157_v6 = vshrl.u32 %v3673_v4, 16  ;;  %v3711_v56 = vcombine.low %v2507_v43, %v4691_v62  ;;  %v2154_v5 = vrot.slane %v2152_v42, 4 }
  0x30   : > { %4030 = vmatprep.mubr.msk.bf16.mxu0 %vm213_vm0, %v3661_v47  ;;  %v2160_v47 = vshll.u32 %v3673_v4, 16  ;;  %v656_v4 = vrot.slane %v3567_v53, 2  ;;  %v4390_v53 = vld [vmem:[%s5269_s1 + $0x90] sm:$0xff]  }
  0x31   : > { %v2159_v2 = vrot.slane %v2157_v6, 3  ;;  %v2155_v7 = vor.u32 %v2154_v5, %v2151_v0  ;;  %v4803_v6 = vld [vmem:[%s4525_s25 + $0xc] sm:$0xff]   ;;  %v761_v0 = vld [vmem:[%s4525_s25 + $0x20] sm:$0x7] }
  0x32   : > { %v2162_v3 = vrot.slane %v2160_v47, 4 }
  0x34   : > { %v2163_v12 = vor.u32 %v2162_v3, %v2159_v2  ;;  %v4823_v2 = vld [vmem:[%s4525_s25 + $0x14] sm:$0xff]  }
  0x35   : > { %3911 = vmatmul.mubr.msk.bf16.vlgmr.msra.gmra.mrb[0].mxu1 %vm213_vm0, %v430_v61  ;;  %v2045_v61 = vsel %vm1295_vm1, %v2042_v19, %v2044_v39 }
  0x36   : > { %3914 = vmatprep.mubr.msk.bf16.mxu1 %vm213_vm0, %v432_v34  ;;  %3919 = vmatpush3.bf16.msra.mxu1 %v4376_v26  ;;  %v545_v26 = vrot.slane %v312_v49, 2  ;;  %v2164_v31 = vsel %vm1787_vm2, %v2155_v7, %v2163_v12  ;;  %v899_v7 = vshrl.u32 %v4803_v6, 16 }
  0x37   : > { %4031 = vmatmul.mubr.msk.bf16.vlgmr.msra.gmra.mrb[0].mxu0 %vm213_vm0, %v3662_v9  ;;  %3928 = vmatprep.subr.bf16.mxu1 %v4701_v11  ;;  %v4757_v9 = vcombine.low %v2009_v63, %v2010_v18  ;;  %v657_v18 = vrot.slane %v4538_v8, 2  ;;  %v4782_v8 = vld [vmem:[%s4525_s25 + $0x2c] sm:$0x3] }
  0x38   : > { %4039 = vmatpush3.bf16.msra.mxu0 %v4373_v36  ;;  %4034 = vmatprep.mubr.msk.bf16.mxu0 %vm213_vm0, %v3663_v14  ;;  %v3675_v36 = vcombine.low %v4724_v16, %v4728_v20  ;;  %v546_v49 = vor.u32 %v545_v26, %v544_v25  ;;  %v2514_v14 = vrot.slane %v3711_v56, 1  ;;  %v2168_v26 = vrot.slane %v2166_v37, 3 }
  0x39   : > { %4048 = vmatprep.subr.bf16.mxu0 %v4711_v44  ;;  %v2515_v63 = vrot.slane %v4757_v9, 1  ;;  %v658_v25 = vsel %vm655_vm6, %v656_v4, %v657_v18 }
  0x3a   : > { %v2046_v40 = vrot.slane %v3675_v36, 3  ;;  %v547_v32 = vsel %vm531_vm5, %v542_v45, %v546_v49  ;;  %v2169_v45 = vshll.u32 %v3674_v35, 16  ;;  %v2175_v17 = vshrl.u32 %v3675_v36, 16 }
  0x3b   : > { %v2178_v19 = vshll.u32 %v3675_v36, 16  ;;  %v659_v36 = vrot.slane %v4570_v22, 2 }
  0x3c   : > { %v2047_v34 = vsel %vm1295_vm1, %v2044_v39, %v2046_v40  ;;  %v2177_v33 = vrot.slane %v2175_v17, 3 }
  0x3d   : > { %3915 = vmatmul.mubr.msk.bf16.gmra.mrb[4].mxu1 %vm213_vm0, %v431_v51  ;;  %v556_v51 = vsel %vm531_vm5, %v546_v49, %v555_v38  ;;  %v2180_v35 = vrot.slane %v2178_v19, 4  ;;  %v660_v42 = vsel %vm655_vm6, %v657_v18, %v659_v36  ;;  %v883_v18 = vld [vmem:[%s4525_s25 + $0x20] sm:$0xf] }
  0x3e   : > { %3920 = vmatprep.mubr.msk.bf16.mxu1 %vm213_vm0, %v543_v30  ;;  %v3684_v30 = vcombine.low %v4782_v8, %v4782_v8 }
  0x3f   : > { %4035 = vmatmul.mubr.msk.bf16.gmra.mrb[4].mxu0 %vm213_vm0, %v3664_v27  ;;  %v2171_v27 = vrot.slane %v2169_v45, 4  ;;  %v2181_v41 = vor.u32 %v2180_v35, %v2177_v33 }
  0x40   : > { %4040 = vmatprep.mubr.msk.bf16.mxu0 %vm213_vm0, %v2043_v54  ;;  %v661_v54 = vrot.slane %v4686_v10, 2  ;;  %v2184_v59 = vshrl.u32 %v3684_v30, 16  ;;  %v2187_v39 = vshll.u32 %v3684_v30, 16  ;;  %v4398_v10 = vld [vmem:[%s5269_s1 + $0x30] sm:$0xff]   ;;  %v4401_v30 = vld [vmem:[%s5269_s1 + $0x38] sm:$0xff]  }
  0x41   : > { %v2172_v49 = vor.u32 %v2171_v27, %v2168_v26  ;;  %v901_v26 = vrot.slane %v899_v7, 1 }
  0x42   : > { %v662_v43 = vsel %vm655_vm6, %v659_v36, %v661_v54  ;;  %v2394_v36 = vshll.u32 %v4757_v9, 16 }
  0x43   : > { %v2173_v47 = vsel %vm1787_vm2, %v2163_v12, %v2172_v49  ;;  %v2182_v52 = vsel %vm1787_vm2, %v2172_v49, %v2181_v41  ;;  %v902_v12 = vshll.u32 %v4803_v6, 16  ;;  %v908_v49 = vshrl.u32 %v4823_v2, 16 }
  0x45   : > { %3921 = vmatmul.mubr.msk.bf16.vlgmr.msra.gmra.mrb[0].mxu1 %vm213_vm0, %v547_v32  ;;  %v2186_v32 = vrot.slane %v2184_v59, 3  ;;  %v904_v27 = vrot.slane %v902_v12, 2  ;;  %v911_v59 = vshll.u32 %v4823_v2, 16 }
  0x46   : > { %3924 = vmatprep.mubr.msk.bf16.mxu1 %vm213_vm0, %v556_v51  ;;  %3929 = vmatpush3.bf16.msra.mxu1 %v4701_v11  ;;  %v4778_v11 = vsel %vm425_vm4, %v2514_v14, %v2515_v63  ;;  %v2189_v51 = vrot.slane %v2187_v39, 4  ;;  %v2381_v39 = vld [vmem:[%s4525_s25 + $0x2c] sm:$0x7] }
  0x47   : > { %4041 = vmatmul.mubr.msk.bf16.vlgmr.msra.gmra.mrb[0].mxu0 %vm213_vm0, %v2045_v61  ;;  %3938 = vmatprep.subr.bf16.mxu1 %v4754_v55  ;;  %v786_v61 = vrot.slane %v4803_v6, 1 }
  0x48   : > { %4049 = vmatpush3.bf16.msra.mxu0 %v4711_v44  ;;  %4044 = vmatprep.mubr.msk.bf16.mxu0 %vm213_vm0, %v2047_v34  ;;  %v2049_v44 = vsel %vm1295_vm1, %v2046_v40, %v2048_v23  ;;  %v754_v40 = vld [vmem:[%s4525_s25 + $0x4] sm:$0xe]  ;;  %v760_v34 = vld [vmem:[%s4525_s25 + $0x1c] sm:$0xf]  ;;  %v2190_v5 = vor.u32 %v2189_v51, %v2186_v32  ;;  %v3692_v23 = vcombine.low %v4681_v60, %v4691_v62  ;;  %v913_v32 = vrot.slane %v911_v59, 2 }
  0x49   : > { %4058 = vmatprep.subr.bf16.mxu0 %v4764_v1  ;;  %v3578_v3 = vcombine.low %v760_v34, %v761_v0  ;;  %v4839_v19 = vcombine.low %v760_v34, %v883_v18  ;;  %v4920_v59 = vld [vmem:[%s4525_s25 + $0x18] sm:$0xf] }
  0x4a   : > { %v2191_v14 = vsel %vm1787_vm2, %v2181_v41, %v2190_v5  ;;  %v2390_v17 = vshll.u32 %v3692_v23, 16  ;;  %v2388_v33 = vshrl.u32 %v3692_v23, 16 }
  0x4b   : > { %v790_v4 = vrot.slane %v3578_v3, 1  ;;  %v920_v41 = vshll.u32 %v4839_v19, 16 }
  0x4c   : > { %v2392_v35 = vrot.slane %v2390_v17, 1  ;;  %v4403_v17 = vld [vmem:[%s5269_s1 + $0xa0] sm:$0xff]  }
  0x4d   : > { %3925 = vmatmul.mubr.msk.bf16.gmra.mrb[4].mxu1 %vm213_vm0, %v555_v38  ;;  %v4797_v38 = vld [vmem:[%s4525_s25 + $0x8] sm:$0xf] }
  0x4e   : > { %3930 = vmatprep.mubr.msk.bf16.mxu1 %vm213_vm0, %v658_v25  ;;  %v3575_v22 = vcombine.low %v754_v40, %v4797_v38  ;;  %v917_v40 = vshrl.u32 %v4839_v19, 16 }
  0x4f   : > { %4045 = vmatmul.mubr.msk.bf16.gmra.mrb[4].mxu0 %vm213_vm0, %v2049_v44 }
  0x50   : > { %4050 = vmatprep.mubr.msk.bf16.mxu0 %vm213_vm0, %v2164_v31  ;;  %v785_v56 = vrot.slane %v3575_v22, 1  ;;  %v891_v37 = vshrl.u32 %v3575_v22, 16  ;;  %v894_v45 = vshll.u32 %v3575_v22, 16  ;;  %v4846_v31 = vcombine.low %v4721_v13, %v4724_v16 }
  0x51   : > { %v905_v16 = vor.u32 %v904_v27, %v901_v26  ;;  %v4864_v22 = vcombine.low %v4728_v20, %v2381_v39  ;;  %v4901_v26 = vld [vmem:[%s4525_s25 + $0xc] sm:$0xf]  ;;  %v4904_v27 = vld [vmem:[%s4525_s25 + $0x10] sm:$0xf]  ;;  %v4923_v39 = vld [vmem:[%s4525_s25 + $0x1c] sm:$0xf] }
  0x52   : > { %v893_v25 = vrot.slane %v891_v37, 1  ;;  %v896_v44 = vrot.slane %v894_v45, 2  ;;  %v2405_v0 = vshrl.u32 %v4846_v31, 16  ;;  %v4405_v45 = vld [vmem:[%s5269_s1 + $0x40] sm:$0xff]  }
  0x53   : > { %v2409_v5 = vshll.u32 %v4864_v22, 16 }
  0x54   : > { %v897_v13 = vor.u32 %v896_v44, %v893_v25  ;;  %v1121_v25 = vld [vmem:[%s4525_s25 + $0x4] sm:$0xc]  ;;  %v4898_v44 = vld [vmem:[%s4525_s25 + $0x8] sm:$0xf] }
  0x55   : > { %3931 = vmatmul.mubr.msk.bf16.vlgmr.msra.gmra.mrb[0].mxu1 %vm213_vm0, %v660_v42  ;;  %v2393_v42 = vor.u32 %v2392_v35, %v2388_v33  ;;  %v4910_v35 = vcombine.low %v4901_v26, %v4904_v27 }
  0x56   : > { %3934 = vmatprep.mubr.msk.bf16.mxu1 %vm213_vm0, %v662_v43  ;;  %3939 = vmatpush3.bf16.msra.mxu1 %v4754_v55  ;;  %v787_v55 = vsel %vm425_vm4, %v785_v56, %v786_v61  ;;  %v2396_v43 = vrot.slane %v2394_v36, 1  ;;  %v906_v51 = vsel %vm531_vm5, %v897_v13, %v905_v16  ;;  %v922_v56 = vrot.slane %v920_v41, 2  ;;  %v4914_v36 = vld [vmem:[%s4525_s25 + $0x14] sm:$0xf] }
  0x57   : > { %4051 = vmatmul.mubr.msk.bf16.vlgmr.msra.gmra.mrb[0].mxu0 %vm213_vm0, %v2173_v47  ;;  %3948 = vmatprep.subr.bf16.mxu1 %v4398_v10  ;;  %v910_v47 = vrot.slane %v908_v49, 1  ;;  %v1028_v49 = vrot.slane %v4839_v19, 2  ;;  %v1169_v41 = vshll.u32 %v4910_v35, 16  ;;  %v2519_v19 = vrot.slane %v4864_v22, 1 }
  0x58   : > { %4059 = vmatpush3.bf16.msra.mxu0 %v4764_v1  ;;  %4054 = vmatprep.mubr.msk.bf16.mxu0 %vm213_vm0, %v2182_v52  ;;  %v788_v1 = vrot.slane %v4823_v2, 1  ;;  %v2401_v52 = vshll.u32 %v4846_v31, 16  ;;  %v2397_v34 = vsel %vm298_vm3, %v2393_v42, %v2396_v43  ;;  %v4929_v42 = vld [vmem:[%s4525_s25 + $0x20] sm:$0xf] }
  0x59   : > { %4068 = vmatprep.subr.bf16.mxu0 %v4390_v53 }
  0x5a   : > { %v789_v60 = vsel %vm425_vm4, %v786_v61, %v788_v1  ;;  %v791_v62 = vsel %vm425_vm4, %v788_v1, %v790_v4  ;;  %v2398_v61 = vshrl.u32 %v4757_v9, 16  ;;  %v2411_v1 = vrot.slane %v2409_v5, 1 }
  0x5d   : > { %3935 = vmatmul.mubr.msk.bf16.gmra.mrb[4].mxu1 %vm213_vm0, %v661_v54  ;;  %v4399_v54 = vld [vmem:[%s5269_s1 + $0x98] sm:$0xff]  }
  0x5e   : > { %3940 = vmatprep.mubr.msk.bf16.mxu1 %vm213_vm0, %v787_v55  ;;  %v2400_v55 = vor.u32 %v2398_v61, %v2396_v43  ;;  %v4408_v61 = vld [vmem:[%s5269_s1 + $0xa8] sm:$0xff]  }
  0x5f   : > { %4055 = vmatmul.mubr.msk.bf16.gmra.mrb[4].mxu0 %vm213_vm0, %v2191_v14  ;;  %v1016_v14 = vld [vmem:[%s4525_s25 + $0x4] sm:$0xc] }
  0x60   : > { %4060 = vmatprep.mubr.msk.bf16.mxu0 %vm213_vm0, %v3692_v23  ;;  %v3594_v37 = vcombine.low %v1016_v14, %v4797_v38  ;;  %v2413_v38 = vshrl.u32 %v4864_v22, 16 }
  0x65   : > { %3941 = vmatmul.mubr.msk.bf16.vlgmr.msra.gmra.mrb[0].mxu1 %vm213_vm0, %v789_v60  ;;  %v1023_v60 = vrot.slane %v3594_v37, 2 }
  0x66   : > { %3944 = vmatprep.mubr.msk.bf16.mxu1 %vm213_vm0, %v791_v62  ;;  %3949 = vmatpush3.bf16.msra.mxu1 %v4398_v10  ;;  %v3695_v10 = vcombine.low %v4728_v20, %v4782_v8  ;;  %v914_v20 = vor.u32 %v913_v32, %v910_v47  ;;  %v2403_v8 = vrot.slane %v2401_v52, 1  ;;  %v1024_v62 = vrot.slane %v4803_v6, 2 }
  0x67   : > { %4061 = vmatmul.mubr.msk.bf16.vlgmr.msra.gmra.mrb[0].mxu0 %vm213_vm0, %v4757_v9  ;;  %3958 = vmatprep.subr.bf16.mxu1 %v4401_v30  ;;  %v3602_v6 = vcombine.low %v1121_v25, %v4898_v44  ;;  %v4939_v47 = vcombine.low %v4914_v36, %v4920_v59  ;;  %v4943_v32 = vcombine.low %v4923_v39, %v4929_v42 }
  0x68   : > { %4069 = vmatpush3.bf16.msra.mxu0 %v4390_v53  ;;  %4064 = vmatprep.mubr.msk.bf16.mxu0 %vm213_vm0, %v4846_v31  ;;  %v919_v53 = vrot.slane %v917_v40, 1  ;;  %v2407_v23 = vor.u32 %v2405_v0, %v2403_v8  ;;  %v2404_v7 = vsel %vm298_vm3, %v2400_v55, %v2403_v8  ;;  %v1025_v33 = vsel %vm655_vm6, %v1023_v60, %v1024_v62  ;;  %v2612_v8 = vld [vmem:[%s4525_s25 + $0x14] sm:$0xf] }
  0x69   : > { %4078 = vmatprep.subr.bf16.mxu0 %v4399_v54  ;;  %v1158_v13 = vshrl.u32 %v3602_v6, 16  ;;  %v1166_v40 = vshrl.u32 %v4910_v35, 16  ;;  %v1178_v0 = vshll.u32 %v4939_v47, 16  ;;  %v1184_v5 = vshrl.u32 %v4943_v32, 16 }
  0x6a   : > { %v923_v3 = vor.u32 %v922_v56, %v919_v53  ;;  %v2412_v12 = vsel %vm298_vm3, %v2407_v23, %v2411_v1 }
  0x6b   : > { %v1168_v53 = vrot.slane %v1166_v40, 2  ;;  %v1180_v14 = vrot.slane %v1178_v0, 3  ;;  %v1299_v0 = vrot.slane %v4939_v47, 3 }
  0x6c   : > { %v924_v18 = vsel %vm531_vm5, %v914_v20, %v923_v3 }
  0x6d   : > { %3945 = vmatmul.mubr.msk.bf16.gmra.mrb[4].mxu1 %vm213_vm0, %v790_v4  ;;  %v915_v4 = vsel %vm531_vm5, %v905_v16, %v914_v20  ;;  %v1161_v16 = vshll.u32 %v3602_v6, 16  ;;  %v1187_v20 = vshll.u32 %v4943_v32, 16  ;;  %v4988_v6 = vld [vmem:[%s4525_s25 + $0x24] sm:$0xff]  }
  0x6e   : > { %3950 = vmatprep.mubr.msk.bf16.mxu1 %vm213_vm0, %v906_v51  ;;  %v1160_v51 = vrot.slane %v1158_v13, 2 }
  0x6f   : > { %4065 = vmatmul.mubr.msk.bf16.gmra.mrb[4].mxu0 %vm213_vm0, %v3695_v10  ;;  %v1163_v52 = vrot.slane %v1161_v16, 3  ;;  %v4420_v16 = vld [vmem:[%s5269_s1 + $0xb0] sm:$0xff]  }
  0x70   : > { %4070 = vmatprep.mubr.msk.bf16.mxu0 %vm213_vm0, %v2397_v34  ;;  %v1175_v34 = vshrl.u32 %v4939_v47, 16 }
  0x71   : > { %v1164_v9 = vor.u32 %v1163_v52, %v1160_v51 }
  0x72   : > { %v1177_v55 = vrot.slane %v1175_v34, 2 }
  0x74   : > { %v1181_v37 = vor.u32 %v1180_v14, %v1177_v55  ;;  %v2860_v14 = vld [vmem:[%s4525_s25 + $0x14] sm:$0xe] }
  0x75   : > { %3951 = vmatmul.mubr.msk.bf16.vlgmr.msra.gmra.mrb[0].mxu1 %vm213_vm0, %v915_v4  ;;  %v1189_v4 = vrot.slane %v1187_v20, 3  ;;  %v1396_v20 = vld [vmem:[%s4525_s25 + $0x8] sm:$0xc] }
  0x76   : > { %3954 = vmatprep.mubr.msk.bf16.mxu1 %vm213_vm0, %v924_v18  ;;  %3959 = vmatpush3.bf16.msra.mxu1 %v4401_v30  ;;  %v2415_v30 = vor.u32 %v2413_v38, %v2411_v1  ;;  %v1186_v1 = vrot.slane %v1184_v5, 2 }
  0x77   : > { %4071 = vmatmul.mubr.msk.bf16.vlgmr.msra.gmra.mrb[0].mxu0 %vm213_vm0, %v2404_v7  ;;  %3968 = vmatprep.subr.bf16.mxu1 %v4405_v45 }
  0x78   : > { %4079 = vmatpush3.bf16.msra.mxu0 %v4399_v54  ;;  %4074 = vmatprep.mubr.msk.bf16.mxu0 %vm213_vm0, %v2412_v12  ;;  %v1026_v54 = vrot.slane %v4823_v2, 2  ;;  %v2517_v2 = vrot.slane %v4846_v31, 1  ;;  %v4419_v31 = vld [vmem:[%s5269_s1 + $0x48] sm:$0xff]   ;;  %v1190_v7 = vor.u32 %v1189_v4, %v1186_v1  ;;  %v1288_v12 = vld [vmem:[%s4525_s25 + $0x4] sm:$0x8]  ;;  %v3622_v1 = vcombine.low %v1396_v20, %v4901_v26  ;;  %v4428_v4 = vld [vmem:[%s5269_s1 + $0x58] sm:$0xff]  }
  0x79   : > { %4088 = vmatprep.subr.bf16.mxu0 %v4403_v17  ;;  %v4423_v26 = vld [vmem:[%s5269_s1 + $0xb8] sm:$0xff]  }
  0x7a   : > { %v1027_v43 = vsel %vm655_vm6, %v1024_v62, %v1026_v54  ;;  %v1029_v10 = vsel %vm655_vm6, %v1026_v54, %v1028_v49  ;;  %v2518_v22 = vsel %vm425_vm4, %v2515_v63, %v2517_v2  ;;  %v2520_v56 = vsel %vm425_vm4, %v2517_v2, %v2519_v19  ;;  %v4980_v62 = vld [vmem:[%s4525_s25 + $0x1c] sm:$0xff]  }
  0x7b   : > { %v1191_v25 = vsel %vm1156_vm7, %v1181_v37, %v1190_v7  ;;  %v2747_v13 = vshll.u32 %v4980_v62, 16  ;;  %v1297_v2 = vrot.slane %v4910_v35, 3 }
  0x7d   : > { %3955 = vmatmul.mubr.msk.bf16.gmra.mrb[4].mxu1 %vm213_vm0, %v923_v3  ;;  %v4965_v3 = vld [vmem:[%s4525_s25 + $0x18] sm:$0xf]  ;;  %v2749_v52 = vrot.slane %v2747_v13, 1  ;;  %v1300_v47 = vsel %vm1295_vm1, %v1297_v2, %v1299_v0 }
  0x7e   : > { %3960 = vmatprep.mubr.msk.bf16.mxu1 %vm213_vm0, %v1025_v33  ;;  %v3719_v18 = vcombine.low %v2612_v8, %v4965_v3  ;;  %v4422_v33 = vld [vmem:[%s5269_s1 + $0x50] sm:$0xff]  }
  0x7f   : > { %4075 = vmatmul.mubr.msk.bf16.gmra.mrb[4].mxu0 %vm213_vm0, %v2415_v30  ;;  %v3614_v30 = vcombine.low %v1288_v12, %v4898_v44  ;;  %v2734_v44 = vld [vmem:[%s4525_s25 + $0x30] sm:$0x7]  ;;  %v1409_v12 = vrot.slane %v3622_v1, 2 }
  0x80   : > { %4080 = vmatprep.mubr.msk.bf16.mxu0 %vm213_vm0, %v4778_v11  ;;  %v1171_v11 = vrot.slane %v1169_v41, 3  ;;  %v2741_v54 = vshrl.u32 %v3719_v18, 16 }
  0x81   : > { %v1296_v41 = vrot.slane %v3614_v30, 3  ;;  %v2868_v30 = vrot.slane %v4980_v62, 1 }
  0x82   : > { %v1172_v63 = vor.u32 %v1171_v11, %v1168_v53 }
  0x83   : > { %v1298_v11 = vsel %vm1295_vm1, %v1296_v41, %v1297_v2 }
  0x84   : > { %v1173_v23 = vsel %vm1156_vm7, %v1164_v9, %v1172_v63  ;;  %v1182_v38 = vsel %vm1156_vm7, %v1172_v63, %v1181_v37  ;;  %v1301_v63 = vrot.slane %v4943_v32, 3  ;;  %v3623_v32 = vcombine.low %v4904_v27, %v4914_v36 }
  0x85   : > { %3961 = vmatmul.mubr.msk.bf16.vlgmr.msra.gmra.mrb[0].mxu1 %vm213_vm0, %v1027_v43  ;;  %v2619_v43 = vld [vmem:[%s4525_s25 + $0x30] sm:$0x3]  ;;  %v3738_v37 = vcombine.low %v2860_v14, %v4965_v3  ;;  %v2981_v14 = vrot.slane %v2747_v13, 2 }
  0x86   : > { %3964 = vmatprep.mubr.msk.bf16.mxu1 %vm213_vm0, %v1029_v10  ;;  %3969 = vmatpush3.bf16.msra.mxu1 %v4405_v45  ;;  %v4972_v45 = vld [vmem:[%s4525_s25 + $0x24] ss:$0 sps:$4 sm:$0x11]  }
  0x87   : > { %4081 = vmatmul.mubr.msk.bf16.vlgmr.msra.gmra.mrb[0].mxu0 %vm213_vm0, %v2518_v22  ;;  %3978 = vmatprep.subr.bf16.mxu1 %v4419_v31  ;;  %v1193_v60 = vshll.u32 %v4972_v45, 16  ;;  %v2751_v22 = vshrl.u32 %v4980_v62, 16  ;;  %v1303_v27 = vrot.slane %v4972_v45, 3 }
  0x88   : > { %4089 = vmatpush3.bf16.msra.mxu0 %v4403_v17  ;;  %4084 = vmatprep.mubr.msk.bf16.mxu0 %vm213_vm0, %v2520_v56  ;;  %v2743_v17 = vshll.u32 %v3719_v18, 16 }
  0x89   : > { %4098 = vmatprep.subr.bf16.mxu0 %v4408_v61  ;;  %v1195_v40 = vrot.slane %v1193_v60, 3  ;;  %v2753_v5 = vor.u32 %v2751_v22, %v2749_v52  ;;  %v1507_v60 = vld [vmem:[%s4525_s25 + $0x8] sm:$0xc]  ;;  %v1304_v45 = vsel %vm1295_vm1, %v1301_v63, %v1303_v27 }
  0x8b   : > { %v1196_v53 = vsel %vm1156_vm7, %v1190_v7, %v1195_v40 }
  0x8d   : > { %3965 = vmatmul.mubr.msk.bf16.gmra.mrb[4].mxu1 %vm213_vm0, %v1028_v49  ;;  %v2745_v49 = vrot.slane %v2743_v17, 1  ;;  %v1410_v17 = vrot.slane %v3623_v32, 2  ;;  %v1562_v32 = vrot.slane %v1560_v46, 2 }
  0x8e   : > { %3970 = vmatprep.mubr.msk.bf16.mxu1 %vm213_vm0, %v1173_v23  ;;  %v1302_v23 = vsel %vm1295_vm1, %v1299_v0, %v1301_v63  ;;  %v1556_v63 = vrot.slane %v1554_v28, 3 }
  0x8f   : > { %4085 = vmatmul.mubr.msk.bf16.gmra.mrb[4].mxu0 %vm213_vm0, %v2519_v19  ;;  %v5003_v19 = vld [vmem:[%s4525_s25 + $0x2c] sm:$0xf]  ;;  %v2746_v51 = vor.u32 %v2745_v49, %v2741_v54  ;;  %v1411_v49 = vsel %vm655_vm6, %v1409_v12, %v1410_v17 }
  0x90   : > { %4090 = vmatprep.mubr.msk.bf16.mxu0 %vm213_vm0, %v3719_v18  ;;  %v5007_v10 = vcombine.low %v5003_v19, %v2734_v44  ;;  %v3722_v35 = vcombine.low %v5003_v19, %v2619_v43 }
  0x91   : > { %v2750_v56 = vsel %vm298_vm3, %v2746_v51, %v2749_v52  ;;  %v2965_v52 = vld [vmem:[%s4525_s25 + $0x30] sm:$0xf] }
  0x92   : > { %v2762_v34 = vshll.u32 %v5007_v10, 16  ;;  %v2766_v36 = vshrl.u32 %v5007_v10, 16 }
  0x94   : > { %v2764_v55 = vrot.slane %v2762_v34, 1 }
  0x95   : > { %3971 = vmatmul.mubr.msk.bf16.vlgmr.msra.gmra.mrb[0].mxu1 %vm213_vm0, %v1182_v38  ;;  %v1397_v38 = vld [vmem:[%s4525_s25 + $0x24] sm:$0xf] }
  0x96   : > { %3974 = vmatprep.mubr.msk.bf16.mxu1 %vm213_vm0, %v1191_v25  ;;  %3979 = vmatpush3.bf16.msra.mxu1 %v4419_v31  ;;  %v2754_v31 = vshll.u32 %v4988_v6, 16  ;;  %v2867_v25 = vrot.slane %v3738_v37, 1  ;;  %v2768_v54 = vor.u32 %v2766_v36, %v2764_v55  ;;  %v3625_v44 = vcombine.low %v4929_v42, %v1397_v38 }
  0x97   : > { %4091 = vmatmul.mubr.msk.bf16.vlgmr.msra.gmra.mrb[0].mxu0 %vm213_vm0, %v4980_v62  ;;  %3988 = vmatprep.subr.bf16.mxu1 %v4422_v33  ;;  %v2872_v42 = vrot.slane %v5007_v10, 1 }
  0x98   : > { %4099 = vmatpush3.bf16.msra.mxu0 %v4408_v61  ;;  %4094 = vmatprep.mubr.msk.bf16.mxu0 %vm213_vm0, %v4988_v6  ;;  %v2758_v61 = vshrl.u32 %v4988_v6, 16  ;;  %v2756_v9 = vrot.slane %v2754_v31, 1  ;;  %v2869_v41 = vsel %vm425_vm4, %v2867_v25, %v2868_v30  ;;  %v1414_v43 = vrot.slane %v3625_v44, 2 }
  0x99   : > { %4108 = vmatprep.subr.bf16.mxu0 %v4420_v16  ;;  %v2985_v27 = vrot.slane %v2754_v31, 2 }
  0x9a   : > { %v2760_v8 = vor.u32 %v2758_v61, %v2756_v9  ;;  %v2757_v18 = vsel %vm298_vm3, %v2753_v5, %v2756_v9  ;;  %v5077_v5 = vcombine.low %v5003_v19, %v2965_v52 }
  0x9c   : > { %v2765_v7 = vsel %vm298_vm3, %v2760_v8, %v2764_v55  ;;  %v2992_v1 = vshll.u32 %v5077_v5, 16 }
  0x9d   : > { %3975 = vmatmul.mubr.msk.bf16.gmra.mrb[4].mxu1 %vm213_vm0, %v1196_v53  ;;  %v2973_v53 = vshrl.u32 %v3738_v37, 16 }
  0x9e   : > { %3980 = vmatprep.mubr.msk.bf16.mxu1 %vm213_vm0, %v1298_v11  ;;  %v2994_v36 = vrot.slane %v2992_v1, 2 }
  0x9f   : > { %4095 = vmatmul.mubr.msk.bf16.gmra.mrb[4].mxu0 %vm213_vm0, %v3722_v35  ;;  %v2976_v35 = vshll.u32 %v3738_v37, 16  ;;  %v2975_v8 = vrot.slane %v2973_v53, 1  ;;  %v1571_v37 = vrot.slane %v1569_v57, 2  ;;  %v4431_v57 = vld [vmem:[%s4525_s25 + $0x28] ss:$0 sps:$4 sm:$0x11]  }
  0xa0   : > { %4100 = vmatprep.mubr.msk.bf16.mxu0 %vm213_vm0, %v2750_v56  ;;  %v1553_v56 = vrot.slane %v1551_v24, 2  ;;  %v2980_v24 = vrot.slane %v2751_v22, 1  ;;  %v1578_v31 = vshll.u32 %v4431_v57, 16 }
  0xa1   : > { %v2978_v55 = vrot.slane %v2976_v35, 2 }
  0xa2   : > { %v1557_v19 = vor.u32 %v1556_v63, %v1553_v56  ;;  %v2982_v22 = vor.u32 %v2981_v14, %v2980_v24 }
  0xa3   : > { %v2979_v13 = vor.u32 %v2978_v55, %v2975_v8 }
  0xa5   : > { %3981 = vmatmul.mubr.msk.bf16.vlgmr.msra.gmra.mrb[0].mxu1 %vm213_vm0, %v1300_v47  ;;  %v4466_v47 = vld [vmem:[%s5269_s1 + $0x60] sm:$0xff]   ;;  %v2983_v46 = vsel %vm531_vm5, %v2979_v13, %v2982_v22 }
  0xa6   : > { %3984 = vmatprep.mubr.msk.bf16.mxu1 %vm213_vm0, %v1302_v23  ;;  %3989 = vmatpush3.bf16.msra.mxu1 %v4422_v33  ;;  %v3624_v33 = vcombine.low %v4920_v59, %v4923_v39  ;;  %v2870_v39 = vrot.slane %v4988_v6, 1  ;;  %v2989_v23 = vshrl.u32 %v5077_v5, 16 }
  0xa7   : > { %4101 = vmatmul.mubr.msk.bf16.vlgmr.msra.gmra.mrb[0].mxu0 %vm213_vm0, %v2757_v18  ;;  %3998 = vmatprep.subr.bf16.mxu1 %v4428_v4 }
  0xa8   : > { %4109 = vmatpush3.bf16.msra.mxu0 %v4420_v16  ;;  %4104 = vmatprep.mubr.msk.bf16.mxu0 %vm213_vm0, %v2765_v7  ;;  %v4465_v16 = vld [vmem:[%s4525_s25 + $0xc] sm:$0xf]  ;;  %v1412_v2 = vrot.slane %v3624_v33, 2  ;;  %v2871_v10 = vsel %vm425_vm4, %v2868_v30, %v2870_v39  ;;  %v2873_v20 = vsel %vm425_vm4, %v2870_v39, %v2872_v42  ;;  %v1574_v7 = vrot.slane %v1572_v58, 3 }
  0xa9   : > { %4118 = vmatprep.subr.bf16.mxu0 %v4423_v26  ;;  %v3633_v40 = vcombine.low %v1507_v60, %v4465_v16  ;;  %v3088_v60 = vld [vmem:[%s4525_s25 + $0x14] sm:$0xc]  ;;  %v3096_v16 = vrot.slane %v4980_v62, 2  ;;  %v3100_v62 = vrot.slane %v5077_v5, 2 }
  0xaa   : > { %v1413_v11 = vsel %vm655_vm6, %v1410_v17, %v1412_v2  ;;  %v1415_v34 = vsel %vm655_vm6, %v1412_v2, %v1414_v43  ;;  %v1575_v58 = vor.u32 %v1574_v7, %v1571_v37  ;;  %v3754_v33 = vcombine.low %v3088_v60, %v4965_v3 }
  0xab   : > { %v1543_v51 = vshrl.u32 %v3633_v40, 16  ;;  %v1546_v59 = vshll.u32 %v3633_v40, 16  ;;  %v1687_v2 = vrot.slane %v4431_v57, 3 }
  0xac   : > { %v3095_v44 = vrot.slane %v3754_v33, 2 }
  0xad   : > { %3985 = vmatmul.mubr.msk.bf16.gmra.mrb[4].mxu1 %vm213_vm0, %v1304_v45  ;;  %v1545_v0 = vrot.slane %v1543_v51, 2  ;;  %v1548_v9 = vrot.slane %v1546_v59, 3 }
  0xae   : > { %3990 = vmatprep.mubr.msk.bf16.mxu1 %vm213_vm0, %v1411_v49  ;;  %v1685_v49 = vrot.slane %v4615_v50, 3  ;;  %v3098_v50 = vrot.slane %v4988_v6, 2 }
  0xaf   : > { %4105 = vmatmul.mubr.msk.bf16.gmra.mrb[4].mxu0 %vm213_vm0, %v2768_v54  ;;  %v1549_v28 = vor.u32 %v1548_v9, %v1545_v0  ;;  %v1580_v54 = vrot.slane %v1578_v31, 3 }
  0xb0   : > { %4110 = vmatprep.mubr.msk.bf16.mxu0 %vm213_vm0, %v2869_v41  ;;  %v1686_v3 = vsel %vm1295_vm1, %v1683_v29, %v1685_v49  ;;  %v3097_v41 = vsel %vm655_vm6, %v3095_v44, %v3096_v16  ;;  %v3101_v21 = vsel %vm655_vm6, %v3098_v50, %v3100_v62  ;;  %v1688_v29 = vsel %vm1295_vm1, %v1685_v49, %v1687_v2 }
  0xb1   : > { %v1558_v18 = vsel %vm1156_vm7, %v1549_v28, %v1557_v19  ;;  %v1581_v40 = vsel %vm1156_vm7, %v1575_v58, %v1580_v54 }
  0xb5   : > { %3991 = vmatmul.mubr.msk.bf16.vlgmr.msra.gmra.mrb[0].mxu1 %vm213_vm0, %v1413_v11 }
  0xb6   : > { %3994 = vmatprep.mubr.msk.bf16.mxu1 %vm213_vm0, %v1415_v34  ;;  %3999 = vmatpush3.bf16.msra.mxu1 %v4428_v4  ;;  %v1565_v4 = vrot.slane %v1563_v48, 3  ;;  %v2991_v48 = vrot.slane %v2989_v23, 1 }
  0xb7   : > { %4111 = vmatmul.mubr.msk.bf16.vlgmr.msra.gmra.mrb[0].mxu0 %vm213_vm0, %v2871_v10  ;;  %4138 = vmatprep.subr.bf16.mxu1 %v4466_v47 }
  0xb8   : > { %4119 = vmatpush3.bf16.msra.mxu0 %v4423_v26  ;;  %4114 = vmatprep.mubr.msk.bf16.mxu0 %vm213_vm0, %v2873_v20  ;;  %v2984_v26 = vrot.slane %v2758_v61, 1  ;;  %v1566_v12 = vor.u32 %v1565_v4, %v1562_v32  ;;  %v2995_v17 = vor.u32 %v2994_v36, %v2991_v48 }
  0xb9   : > { %4128 = vmatprep.subr.bf16.mxu0 %v4429_v15 }
  0xba   : > { %v2986_v61 = vor.u32 %v2985_v27, %v2984_v26  ;;  %v1567_v38 = vsel %vm1156_vm7, %v1557_v19, %v1566_v12  ;;  %v1576_v25 = vsel %vm1156_vm7, %v1566_v12, %v1575_v58 }
  0xbc   : > { %v2987_v30 = vsel %vm531_vm5, %v2982_v22, %v2986_v61  ;;  %v2996_v45 = vsel %vm531_vm5, %v2986_v61, %v2995_v17 }
  0xbd   : > { %3995 = vmatmul.mubr.msk.bf16.gmra.mrb[4].mxu1 %vm213_vm0, %v1414_v43  ;;  %v3099_v43 = vsel %vm655_vm6, %v3096_v16, %v3098_v50 }
  0xbe   : > { %4000 = vmatprep.mubr.msk.bf16.mxu1 %vm213_vm0, %v1558_v18 }
  0xbf   : > { %4115 = vmatmul.mubr.msk.bf16.gmra.mrb[4].mxu0 %vm213_vm0, %v2872_v42  ;;  %v3531_v42 = vld [vmem:[%s5270_s2] ss:$0 sm:$0xff] }
  0xc0   : > { %4120 = vmatprep.mubr.msk.bf16.mxu0 %vm213_vm0, %v2983_v46 }
  0xc5   : > { %4001 = vmatmul.mubr.msk.bf16.vlgmr.msra.gmra.mrb[0].mxu1 %vm213_vm0, %v1567_v38 }
  0xc6   : > { %4004 = vmatprep.mubr.msk.bf16.mxu1 %vm213_vm0, %v1576_v25  ;;  %4139 = vmatpush3.bf16.msra.mxu1 %v4466_v47 }
  0xc7   : > { %4121 = vmatmul.mubr.msk.bf16.vlgmr.msra.gmra.mrb[0].mxu0 %vm213_vm0, %v2987_v30 }
  0xc8   : > { %4129 = vmatpush3.bf16.msra.mxu0 %v4429_v15  ;;  %4124 = vmatprep.mubr.msk.bf16.mxu0 %vm213_vm0, %v2996_v45 }
  0xcd   : > { %4005 = vmatmul.mubr.msk.bf16.gmra.mrb[4].mxu1 %vm213_vm0, %v1581_v40 }
  0xce   : > { %4014 = vmatprep.mubr.msk.bf16.mxu1 %vm213_vm0, %v1686_v3 }
  0xcf   : > { %4125 = vmatmul.mubr.msk.bf16.gmra.mrb[4].mxu0 %vm213_vm0, %v2995_v17 }
  0xd0   : > { %4130 = vmatprep.mubr.msk.bf16.mxu0 %vm213_vm0, %v3097_v41 }
  0xd7   : > { %4131 = vmatmul.mubr.msk.bf16.vlgmr.msra.gmra.mrb[0].mxu0 %vm213_vm0, %v3099_v43 }
  0xd8   : > { %4134 = vmatprep.mubr.msk.bf16.mxu0 %vm213_vm0, %v3101_v21 }
  0xd9   : > { %4015 = vmatmul.mubr.msk.bf16.vlgmr.msra.gmra.mrb[4].mxu1 %vm213_vm0, %v1688_v29 }
  0xdf   : > { %4135 = vmatmul.mubr.msk.bf16.gmra.mrb[4].mxu0 %vm213_vm0, %v3100_v62 }
 0x198   : > { %v4002_v51 = vpop.f32.mrb[0].mxu1 }
 0x199   : > { %v1634_v59 = vpop.f32.mrb[1].mxu1  ;;  %v4140_v52 = vadd.f32 %v4002_v51, %v3531_v42 }
 0x19a   : > { %v4003_v6 = vpop.f32.mrb[2].mxu1  ;;  %v4142_v53 = vadd.f32 %v3531_v42, %v1634_v59 }
 0x19b   : > { %v1637_v39 = vpop.f32.mrb[3].mxu1  ;;  %v4144_v11 = vadd.f32 %v4003_v6, %v3531_v42 }
 0x19c   : > { %v4146_v0 = vadd.f32 %v3531_v42, %v1637_v39 }
 0x1aa   : > { %v4132_v35 = vpop.f32.mrb[0].mxu0 }
 0x1ab   : > { %v4141_v56 = vadd.f32 %v4140_v52, %v4132_v35  ;;  %v3154_v34 = vpop.f32.mrb[1].mxu0 }
 0x1ac   : > { %v4143_v9 = vadd.f32 %v4142_v53, %v3154_v34  ;;  %v4133_v63 = vpop.f32.mrb[2].mxu0  ;;  %v4016_v5 = vpop.f32.mrb[4].mxu1 }
 0x1ad   : > { %v5149_v10 = vmax.f32 %v4141_v56, 0.0  ;;  %v4145_v20 = vadd.f32 %v4144_v11, %v4133_v63  ;;  %v3157_v8 = vpop.f32.mrb[3].mxu0  ;;  %v1757_v55 = vpop.f32.mrb[5].mxu1  ;;  %v4148_v19 = vadd.f32 %v4016_v5, %v3531_v42 }
 0x1ae   : > { %v4147_v24 = vadd.f32 %v4146_v0, %v3157_v8  ;;  %v4017_v14 = vpop.f32.mrb[6].mxu1  ;;  %v5155_v28 = vmax.f32 %v4143_v9, 0.0  ;;  %v4150_v13 = vadd.f32 %v3531_v42, %v1757_v55 }
 0x1af   : > { %v5153_v15 = vmul.f32 %v5149_v10, %v5149_v10  ;;  %v1760_v47 = vpop.f32.mrb[7].mxu1  ;;  %v4152_v22 = vadd.f32 %v4017_v14, %v3531_v42  ;;  %v5169_v48 = vmax.f32 %v4145_v20, 0.0 }
 0x1b0   : > { %v4154_v23 = vadd.f32 %v3531_v42, %v1760_v47  ;;  %v5163_v32 = vmul.f32 %v5155_v28, %v5155_v28  ;;  %v5183_v12 = vmax.f32 %v4147_v24, 0.0 }
 0x1b1   : > { %3261 = vrot.lane.b32.xlu1 %v5153_v15, %s4475_s22  ;;  %3213 = vrot.lane.b32.xlu0 %v5153_v15, %s4476_s23  ;;  %v3204_v36 = vmul.f32 %v5169_v48, %v5169_v48 }
 0x1b2   : > { %v4136_v1 = vpop.f32.mrb[4].mxu0  ;;  %v5189_v57 = vmul.f32 %v5183_v12, %v5183_v12 }
 0x1b3   : > { %v4149_v4 = vadd.f32 %v4148_v19, %v4136_v1  ;;  %v3170_v18 = vpop.f32.mrb[5].mxu0 }
 0x1b4   : > { %v4151_v37 = vadd.f32 %v4150_v13, %v3170_v18  ;;  %v4137_v7 = vpop.f32.mrb[6].mxu0 }
 0x1b5   : > { %v4153_v26 = vadd.f32 %v4152_v22, %v4137_v7  ;;  %v3173_v27 = vpop.f32.mrb[7].mxu0  ;;  %3237 = vrot.lane.b32.xlu0 %v5153_v15, %s4477_s24  ;;  %3233 = vrot.lane.b32.xlu1 %v5163_v32, %s4477_s24  ;;  %v3199_v31 = vmax.f32 %v4149_v4, 0.0 }
 0x1b6   : > { %v4155_v46 = vadd.f32 %v4154_v23, %v3173_v27  ;;  %v5191_v58 = vmax.f32 %v4151_v37, 0.0 }
 0x1b7   : > { %v3200_v60 = vmax.f32 %v4153_v26, 0.0  ;;  %v5227_v25 = vmul.f32 %v3199_v31, %v3199_v31 }
 0x1b8   : > { %v5199_v61 = vmul.f32 %v5191_v58, %v5191_v58  ;;  %v5209_v17 = vmax.f32 %v4155_v46, 0.0 }
 0x1b9   : > { %3285 = vrot.lane.b32.xlu0 %v5153_v15, %s4478_s26  ;;  %3281 = vrot.lane.b32.xlu1 %v5163_v32, %s4478_s26  ;;  %v5229_v30 = vmul.f32 %v3200_v60, %v3200_v60 }
 0x1ba   : > { %v5217_v38 = vmul.f32 %v5209_v17, %v5209_v17 }
 0x1bd   : > { %3209 = vrot.lane.b32.xlu0 %v5163_v32, %s4476_s23  ;;  %3215 = vrot.lane.b32.xlu1 %v3204_v36, %s4476_s23 }
 0x1c1   : > { %3257 = vrot.lane.b32.xlu0 %v5163_v32, %s4475_s22  ;;  %3239 = vrot.lane.b32.xlu1 %v3204_v36, %s4477_s24 }
 0x1c5   : > { %3263 = vrot.lane.b32.xlu0 %v3204_v36, %s4475_s22  ;;  %3287 = vrot.lane.b32.xlu1 %v3204_v36, %s4478_s26 }
 0x1c9   : > { %3235 = vrot.lane.b32.xlu0 %v5189_v57, %s4477_s24  ;;  %3211 = vrot.lane.b32.xlu1 %v5189_v57, %s4476_s23 }
 0x1cd   : > { %3259 = vrot.lane.b32.xlu1 %v5189_v57, %s4475_s22  ;;  %3217 = vrot.lane.b32.xlu0 %v5199_v61, %s4476_s23 }
 0x1d1   : > { %3241 = vrot.lane.b32.xlu1 %v5199_v61, %s4477_s24  ;;  %3265 = vrot.lane.b32.xlu0 %v5199_v61, %s4475_s22 }
 0x1d5   : > { %3283 = vrot.lane.b32.xlu1 %v5189_v57, %s4478_s26  ;;  %3289 = vrot.lane.b32.xlu0 %v5199_v61, %s4478_s26 }
 0x1d9   : > { %3243 = vrot.lane.b32.xlu1 %v5217_v38, %s4477_s24  ;;  %3219 = vrot.lane.b32.xlu0 %v5217_v38, %s4476_s23 }
 0x1dd   : > { %3291 = vrot.lane.b32.xlu1 %v5217_v38, %s4478_s26  ;;  %3267 = vrot.lane.b32.xlu0 %v5217_v38, %s4475_s22 }
 0x1e1   : > { %3223 = vrot.lane.b32.xlu1 %v5229_v30, %s4476_s23  ;;  %3221 = vrot.lane.b32.xlu0 %v5227_v25, %s4476_s23 }
 0x1e5   : > { %3247 = vrot.lane.b32.xlu1 %v5229_v30, %s4477_s24  ;;  %3245 = vrot.lane.b32.xlu0 %v5227_v25, %s4477_s24 }
 0x1e9   : > { %3271 = vrot.lane.b32.xlu1 %v5229_v30, %s4475_s22  ;;  %3269 = vrot.lane.b32.xlu0 %v5227_v25, %s4475_s22 }
 0x1ed   : > { %3295 = vrot.lane.b32.xlu1 %v5229_v30, %s4478_s26  ;;  %3293 = vrot.lane.b32.xlu0 %v5227_v25, %s4478_s26 }
 0x223   : > { %v3262_v45 = vpop.permute.xlu1 %3261  ;;  %v3214_v33 = vpop.permute.xlu0 %3213 }
 0x224   : > { %v3227_v54 = vadd.f32 %v3214_v33, %v5153_v15 }
 0x227   : > { %v3238_v49 = vpop.permute.xlu0 %3237  ;;  %v3234_v44 = vpop.permute.xlu1 %3233 }
 0x228   : > { %v3251_v16 = vadd.f32 %v3238_v49, %v3227_v54 }
 0x22a   : > { %v3275_v40 = vadd.f32 %v3262_v45, %v3251_v16 }
 0x22b   : > { %v3286_v3 = vpop.permute.xlu0 %3285  ;;  %v3282_v41 = vpop.permute.xlu1 %3281 }
 0x22c   : > { %v3299_v50 = vadd.f32 %v3286_v3, %v3275_v40 }
 0x22e   : > { %v3307_v62 = vmul.f32 2e-05, %v3299_v50 }
 0x22f   : > { %v3210_v2 = vpop.permute.xlu0 %3209  ;;  %v3216_v43 = vpop.permute.xlu1 %3215 }
 0x230   : > { %v3315_v21 = vadd.f32 1.0, %v3307_v62  ;;  %v3225_v29 = vadd.f32 %v3210_v2, %v5163_v32  ;;  %v3228_v39 = vadd.f32 %v3216_v43, %v3204_v36 }
 0x232   : > { %4433 = vrsqrt.f32 %v3315_v21  ;;  %v3249_v51 = vadd.f32 %v3234_v44, %v3225_v29  ;;  %vm3345_vm8 = vcmp.eq.f32.partialorder %v3315_v21, inf  ;;  %v3348_v24 = vand.u32 2147483648, %v3315_v21 }
 0x233   : > { %v3258_v59 = vpop.permute.xlu0 %3257  ;;  %v3240_v6 = vpop.permute.xlu1 %3239  ;;  %vm3347_vm9 = vcmp.eq.f32.partialorder %v3315_v21, 0.0 }
 0x234   : > { %v3273_v42 = vadd.f32 %v3258_v59, %v3249_v51  ;;  %v3252_v52 = vadd.f32 %v3240_v6, %v3228_v39 }
 0x236   : > { %v3297_v53 = vadd.f32 %v3282_v41, %v3273_v42 }
 0x237   : > { %v3264_v35 = vpop.permute.xlu0 %3263  ;;  %v3288_v11 = vpop.permute.xlu1 %3287 }
 0x238   : > { %v3276_v56 = vadd.f32 %v3264_v35, %v3252_v52  ;;  %v3305_v34 = vmul.f32 2e-05, %v3297_v53 }
 0x23a   : > { %v3300_v0 = vadd.f32 %v3288_v11, %v3276_v56  ;;  %v3313_v9 = vadd.f32 1.0, %v3305_v34 }
 0x23b   : > { %v3236_v63 = vpop.permute.xlu0 %3235  ;;  %v3212_v5 = vpop.permute.xlu1 %3211 }
 0x23c   : > { %v4434_v20 = vpop.eup %4433  ;;  %v3308_v8 = vmul.f32 2e-05, %v3300_v0  ;;  %4435 = vrsqrt.f32 %v3313_v9  ;;  %v3226_v15 = vadd.f32 %v3212_v5, %v5189_v57  ;;  %vm3331_vm10 = vcmp.eq.f32.partialorder %v3313_v9, inf }
 0x23d   : > { %v3344_v55 = vmul.f32 %v4434_v20, %v3315_v21  ;;  %v3334_v60 = vand.u32 2147483648, %v3313_v9  ;;  %vm3333_vm11 = vcmp.eq.f32.partialorder %v3313_v9, 0.0 }
 0x23e   : > { %v3316_v14 = vadd.f32 1.0, %v3308_v8  ;;  %v3250_v23 = vadd.f32 %v3236_v63, %v3226_v15 }
 0x23f   : > { %v3346_v19 = vsel %vm3345_vm8, %v3315_v21, %v3344_v55  ;;  %v3260_v47 = vpop.permute.xlu1 %3259  ;;  %v3218_v13 = vpop.permute.xlu0 %3217  ;;  %vm3443_vm8 = vcmask 253952  }
 0x240   : > { %v3349_v22 = vsel %vm3347_vm9, %v3348_v24, %v3346_v19  ;;  %4437 = vrsqrt.f32 %v3316_v14  ;;  %v3229_v1 = vadd.f32 %v3218_v13, %v5199_v61  ;;  %v3274_v37 = vadd.f32 %v3260_v47, %v3250_v23 }
 0x241   : > { %4439 = vrsqrt.f32 %v3349_v22  ;;  %vm3352_vm12 = vcmp.eq.f32.partialorder %v3316_v14, inf  ;;  %v3355_v40 = vand.u32 2147483648, %v3316_v14  ;;  %vm3354_vm13 = vcmp.eq.f32.partialorder %v3316_v14, 0.0 }
 0x243   : > { %v3242_v32 = vpop.permute.xlu1 %3241  ;;  %v3266_v4 = vpop.permute.xlu0 %3265 }
 0x244   : > { %v3253_v18 = vadd.f32 %v3242_v32, %v3229_v1 }
 0x246   : > { %v3277_v7 = vadd.f32 %v3266_v4, %v3253_v18  ;;  %v4436_v26 = vpop.eup %4435 }
 0x247   : > { %v3284_v27 = vpop.permute.xlu1 %3283  ;;  %v3290_v46 = vpop.permute.xlu0 %3289  ;;  %v3330_v36 = vmul.f32 %v4436_v26, %v3313_v9 }
 0x248   : > { %v3298_v57 = vadd.f32 %v3284_v27, %v3274_v37  ;;  %v3301_v31 = vadd.f32 %v3290_v46, %v3277_v7 }
 0x249   : > { %v3332_v33 = vsel %vm3331_vm10, %v3313_v9, %v3330_v36 }
 0x24a   : > { %v4438_v45 = vpop.eup %4437  ;;  %v3306_v54 = vmul.f32 2e-05, %v3298_v57  ;;  %v3309_v49 = vmul.f32 2e-05, %v3301_v31  ;;  %v3335_v61 = vsel %vm3333_vm11, %v3334_v60, %v3332_v33 }
 0x24b   : > { %v4440_v44 = vpop.eup %4439  ;;  %v3351_v16 = vmul.f32 %v4438_v45, %v3316_v14  ;;  %v3244_v3 = vpop.permute.xlu1 %3243  ;;  %4441 = vrsqrt.f32 %v3335_v61 }
 0x24c   : > { %v3220_v41 = vpop.permute.xlu0 %3219  ;;  %v3395_v50 = vmul.f32 %v4440_v44, %v4434_v20  ;;  %v3314_v62 = vadd.f32 1.0, %v3306_v54  ;;  %v3317_v2 = vadd.f32 1.0, %v3309_v49 }
 0x24d   : > { %v3353_v43 = vsel %vm3352_vm12, %v3316_v14, %v3351_v16  ;;  %v3230_v21 = vadd.f32 %v3220_v41, %v5217_v38 }
 0x24e   : > { %v3403_v29 = vmul.f32 %v3395_v50, %v5149_v10  ;;  %v3356_v51 = vsel %vm3354_vm13, %v3355_v40, %v3353_v43  ;;  %4443 = vrsqrt.f32 %v3314_v62  ;;  %vm3338_vm14 = vcmp.eq.f32.partialorder %v3314_v62, inf }
 0x24f   : > { %4445 = vrsqrt.f32 %v3356_v51  ;;  %v3292_v59 = vpop.permute.xlu1 %3291  ;;  %v3254_v39 = vadd.f32 %v3244_v3, %v3230_v21  ;;  %vm3340_vm15 = vcmp.eq.f32.partialorder %v3314_v62, 0.0  ;;  %v3341_v20 = vand.u32 2147483648, %v3314_v62 }
 0x250   : > { %v3268_v6 = vpop.permute.xlu0 %3267  ;;  %3411 = vst [vmem:[#allocation2 + $0x10] sm:$0xff] %v3403_v29  ;;  %4447 = vrsqrt.f32 %v3317_v2  ;;  %vm3359_vm0 = vcmp.eq.f32.partialorder %v3317_v2, inf  ;;  %v3362_v13 = vand.u32 2147483648, %v3317_v2  ;;  %vm3361_vm1 = vcmp.eq.f32.partialorder %v3317_v2, 0.0 }
 0x251   : > { %v3278_v42 = vadd.f32 %v3268_v6, %v3254_v39 }
 0x253   : > { %v3224_v52 = vpop.permute.xlu1 %3223  ;;  %v3302_v35 = vadd.f32 %v3292_v59, %v3278_v42 }
 0x254   : > { %v3222_v53 = vpop.permute.xlu0 %3221  ;;  %v3232_v14 = vadd.f32 %v3224_v52, %v5229_v30 }
 0x255   : > { %v4442_v11 = vpop.eup %4441  ;;  %v3310_v56 = vmul.f32 2e-05, %v3302_v35  ;;  %v3231_v15 = vadd.f32 %v3222_v53, %v5227_v25 }
 0x256   : > { %v3393_v34 = vmul.f32 %v4442_v11, %v4436_v26 }
 0x257   : > { %v3248_v0 = vpop.permute.xlu1 %3247  ;;  %v3318_v8 = vadd.f32 1.0, %v3310_v56  ;;  %v3445_v43 = vld [vmem:[#allocation2 + $0x14] ss:$2 sm:$0x3] }
 0x258   : > { %v3246_v9 = vpop.permute.xlu0 %3245  ;;  %v4444_v38 = vpop.eup %4443  ;;  %v3401_v63 = vmul.f32 %v3393_v34, %v5155_v28  ;;  %v3256_v32 = vadd.f32 %v3248_v0, %v3232_v14  ;;  %v3446_v21 = vld [vmem:[#allocation2 + $0x15] ss:$2 sm:$0x3] }
 0x259   : > { %v4446_v10 = vpop.eup %4445  ;;  %v3337_v5 = vmul.f32 %v4444_v38, %v3314_v62  ;;  %4449 = vrsqrt.f32 %v3318_v8  ;;  %v3255_v4 = vadd.f32 %v3246_v9, %v3231_v15  ;;  %vm3366_vm2 = vcmp.eq.f32.partialorder %v3318_v8, inf }
 0x25a   : > { %v4448_v55 = vpop.eup %4447  ;;  %v3396_v24 = vmul.f32 %v4446_v10, %v4438_v45  ;;  %3409 = vst [vmem:[#allocation2] sm:$0xff] %v3401_v63  ;;  %v3369_v54 = vand.u32 2147483648, %v3318_v8  ;;  %vm3368_vm3 = vcmp.eq.f32.partialorder %v3318_v8, 0.0  ;;  %v3447_v59 = vmax.f32 %v3445_v43, %v3446_v21 }
 0x25b   : > { %v3339_v19 = vsel %vm3338_vm14, %v3314_v62, %v3337_v5  ;;  %v3358_v47 = vmul.f32 %v4448_v55, %v3317_v2  ;;  %v3272_v22 = vpop.permute.xlu1 %3271 }
 0x25c   : > { %v3270_v23 = vpop.permute.xlu0 %3269  ;;  %v3404_v1 = vmul.f32 %v3396_v24, %v5169_v48  ;;  %v3342_v28 = vsel %vm3340_vm15, %v3341_v20, %v3339_v19  ;;  %v3280_v37 = vadd.f32 %v3272_v22, %v3256_v32  ;;  %v3434_v19 = vld [vmem:[#allocation2 + $0x14] ss:$2 sm:$0x3]  ;;  %v3437_v22 = vld [vmem:[#allocation2 + $0x15] ss:$2 sm:$0x3] }
 0x25d   : > { %4451 = vrsqrt.f32 %v3342_v28  ;;  %v3360_v18 = vsel %vm3359_vm0, %v3317_v2, %v3358_v47  ;;  %v3279_v25 = vadd.f32 %v3270_v23, %v3255_v4 }
 0x25e   : > { %3412 = vst [vmem:[#allocation2 + $0x18] sm:$0xff] %v3404_v1  ;;  %v3363_v30 = vsel %vm3361_vm1, %v3362_v13, %v3360_v18 }
 0x25f   : > { %4453 = vrsqrt.f32 %v3363_v30  ;;  %v3296_v7 = vpop.permute.xlu1 %3295 }
 0x260   : > { %v3294_v26 = vpop.permute.xlu0 %3293  ;;  %v3304_v27 = vadd.f32 %v3296_v7, %v3280_v37 }
 0x261   : > { %v3303_v46 = vadd.f32 %v3294_v26, %v3279_v25  ;;  %v3417_v41 = vld [vmem:[#allocation2] ss:$2 sm:$0x3]  ;;  %v3419_v50 = vld [vmem:[#allocation2 + $0x1] ss:$2 sm:$0x3] }
 0x262   : > { %v3312_v36 = vmul.f32 2e-05, %v3304_v27  ;;  %v3420_v2 = vmax.f32 %v3417_v41, %v3419_v50  ;;  %v3422_v29 = vld [vmem:[#allocation2 + $0x2] ss:$2 sm:$0x3] }
 0x263   : > { %v3311_v57 = vmul.f32 2e-05, %v3303_v46  ;;  %v4450_v31 = vpop.eup %4449 }
 0x264   : > { %v3365_v48 = vmul.f32 %v4450_v31, %v3318_v8  ;;  %v3320_v60 = vadd.f32 1.0, %v3312_v36  ;;  %v3423_v39 = vmax.f32 %v3420_v2, %v3422_v29 }
 0x265   : > { %v3319_v45 = vadd.f32 1.0, %v3311_v57  ;;  %v3448_v6 = vld [vmem:[#allocation2 + $0x16] ss:$2 sm:$0x3] }
 0x266   : > { %v3367_v44 = vsel %vm3366_vm2, %v3318_v8, %v3365_v48  ;;  %4455 = vrsqrt.f32 %v3320_v60  ;;  %vm3380_vm4 = vcmp.eq.f32.partialorder %v3320_v60, inf  ;;  %vm3382_vm5 = vcmp.eq.f32.partialorder %v3320_v60, 0.0  ;;  %v3440_v28 = vld [vmem:[#allocation2 + $0x16] ss:$2 sm:$0x3] }
 0x267   : > { %v4452_v33 = vpop.eup %4451  ;;  %v3370_v16 = vsel %vm3368_vm3, %v3369_v54, %v3367_v44  ;;  %4457 = vrsqrt.f32 %v3319_v45  ;;  %vm3373_vm6 = vcmp.eq.f32.partialorder %v3319_v45, inf  ;;  %v3449_v34 = vmax.f32 %v3447_v59, %v3448_v6 }
 0x268   : > { %v3394_v49 = vmul.f32 %v4452_v33, %v4444_v38  ;;  %4459 = vrsqrt.f32 %v3370_v16  ;;  %vm3375_vm7 = vcmp.eq.f32.partialorder %v3319_v45, 0.0 }
 0x269   : > { %v4454_v61 = vpop.eup %4453 }
 0x26a   : > { %v3402_v40 = vmul.f32 %v3394_v49, %v5183_v12  ;;  %v3397_v3 = vmul.f32 %v4454_v61, %v4448_v55  ;;  %v3383_v12 = vand.u32 2147483648, %v3320_v60 }
 0x26c   : > { %3410 = vst [vmem:[#allocation2 + $0x8] sm:$0xff] %v3402_v40  ;;  %v3405_v62 = vmul.f32 %v3397_v3, %v5191_v58  ;;  %v3376_v58 = vand.u32 2147483648, %v3319_v45 }
 0x26e   : > { %3413 = vst [vmem:[#allocation2 + $0x20] sm:$0xff] %v3405_v62 }
 0x270   : > { %v4456_v51 = vpop.eup %4455 }
 0x271   : > { %v4458_v42 = vpop.eup %4457  ;;  %v3379_v53 = vmul.f32 %v4456_v51, %v3320_v60 }
 0x272   : > { %v4460_v35 = vpop.eup %4459  ;;  %v3372_v56 = vmul.f32 %v4458_v42, %v3319_v45 }
 0x273   : > { %v3425_v52 = vld [vmem:[#allocation2 + $0xa] ss:$2 sm:$0x3]  ;;  %v3428_v0 = vld [vmem:[#allocation2 + $0xb] ss:$2 sm:$0x3]  ;;  %v3398_v38 = vmul.f32 %v4460_v35, %v4450_v31  ;;  %v3381_v10 = vsel %vm3380_vm4, %v3320_v60, %v3379_v53 }
 0x274   : > { %v3426_v11 = vmax.f32 %v3423_v39, %v3425_v52  ;;  %v3384_v5 = vsel %vm3382_vm5, %v3383_v12, %v3381_v10  ;;  %v3374_v20 = vsel %vm3373_vm6, %v3319_v45, %v3372_v56  ;;  %v3431_v8 = vld [vmem:[#allocation2 + $0xc] ss:$2 sm:$0x3] }
 0x275   : > { %v3451_v9 = vld [vmem:[#allocation2 + $0x1e] ss:$2 sm:$0x3]  ;;  %v3406_v24 = vmul.f32 %v3398_v38, %v5209_v17  ;;  %4461 = vrsqrt.f32 %v3384_v5  ;;  %v3377_v14 = vsel %vm3375_vm7, %v3376_v58, %v3374_v20  ;;  %v3454_v13 = vld [vmem:[#allocation2 + $0x1f] ss:$2 sm:$0x3] }
 0x276   : > { %v3429_v63 = vmax.f32 %v3426_v11, %v3428_v0  ;;  %v3452_v55 = vmax.f32 %v3449_v34, %v3451_v9  ;;  %4463 = vrsqrt.f32 %v3377_v14  ;;  %v3457_v4 = vld [vmem:[#allocation2 + $0x20] ss:$2 sm:$0x3] }
 0x277   : > { %3414 = vst [vmem:[#allocation2 + $0x28] sm:$0xff] %v3406_v24 }
 0x278   : > { %v3432_v15 = vmax.f32 %v3429_v63, %v3431_v8  ;;  %v3455_v23 = vmax.f32 %v3452_v55, %v3454_v13 }
 0x27a   : > { %v3435_v47 = vmax.f32 %v3432_v15, %v3434_v19  ;;  %v3458_v18 = vmax.f32 %v3455_v23, %v3457_v4 }
 0x27c   : > { %v3438_v1 = vmax.f32 %v3435_v47, %v3437_v22 }
 0x27e   : > { %v3441_v32 = vmax.f32 %v3438_v1, %v3440_v28  ;;  %v3460_v30 = vld [vmem:[#allocation2 + $0x28] ss:$2 sm:$0x3]  ;;  %v3463_v26 = vld [vmem:[#allocation2 + $0x29] ss:$2 sm:$0x3] }
 0x27f   : > { %v4462_v37 = vpop.eup %4461  ;;  %v3461_v25 = vmax.f32 %v3458_v18, %v3460_v30  ;;  %v3466_v46 = vld [vmem:[#allocation2 + $0x2a] ss:$2 sm:$0x3] }
 0x280   : > { %v3442_v17 = vpack.c.bf16 %v3441_v32, %v3441_v32  ;;  %v4464_v7 = vpop.eup %4463 }
 0x281   : > { %v3464_v27 = vmax.f32 %v3461_v25, %v3463_v26 }
 0x282   : > { %3444 = vst.msk [vmem:[%s168_s30] sm:$0x1] %vm3443_vm8, %v3442_v17 }
 0x283   : > { %v3467_v36 = vmax.f32 %v3464_v27, %v3466_v46 }
 0x285   : > { %v3468_v57 = vpack.c.bf16 %v3467_v36, %v3467_v36 }
 0x287   : > { %3760 = vst.msk [vmem:[%s168_s30 + $0x1] sm:$0x1] %vm3443_vm8, %v3468_v57 }
 0x288 PF: > { %s13_s12 = sadd.s32 1, %s4473_s12  }
 0x289   : > { %p10_p4 = scmp.ge.s32.totalorder %s13_s12, 4  }
 0x28b   :  { %12 = sbr.rel (!%p10_p4) target bundleno = 1 (0x1), region = 101 }

// kernel: forward.7
= control target key start
LH: loop header
LB: loop body
LE: loop exit
PB: predicated region body
PF: predicated region fallthrough
CT: control target
= control target key end

     0   :  { %s1273_s12 = smov 0   ;;  %s1450_s0 = inlined_call_operand.vmem [shape: bf16[2,24,48], index: 0, kind: input, shape index: {}]   ;;  %s1451_s1 = inlined_call_operand.vmem [shape: bf16[9,48,128], index: 1, kind: input, shape index: {}]   ;;  %s1452_s2 = inlined_call_operand.vmem [shape: f32[1,128], index: 2, kind: input, shape index: {}]   ;;  %s1453_s3 = inlined_call_operand.vmem [shape: bf16[2,2,2,48], index: 3, kind: output, shape index: {}]  }
   0x1 LB: > { %s938_s13 = sadd.s32 4294967295, %s1248_s12   ;;  %p942_p0 = scmp.ge.s32.totalorder %s1248_s12, 1  ;;  %s1248_s12 = sphi %s1273_s12, %s13_s12  }
   0x2   : > { %p137_p1 = scmp.lt.s32.totalorder %s1248_s12, 3 }
   0x4   : > { %p138_p2 = pnand %p942_p0, %p137_p1 }
   0x5   : > { %v1208_v0 = vld [vmem:[%s1451_s1] sm:$0xff] (!%p138_p2)   ;;  %v1250_v1 = vmov (!%p138_p2), 0.0   ;;  %v1210_v3 = vld [vmem:[%s1451_s1 + $0x8] sm:$0xff] (!%p138_p2)   ;;  %vm1251_vm0 = vmmov (!%p138_p2), 0   ;;  %p160_p3 = scmp.lt.s32.totalorder (!%p138_p2), %s938_s13, 1  ;;  %v1212_v5 = vld [vmem:[%s1451_s1 + $0x10] sm:$0xff] (!%p138_p2)  }
   0x6   : > { %141 = sbr.rel (%p138_p2) target bundleno = 299 (0x12b), region = 32  ;;  %1076 = vmatprep.subr.bf16.mxu1 (!%p138_p2), %v1250_v1  ;;  %1116 = vmatprep.subr.bf16.mxu0 (!%p138_p2), %v1250_v1  ;;  %v1209_v2 = vld [vmem:[%s1451_s1 + $0x60] sm:$0xff] (!%p138_p2)   ;;  %v1211_v4 = vld [vmem:[%s1451_s1 + $0x68] sm:$0xff] (!%p138_p2)   ;;  %v1213_v6 = vld [vmem:[%s1451_s1 + $0x70] sm:$0xff] (!%p138_p2)   ;;  %vm202_vm1 = vcmask (!%p138_p2), 392192   ;;  %vm864_vm2 = vcmask (!%p138_p2), 385024  }
   0x7   : > { %1077 = vmatpush3.bf16.msra.mxu1 (!%p138_p2), %v1208_v0  ;;  %1082 = vmatprep.mubr.msk.bf16.mxu1 (!%p138_p2), %vm1251_vm0, %v1250_v1  ;;  %v1214_v7 = vld [vmem:[%s1451_s1 + $0x18] sm:$0xff] (!%p138_p2)   ;;  %v1217_v14 = vld [vmem:[%s1451_s1 + $0x20] sm:$0xff] (!%p138_p2)   ;;  %v1219_v25 = vld [vmem:[%s1451_s1 + $0x28] sm:$0xff] (!%p138_p2)  }
   0x8   : > { %1117 = vmatpush3.bf16.msra.mxu0 (!%p138_p2), %v1209_v2  ;;  %1078 = vmatprep.subr.bf16.mxu1 (!%p138_p2), %v1250_v1  ;;  %v1216_v20 = vld [vmem:[%s1451_s1 + $0x78] sm:$0xff] (!%p138_p2)   ;;  %v1218_v24 = vld [vmem:[%s1451_s1 + $0x80] sm:$0xff] (!%p138_p2)   ;;  %v1222_v30 = vld [vmem:[%s1451_s1 + $0x30] sm:$0xff] (!%p138_p2)  }
   0x9   : > { %1118 = vmatprep.subr.bf16.mxu0 (!%p138_p2), %v1250_v1  ;;  %1122 = vmatprep.mubr.msk.bf16.mxu0 (!%p138_p2), %vm1251_vm0, %v1250_v1  ;;  %v1220_v31 = vld [vmem:[%s1451_s1 + $0x88] sm:$0xff] (!%p138_p2)   ;;  %v1225_v33 = vld [vmem:[%s1451_s1 + $0x38] sm:$0xff] (!%p138_p2)   ;;  %v1224_v35 = vld [vmem:[%s1451_s1 + $0x90] sm:$0xff] (!%p138_p2)  }
   0xa   : > { %v1227_v37 = vld [vmem:[%s1451_s1 + $0x40] sm:$0xff] (!%p138_p2)   ;;  %v1226_v38 = vld [vmem:[%s1451_s1 + $0x98] sm:$0xff] (!%p138_p2)   ;;  %v1230_v40 = vld [vmem:[%s1451_s1 + $0x48] sm:$0xff] (!%p138_p2)  }
   0xb   : > { %1079 = vmatpush3.bf16.msra.mxu1 (!%p138_p2), %v1210_v3  ;;  %v1228_v41 = vld [vmem:[%s1451_s1 + $0xa0] sm:$0xff] (!%p138_p2)   ;;  %v1232_v44 = vld [vmem:[%s1451_s1 + $0x50] sm:$0xff] (!%p138_p2)   ;;  %v1231_v48 = vld [vmem:[%s1451_s1 + $0xa8] sm:$0xff] (!%p138_p2)  }
   0xc   : > { %1119 = vmatpush3.bf16.msra.mxu0 (!%p138_p2), %v1211_v4  ;;  %1080 = vmatprep.subr.bf16.mxu1 (!%p138_p2), %v1250_v1  ;;  %v1234_v50 = vld [vmem:[%s1451_s1 + $0x58] sm:$0xff] (!%p138_p2)   ;;  %v1233_v52 = vld [vmem:[%s1451_s1 + $0xb0] sm:$0xff] (!%p138_p2)   ;;  %v1238_v58 = vld [vmem:[%s1451_s1 + $0xc0] sm:$0xff] (!%p138_p2)  }
   0xd   : > { %s1455_s13 = smov (!%p160_p3, %s938_s13), 1  ;;  %1120 = vmatprep.subr.bf16.mxu0 %v1250_v1  ;;  %v1235_v56 = vld [vmem:[%s1451_s1 + $0xb8] sm:$0xff]   ;;  %v1239_v59 = vld [vmem:[%s1451_s1 + $0xc8] sm:$0xff]   ;;  %v1240_v62 = vld [vmem:[%s1451_s1 + $0xd0] sm:$0xff]  }
   0xe   : > { %s1196_s24 = smul.u32 12, %s1455_s13 }
   0xf   : > { %1081 = vmatpush3.bf16.msra.mxu1 %v1212_v5  ;;  %v1252_v5 = vmov 1966171168  }
  0x10   : > { %s1315_s29 = scalar_lea.vmem %s1450_s0, %s1196_s24  ;;  %1121 = vmatpush3.bf16.msra.mxu0 %v1213_v6  ;;  %1086 = vmatprep.subr.bf16.mxu1 %v1250_v1  ;;  %v868_v6 = vunpack.c.l.s4 %v1252_v5  ;;  %s944_s24 = sshll.u32 %s1455_s13, 1 }
  0x11   : > { %v1321_v8 = vld [vmem:[%s1315_s29] sm:$0xc]  ;;  %v480_v9 = vld [vmem:[%s1315_s29 + $0x4] sm:$0x7]  ;;  %1126 = vmatprep.subr.bf16.mxu0 %v1250_v1  ;;  %v706_v43 = vld [vmem:[%s1315_s29 + $0x8] sm:$0x1]  ;;  %s168_s27 = scalar_lea.vmem %s1453_s3, %s944_s24 }
  0x12   : > { %v171_v10 = vld [vmem:[%s1315_s29] sm:$0xf]  ;;  %v989_v11 = vcombine.low %v1321_v8, %v480_v9  ;;  %v247_v16 = vld [vmem:[%s1315_s29 + $0x4] sm:$0x1]  ;;  %v788_v60 = vld [vmem:[%s1315_s29 + $0x4] sm:$0xe] }
  0x13   : > { %1083 = vmatmul.mubr.msk.bf16.vlgmr.msra.gmra.mrb[0].mxu1 %vm202_vm1, %v171_v10  ;;  %v246_v15 = vld [vmem:[%s1315_s29] sm:$0xf]  ;;  %v705_v42 = vld [vmem:[%s1315_s29 + $0x4] sm:$0xf]  ;;  %v1032_v61 = vcombine.low %v788_v60, %v706_v43  ;;  %v869_v10 = vunpack.c.0.s8 %v868_v6 }
  0x14   : > { %v492_v12 = vshrl.u32 %v989_v11, 16  ;;  %v495_v13 = vshll.u32 %v989_v11, 16  ;;  %1087 = vmatpush3.bf16.msra.mxu1 %v1214_v7  ;;  %1092 = vmatprep.mubr.msk.bf16.mxu1 %vm1251_vm0, %v1250_v1  ;;  %v956_v19 = vcombine.low %v246_v15, %v247_v16  ;;  %v561_v27 = vld [vmem:[%s1315_s29] sm:$0x8]  ;;  %v404_v45 = vld [vmem:[%s1315_s29 + $0x4] sm:$0x3]  ;;  %v1021_v46 = vcombine.low %v705_v42, %v706_v43 }
  0x15   : > { %1088 = vmatprep.subr.bf16.mxu1 %v1250_v1  ;;  %v1000_v29 = vcombine.low %v561_v27, %v480_v9  ;;  %v329_v34 = vld [vmem:[%s1315_s29] sm:$0xe]  ;;  %v635_v47 = vld [vmem:[%s1315_s29 + $0x4] sm:$0xf]  ;;  %v978_v49 = vcombine.low %v1321_v8, %v404_v45  ;;  %v799_v63 = vrot.slane %v1032_v61, 1  ;;  %v870_v7 = vlaneseq }
  0x16   : > { %v494_v17 = vrot.slane %v492_v12, 2  ;;  %v497_v18 = vrot.slane %v495_v13, 3  ;;  %v261_v22 = vshrl.u32 %v956_v19, 16  ;;  %v263_v23 = vshll.u32 %v956_v19, 16  ;;  %v945_v8 = vld [vmem:[%s1452_s2] ss:$0 sm:$0xff] }
  0x17   : > { %v572_v32 = vrot.slane %v1000_v29, 3  ;;  %v967_v36 = vcombine.low %v329_v34, %v247_v16  ;;  %v722_v51 = vshll.u32 %v1021_v46, 16  ;;  %v417_v53 = vrot.slane %v978_v49, 2 }
  0x18   : > { %v498_v21 = vor.u32 %v497_v18, %v494_v17  ;;  %1089 = vmatpush3.bf16.msra.mxu1 %v1217_v14  ;;  %v265_v26 = vrot.slane %v263_v23, 1  ;;  %v720_v54 = vshrl.u32 %v1021_v46, 16  ;;  %v871_v11 = vshrl.u32 %v870_v7, 7 }
  0x19   : > { %1090 = vmatprep.subr.bf16.mxu1 %v1250_v1  ;;  %v340_v39 = vrot.slane %v967_v36, 1  ;;  %v724_v55 = vrot.slane %v722_v51, 1 }
  0x1a   : > { %1123 = vmatmul.mubr.msk.bf16.vlgmr.msra.gmra.mrb[0].mxu0 %vm202_vm1, %v498_v21  ;;  %v266_v28 = vor.u32 %v265_v26, %v261_v22  ;;  %v872_v16 = vsub.s32 %v869_v10, %v871_v11 }
  0x1b   : > { %1127 = vmatpush3.bf16.msra.mxu0 %v1216_v20  ;;  %1132 = vmatprep.mubr.msk.bf16.mxu0 %vm1251_vm0, %v1250_v1  ;;  %v725_v57 = vor.u32 %v724_v55, %v720_v54 }
  0x1c   : > { %1128 = vmatprep.subr.bf16.mxu0 %v1250_v1  ;;  %1091 = vmatpush3.bf16.msra.mxu1 %v1219_v25 }
  0x1d   : > { %1096 = vmatprep.subr.bf16.mxu1 %v1250_v1 }
  0x1f   : > { %1129 = vmatpush3.bf16.msra.mxu0 %v1218_v24  ;;  %1093 = vmatmul.mubr.msk.bf16.vlgmr.msra.gmra.mrb[0].mxu1 %vm202_vm1, %v266_v28 }
  0x20   : > { %1130 = vmatprep.subr.bf16.mxu0 %v1250_v1  ;;  %1097 = vmatpush3.bf16.msra.mxu1 %v1222_v30 }
  0x21   : > { %1102 = vmatprep.mubr.msk.bf16.mxu1 %vm1251_vm0, %v1250_v1  ;;  %1098 = vmatprep.subr.bf16.mxu1 %v1250_v1 }
  0x23   : > { %1131 = vmatpush3.bf16.msra.mxu0 %v1220_v31 }
  0x24   : > { %1136 = vmatprep.subr.bf16.mxu0 %v1250_v1  ;;  %1099 = vmatpush3.bf16.msra.mxu1 %v1225_v33 }
  0x25   : > { %1100 = vmatprep.subr.bf16.mxu1 %v1250_v1 }
  0x26   : > { %1133 = vmatmul.mubr.msk.bf16.vlgmr.msra.gmra.mrb[0].mxu0 %vm202_vm1, %v572_v32 }
  0x27   : > { %1137 = vmatpush3.bf16.msra.mxu0 %v1224_v35  ;;  %1142 = vmatprep.mubr.msk.bf16.mxu0 %vm1251_vm0, %v1250_v1 }
  0x28   : > { %1138 = vmatprep.subr.bf16.mxu0 %v1250_v1  ;;  %1101 = vmatpush3.bf16.msra.mxu1 %v1227_v37 }
  0x29   : > { %1106 = vmatprep.subr.bf16.mxu1 %v1250_v1 }
  0x2b   : > { %1139 = vmatpush3.bf16.msra.mxu0 %v1226_v38  ;;  %1103 = vmatmul.mubr.msk.bf16.vlgmr.msra.gmra.mrb[0].mxu1 %vm202_vm1, %v340_v39 }
  0x2c   : > { %1140 = vmatprep.subr.bf16.mxu0 %v1250_v1  ;;  %1107 = vmatpush3.bf16.msra.mxu1 %v1230_v40 }
  0x2d   : > { %1112 = vmatprep.mubr.msk.bf16.mxu1 %vm1251_vm0, %v1250_v1  ;;  %1108 = vmatprep.subr.bf16.mxu1 %v1250_v1 }
  0x2f   : > { %1141 = vmatpush3.bf16.msra.mxu0 %v1228_v41 }
  0x30   : > { %1146 = vmatprep.subr.bf16.mxu0 %v1250_v1  ;;  %1109 = vmatpush3.bf16.msra.mxu1 %v1232_v44 }
  0x31   : > { %1110 = vmatprep.subr.bf16.mxu1 %v1250_v1 }
  0x32   : > { %1143 = vmatmul.mubr.msk.bf16.vlgmr.msra.gmra.mrb[0].mxu0 %vm202_vm1, %v635_v47 }
  0x33   : > { %1147 = vmatpush3.bf16.msra.mxu0 %v1231_v48  ;;  %1152 = vmatprep.mubr.msk.bf16.mxu0 %vm1251_vm0, %v1250_v1 }
  0x34   : > { %1148 = vmatprep.subr.bf16.mxu0 %v1250_v1  ;;  %1111 = vmatpush3.bf16.msra.mxu1 %v1234_v50 }
  0x37   : > { %1149 = vmatpush3.bf16.msra.mxu0 %v1233_v52  ;;  %1113 = vmatmul.mubr.msk.bf16.vlgmr.msra.gmra.mrb[0].mxu1 %vm202_vm1, %v417_v53 }
  0x38   : > { %1150 = vmatprep.subr.bf16.mxu0 %v1250_v1 }
  0x3b   : > { %1151 = vmatpush3.bf16.msra.mxu0 %v1235_v56 }
  0x3c   : > { %1156 = vmatprep.subr.bf16.mxu0 %v1250_v1 }
  0x3e   : > { %1153 = vmatmul.mubr.msk.bf16.vlgmr.msra.gmra.mrb[0].mxu0 %vm202_vm1, %v725_v57 }
  0x3f   : > { %1157 = vmatpush3.bf16.msra.mxu0 %v1238_v58  ;;  %1162 = vmatprep.mubr.msk.bf16.mxu0 %vm1251_vm0, %v1250_v1 }
  0x40   : > { %1158 = vmatprep.subr.bf16.mxu0 %v1250_v1 }
  0x43   : > { %1159 = vmatpush3.bf16.msra.mxu0 %v1239_v59 }
  0x44   : > { %1160 = vmatprep.subr.bf16.mxu0 %v1250_v1 }
  0x47   : > { %1161 = vmatpush3.bf16.msra.mxu0 %v1240_v62 }
  0x4a   : > { %1163 = vmatmul.mubr.msk.bf16.vlgmr.msra.gmra.mrb[0].mxu0 %vm202_vm1, %v799_v63 }
 0x10a   : > { %v473_v0 = vpop.f32.mrb[0].mxu1 }
 0x10b   : > { %v1114_v2 = vpop.f32.mrb[1].mxu1  ;;  %v1166_v9 = vadd.f32 %v945_v8, %v473_v0 }
 0x10c   : > { %v476_v3 = vpop.f32.mrb[2].mxu1 }
 0x10d   : > { %v1115_v4 = vpop.f32.mrb[3].mxu1 }
 0x11d   : > { %v855_v1 = vpop.f32.mrb[0].mxu0 }
 0x11e   : > { %v1167_v12 = vadd.f32 %v1166_v9, %v855_v1  ;;  %v1164_v13 = vpop.f32.mrb[1].mxu0 }
 0x11f   : > { %v858_v14 = vpop.f32.mrb[2].mxu0 }
 0x120   : > { %v862_v15 = vmax.f32 %v1167_v12, 0.0  ;;  %v1165_v17 = vpop.f32.mrb[3].mxu0 }
 0x122   : > { %v863_v18 = vpack.c.bf16 %v862_v15, %v862_v15 }
 0x124   : > { %865 = vst.msk [vmem:[%s168_s27] sm:$0x1] %vm864_vm2, %v863_v18  ;;  %v873_v19 = vrot.slane %v863_v18, %v872_v16 }
 0x126   : > { %v880_v20 = vrot.slane %v873_v19, %v872_v16 }
 0x128   : > { %v881_v21 = vcombine.high %v880_v20, %v880_v20 }
 0x12a   : > { %1037 = vst.msk [vmem:[%s168_s27 + $0x1] sm:$0x1] %vm864_vm2, %v881_v21 }
 0x12b PF: > { %s13_s12 = sadd.s32 1, %s1248_s12  }
 0x12c   : > { %p10_p4 = scmp.ge.s32.totalorder %s13_s12, 4  }
 0x12e   :  { %12 = sbr.rel (!%p10_p4) target bundleno = 1 (0x1), region = 71 }

</bundles_post_ra>
